<compile_context>
chip_gen: v6e
topology: v6e:2x2x1
jax: 0.10.0
libtpu: 0.0.40
codegen_flags: <defaults>
</compile_context>

<pallas_src>
import jax
import jax.numpy as jnp
from jax import lax
from jax.experimental import pallas as pl
from jax.experimental.pallas import tpu as pltpu


def _round_up(x, m):
    return (x + m - 1) // m * m


def seq2seq_kernel(enc_emb_ref, enc_mask_ref, dec_emb_ref,
                   w_ih_e_ref, w_hh_e_ref, b_e_ref,
                   w_ih_d_ref, w_hh_d_ref, b_d_ref,
                   w_att_ref, b_att_ref,
                   w_out_ref, b_out_ref,
                   logp_ref, pred_ref,
                   enc_out_ref, att_out_ref, xg_enc_ref, xg_dec_ref):
    """Whole encoder+decoder forward in one kernel (tiny shapes, no grid)."""
    T_enc, B, HP = enc_out_ref.shape            # B, HP are padded (sublane/lane dense)
    T_dec = att_out_ref.shape[0]
    VP = logp_ref.shape[2]

    # ---- loop-invariant recurrent weights / biases (bf16) -------------------
    wh_e = w_hh_e_ref[...]
    wh_d = w_hh_d_ref[...]
    w_att = w_att_ref[...]
    b_att = b_att_ref[...]

    # ---- input->gate projections batched over all timesteps (out of the loop)
    xg_enc_ref[...] = (
        jnp.dot(enc_emb_ref[...].reshape(T_enc * B, HP).astype(jnp.bfloat16),
                w_ih_e_ref[...], preferred_element_type=jnp.float32)
        + b_e_ref[...]).reshape(T_enc, B, 4 * HP)
    xg_dec_ref[...] = (
        jnp.dot(dec_emb_ref[...].reshape(T_dec * B, HP).astype(jnp.bfloat16),
                w_ih_d_ref[...], preferred_element_type=jnp.float32)
        + b_d_ref[...]).reshape(T_dec, B, 4 * HP)

    def cell(x_gates, h, c, w_hh):
        # PyTorch nn.LSTM gate order: i, f, g, o ; each gate slot is a full
        # 128-lane tile so the slices are whole-vreg selects.
        gates = x_gates + jnp.dot(h.astype(jnp.bfloat16), w_hh,
                                  preferred_element_type=jnp.float32)
        i = jax.nn.sigmoid(gates[:, 0:HP])
        f = jax.nn.sigmoid(gates[:, HP:2 * HP])
        g = jnp.tanh(gates[:, 2 * HP:3 * HP])
        o = jax.nn.sigmoid(gates[:, 3 * HP:4 * HP])
        c_new = f * c + i * g
        h_new = o * jnp.tanh(c_new)
        return h_new, c_new

    zero = jnp.zeros((B, HP), jnp.float32)

    # ---------------- encoder (packed-sequence semantics via length masks) ---
    def enc_step(t, carry):
        h, c = carry
        h_new, c_new = cell(xg_enc_ref[t], h, c, wh_e)
        m = jnp.broadcast_to(enc_mask_ref[t], (B, HP))        # (B, HP) f32 0/1
        enc_out_ref[t] = m * h_new                            # zeros at padded steps
        # h_n / c_n = state at last *valid* timestep of each sequence
        return (h + m * (h_new - h), c + m * (c_new - c))

    h_e, c_e = lax.fori_loop(0, T_enc, enc_step, (zero, zero), unroll=True)

    # ---------------- decoder with teacher forcing + attention ---------------
    def dec_step(t, carry):
        h, c = carry
        h_new, c_new = cell(xg_dec_ref[t], h, c, wh_d)

        # Luong dot attention, softmax over encoder steps (unmasked, as in ref).
        enc_o = enc_out_ref[...]        # re-load each step (cheap vld; frees vregs)
        scores = jnp.sum(enc_o * h_new[None, :, :],
                         axis=-1, keepdims=True)               # (T_enc, B, 1)
        smax = jnp.max(scores, axis=0, keepdims=True)
        e = jnp.exp(scores - smax)
        attn = e / jnp.sum(e, axis=0, keepdims=True)
        mix = jnp.sum(attn * enc_o, axis=0)                    # (B, HP)

        # fused linear_out(cat(mix, output)): one K=2*HP dot
        cat = jnp.concatenate([mix, h_new], axis=-1).astype(jnp.bfloat16)
        att_out_ref[t] = jnp.tanh(
            jnp.dot(cat, w_att, preferred_element_type=jnp.float32) + b_att)
        return (h_new, c_new)

    lax.fori_loop(0, T_dec, dec_step, (h_e, c_e), unroll=True)

    # ---- hoisted output projection + log_softmax + argmax over all steps ----
    att_all = att_out_ref[...].reshape(T_dec * B, HP).astype(jnp.bfloat16)
    logits = (jnp.dot(att_all, w_out_ref[...],
                      preferred_element_type=jnp.float32)
              + b_out_ref[...])                                # (T_dec*B, VP) f32
    m = jnp.max(logits, axis=-1, keepdims=True)
    lse = m + jnp.log(jnp.sum(jnp.exp(logits - m), axis=-1, keepdims=True))
    logp_ref[...] = (logits - lse).reshape(T_dec, B, VP)
    # first-occurrence argmax along lanes (padded vocab cols hold -1e30 -> never max)
    idx = lax.broadcasted_iota(jnp.int32, logits.shape, 1)
    pred = jnp.min(jnp.where(logits == m, idx, VP), axis=-1)
    pred_ref[...] = pred.reshape(T_dec, B).astype(jnp.int32)


def make_params(key, en_voc, zh_voc, hidden):
    H = hidden
    ks = jax.random.split(key, 14)
    s = 0.1
    p = {
        "emb_enc":   jax.random.normal(ks[0], (en_voc, H), jnp.float32) * s,
        "emb_dec":   jax.random.normal(ks[1], (zh_voc, H), jnp.float32) * s,
        "w_ih_e":    jax.random.normal(ks[2], (H, 4 * H), jnp.float32) * s,
        "w_hh_e":    jax.random.normal(ks[3], (H, 4 * H), jnp.float32) * s,
        "b_e":       jax.random.normal(ks[4], (1, 4 * H), jnp.float32) * s,
        "w_ih_d":    jax.random.normal(ks[5], (H, 4 * H), jnp.float32) * s,
        "w_hh_d":    jax.random.normal(ks[6], (H, 4 * H), jnp.float32) * s,
        "b_d":       jax.random.normal(ks[7], (1, 4 * H), jnp.float32) * s,
        "w_att_mix": jax.random.normal(ks[8], (H, H), jnp.float32) * s,
        "w_att_dec": jax.random.normal(ks[9], (H, H), jnp.float32) * s,
        "b_att":     jax.random.normal(ks[10], (1, H), jnp.float32) * s,
        "w_out":     jax.random.normal(ks[11], (H, zh_voc), jnp.float32) * s,
        "b_out":     jax.random.normal(ks[12], (1, zh_voc), jnp.float32) * s,
    }
    return p


def net_forward(params, entext, zh_gtruths, entext_len):
    """Returns (dec_outputs, predicts):
       dec_outputs: (T_dec, B, zh_voc) log-probs  (== stacked list of per-step (B, V))
       predicts:    (B, T_dec) int32 argmax symbols (== torch.cat(sequence_symbols, 1))
    """
    B, T_enc = entext.shape
    T_dec = zh_gtruths.shape[1] - 1                 # teacher forcing uses inputs[:, :-1]
    H = params["w_att_mix"].shape[0]
    V = params["w_out"].shape[1]

    BP = _round_up(B, 8)                            # f32 sublane tile
    HP = _round_up(H, 128)                          # one full lane tile per gate slot
    VP = _round_up(V, 128)                          # lane-dense logits / log_softmax

    # ---- pad parameters into lane-dense kernel layouts (zero-padded) --------
    def pad2(w, shape):
        return jnp.zeros(shape, jnp.float32).at[:w.shape[0], :w.shape[1]].set(w)

    def pad_gates_w(w):        # (H, 4H), gate order i,f,g,o -> (HP, 4*HP) bf16
        out = jnp.zeros((HP, 4 * HP), jnp.float32)
        for k in range(4):
            out = out.at[:H, k * HP:k * HP + H].set(w[:, k * H:(k + 1) * H])
        return out.astype(jnp.bfloat16)

    def pad_gates_b(b):        # (1, 4H) -> (1, 4*HP) f32
        out = jnp.zeros((1, 4 * HP), jnp.float32)
        for k in range(4):
            out = out.at[:, k * HP:k * HP + H].set(b[:, k * H:(k + 1) * H])
        return out

    w_ih_e = pad_gates_w(params["w_ih_e"])
    w_hh_e = pad_gates_w(params["w_hh_e"])
    w_ih_d = pad_gates_w(params["w_ih_d"])
    w_hh_d = pad_gates_w(params["w_hh_d"])
    b_e = pad_gates_b(params["b_e"])
    b_d = pad_gates_b(params["b_d"])
    # fused linear_out weight: rows [0:HP) act on mix, rows [HP:2HP) act on h_new
    w_att = jnp.concatenate(
        [pad2(params["w_att_mix"], (HP, HP)),
         pad2(params["w_att_dec"], (HP, HP))], axis=0).astype(jnp.bfloat16)
    b_att = pad2(params["b_att"], (1, HP))
    w_out = pad2(params["w_out"], (HP, VP)).astype(jnp.bfloat16)
    # padded vocab columns get -1e30 so they never leak into log_softmax / argmax
    b_out = jnp.full((1, VP), -1e30, jnp.float32).at[:, :V].set(params["b_out"])

    # ---- embedding gathers + time-major transpose + batch/hidden padding ----
    def embed(table, ids):                           # ids (B, T) -> (T, BP, HP) f32
        e = table[ids].transpose(1, 0, 2)            # (T, B, H)
        return jnp.pad(e, ((0, 0), (0, BP - B), (0, HP - H)))

    enc_emb = embed(params["emb_enc"], entext)
    dec_emb = embed(params["emb_dec"], zh_gtruths[:, :-1])

    lens = entext_len.astype(jnp.int32)
    mask = (jnp.arange(T_enc, dtype=jnp.int32)[:, None] < lens[None, :]).astype(jnp.float32)
    mask = jnp.pad(mask, ((0, 0), (0, BP - B)))[..., None]   # (T_enc, BP, 1)

    vmem = pl.BlockSpec(memory_space=pltpu.MemorySpace.VMEM)
    logp_full, pred_full = pl.pallas_call(
        seq2seq_kernel,
        out_shape=(jax.ShapeDtypeStruct((T_dec, BP, VP), jnp.float32),
                   jax.ShapeDtypeStruct((T_dec, BP), jnp.int32)),
        in_specs=[vmem] * 13,
        out_specs=(vmem, vmem),
        scratch_shapes=[
            pltpu.VMEM((T_enc, BP, HP), jnp.float32),       # encoder_outputs
            pltpu.VMEM((T_dec, BP, HP), jnp.float32),       # staged att_out (pre-projection)
            pltpu.VMEM((T_enc, BP, 4 * HP), jnp.float32),   # precomputed enc input gates
            pltpu.VMEM((T_dec, BP, 4 * HP), jnp.float32),   # precomputed dec input gates
        ],
    )(enc_emb, mask, dec_emb,
      w_ih_e, w_hh_e, b_e,
      w_ih_d, w_hh_d, b_d,
      w_att, b_att,
      w_out, b_out)

    logp = logp_full[:, :B, :V]                     # strip batch/vocab padding
    predicts = pred_full[:, :B].T                   # (B, T_dec) int32 symbols
    return logp, predicts


if __name__ == "__main__":
    B = 2
    EN_MAXLEN = 8
    ZH_MAXLEN = 6
    H = 32          # en_hidden_size == zh_hidden_size (num_layers=1, unidirectional)
    EN_VOC = 16
    ZH_VOC = 16

    key = jax.random.PRNGKey(0)
    k_par, k_x, k_y = jax.random.split(key, 3)
    params = make_params(k_par, EN_VOC, ZH_VOC, H)

    entext = jax.random.randint(k_x, (B, EN_MAXLEN), 0, EN_VOC, dtype=jnp.int32)
    zh_gtruths = jax.random.randint(k_y, (B, ZH_MAXLEN), 0, ZH_VOC, dtype=jnp.int32)
    entext_len = jnp.array([EN_MAXLEN, 5], dtype=jnp.int32)

    fwd = jax.jit(net_forward)
    dec_outputs, predicts = fwd(params, entext, zh_gtruths, entext_len)
    jax.block_until_ready((dec_outputs, predicts))
    assert dec_outputs.shape == (ZH_MAXLEN - 1, B, ZH_VOC)
    assert predicts.shape == (B, ZH_MAXLEN - 1)
    print("KERNEL_OK")
</pallas_src>

<mosaic_0001>
module attributes {stable_mosaic.version = 11 : i64} {
  func.func @seq2seq_kernel(%arg0: memref<8x8x128xf32, #tpu.memory_space<vmem>>, %arg1: memref<8x8x1xf32, #tpu.memory_space<vmem>>, %arg2: memref<5x8x128xf32, #tpu.memory_space<vmem>>, %arg3: memref<128x512xbf16, #tpu.memory_space<vmem>>, %arg4: memref<128x512xbf16, #tpu.memory_space<vmem>>, %arg5: memref<1x512xf32, #tpu.memory_space<vmem>>, %arg6: memref<128x512xbf16, #tpu.memory_space<vmem>>, %arg7: memref<128x512xbf16, #tpu.memory_space<vmem>>, %arg8: memref<1x512xf32, #tpu.memory_space<vmem>>, %arg9: memref<256x128xbf16, #tpu.memory_space<vmem>>, %arg10: memref<1x128xf32, #tpu.memory_space<vmem>>, %arg11: memref<128x128xbf16, #tpu.memory_space<vmem>>, %arg12: memref<1x128xf32, #tpu.memory_space<vmem>>, %arg13: memref<5x8x128xf32, #tpu.memory_space<vmem>>, %arg14: memref<5x8xi32, #tpu.memory_space<vmem>>, %arg15: memref<8x8x128xf32, #tpu.memory_space<vmem>>, %arg16: memref<5x8x128xf32, #tpu.memory_space<vmem>>, %arg17: memref<8x8x512xf32, #tpu.memory_space<vmem>>, %arg18: memref<5x8x512xf32, #tpu.memory_space<vmem>>) attributes {dimension_semantics = [], scalar_prefetch = 0 : i64, scratch_operands = 4 : i64, tpu.core_type = #tpu.core_type<tc>} {
    %c0 = arith.constant 0 : index
    %c0_0 = arith.constant 0 : index
    %0 = vector.load %arg4[%c0, %c0_0] : memref<128x512xbf16, #tpu.memory_space<vmem>>, vector<128x512xbf16>
    %c0_1 = arith.constant 0 : index
    %c0_2 = arith.constant 0 : index
    %1 = vector.load %arg7[%c0_1, %c0_2] : memref<128x512xbf16, #tpu.memory_space<vmem>>, vector<128x512xbf16>
    %c0_3 = arith.constant 0 : index
    %c0_4 = arith.constant 0 : index
    %2 = vector.load %arg9[%c0_3, %c0_4] : memref<256x128xbf16, #tpu.memory_space<vmem>>, vector<256x128xbf16>
    %c0_5 = arith.constant 0 : index
    %c0_6 = arith.constant 0 : index
    %3 = vector.load %arg10[%c0_5, %c0_6] : memref<1x128xf32, #tpu.memory_space<vmem>>, vector<1x128xf32>
    %c0_7 = arith.constant 0 : index
    %c0_8 = arith.constant 0 : index
    %c0_9 = arith.constant 0 : index
    %4 = vector.load %arg0[%c0_7, %c0_8, %c0_9] : memref<8x8x128xf32, #tpu.memory_space<vmem>>, vector<8x8x128xf32>
    %5 = vector.shape_cast %4 : vector<8x8x128xf32> to vector<64x128xf32>
    %6 = arith.truncf %5 : vector<64x128xf32> to vector<64x128xbf16>
    %c0_10 = arith.constant 0 : index
    %c0_11 = arith.constant 0 : index
    %7 = vector.load %arg3[%c0_10, %c0_11] : memref<128x512xbf16, #tpu.memory_space<vmem>>, vector<128x512xbf16>
    %cst = arith.constant dense<0.000000e+00> : vector<64x512xf32>
    %8 = tpu.matmul %6, %7, %cst {dimension_numbers = #tpu.dot_dimension_numbers<[1], [0], [0], [1], [0, 0, 1, 1], [], []>} : vector<64x128xbf16>, vector<128x512xbf16>, vector<64x512xf32> -> vector<64x512xf32>
    %c0_12 = arith.constant 0 : index
    %c0_13 = arith.constant 0 : index
    %9 = vector.load %arg5[%c0_12, %c0_13] : memref<1x512xf32, #tpu.memory_space<vmem>>, vector<1x512xf32>
    %10 = vector.broadcast %9 : vector<1x512xf32> to vector<64x512xf32>
    %11 = arith.addf %8, %10 : vector<64x512xf32>
    %12 = vector.shape_cast %11 : vector<64x512xf32> to vector<8x8x512xf32>
    %c0_14 = arith.constant 0 : index
    %c0_15 = arith.constant 0 : index
    %c0_16 = arith.constant 0 : index
    %13 = vector.load %arg17[%c0_14, %c0_15, %c0_16] : memref<8x8x512xf32, #tpu.memory_space<vmem>>, vector<8x8x512xf32>
    tpu.vector_store %arg17[%c0_14, %c0_15, %c0_16], %12 {strides = array<i32>} : memref<8x8x512xf32, #tpu.memory_space<vmem>>, vector<8x8x512xf32>,
    %c0_17 = arith.constant 0 : index
    %c0_18 = arith.constant 0 : index
    %c0_19 = arith.constant 0 : index
    %14 = vector.load %arg2[%c0_17, %c0_18, %c0_19] : memref<5x8x128xf32, #tpu.memory_space<vmem>>, vector<5x8x128xf32>
    %15 = vector.shape_cast %14 : vector<5x8x128xf32> to vector<40x128xf32>
    %16 = arith.truncf %15 : vector<40x128xf32> to vector<40x128xbf16>
    %c0_20 = arith.constant 0 : index
    %c0_21 = arith.constant 0 : index
    %17 = vector.load %arg6[%c0_20, %c0_21] : memref<128x512xbf16, #tpu.memory_space<vmem>>, vector<128x512xbf16>
    %cst_22 = arith.constant dense<0.000000e+00> : vector<40x512xf32>
    %18 = tpu.matmul %16, %17, %cst_22 {dimension_numbers = #tpu.dot_dimension_numbers<[1], [0], [0], [1], [0, 0, 1, 1], [], []>} : vector<40x128xbf16>, vector<128x512xbf16>, vector<40x512xf32> -> vector<40x512xf32>
    %c0_23 = arith.constant 0 : index
    %c0_24 = arith.constant 0 : index
    %19 = vector.load %arg8[%c0_23, %c0_24] : memref<1x512xf32, #tpu.memory_space<vmem>>, vector<1x512xf32>
    %20 = vector.broadcast %19 : vector<1x512xf32> to vector<40x512xf32>
    %21 = arith.addf %18, %20 : vector<40x512xf32>
    %22 = vector.shape_cast %21 : vector<40x512xf32> to vector<5x8x512xf32>
    %c0_25 = arith.constant 0 : index
    %c0_26 = arith.constant 0 : index
    %c0_27 = arith.constant 0 : index
    %23 = vector.load %arg18[%c0_25, %c0_26, %c0_27] : memref<5x8x512xf32, #tpu.memory_space<vmem>>, vector<5x8x512xf32>
    tpu.vector_store %arg18[%c0_25, %c0_26, %c0_27], %22 {strides = array<i32>} : memref<5x8x512xf32, #tpu.memory_space<vmem>>, vector<5x8x512xf32>,
    %cst_28 = arith.constant 0.000000e+00 : f32
    %24 = vector.broadcast %cst_28 : f32 to vector<8x128xf32>
    %c0_i32 = arith.constant 0 : i32
    %25 = arith.index_cast %c0_i32 : i32 to index
    %c0_29 = arith.constant 0 : index
    %c0_30 = arith.constant 0 : index
    %26 = vector.load %arg17[%25, %c0_29, %c0_30] : memref<8x8x512xf32, #tpu.memory_space<vmem>>, vector<1x8x512xf32>
    %27 = vector.shape_cast %26 : vector<1x8x512xf32> to vector<8x512xf32>
    %28 = arith.truncf %24 : vector<8x128xf32> to vector<8x128xbf16>
    %cst_31 = arith.constant dense<0.000000e+00> : vector<8x512xf32>
    %29 = tpu.matmul %28, %0, %cst_31 {dimension_numbers = #tpu.dot_dimension_numbers<[1], [0], [0], [1], [0, 0, 1, 1], [], []>} : vector<8x128xbf16>, vector<128x512xbf16>, vector<8x512xf32> -> vector<8x512xf32>
    %30 = arith.addf %27, %29 : vector<8x512xf32>
    %31 = vector.extract_strided_slice %30 {offsets = [0, 0], sizes = [8, 128], strides = [1, 1]} : vector<8x512xf32> to vector<8x128xf32>
    %32 = arith.negf %31 : vector<8x128xf32>
    %33 = math.exp %32 : vector<8x128xf32>
    %cst_32 = arith.constant 1.000000e+00 : f32
    %34 = vector.broadcast %cst_32 : f32 to vector<8x128xf32>
    %35 = arith.addf %34, %33 : vector<8x128xf32>
    %36 = arith.divf %34, %35 : vector<8x128xf32>
    %37 = vector.extract_strided_slice %30 {offsets = [0, 128], sizes = [8, 128], strides = [1, 1]} : vector<8x512xf32> to vector<8x128xf32>
    %38 = arith.negf %37 : vector<8x128xf32>
    %39 = math.exp %38 : vector<8x128xf32>
    %cst_33 = arith.constant 1.000000e+00 : f32
    %40 = vector.broadcast %cst_33 : f32 to vector<8x128xf32>
    %41 = arith.addf %40, %39 : vector<8x128xf32>
    %42 = arith.divf %40, %41 : vector<8x128xf32>
    %43 = vector.extract_strided_slice %30 {offsets = [0, 256], sizes = [8, 128], strides = [1, 1]} : vector<8x512xf32> to vector<8x128xf32>
    %44 = math.tanh %43 : vector<8x128xf32>
    %45 = vector.extract_strided_slice %30 {offsets = [0, 384], sizes = [8, 128], strides = [1, 1]} : vector<8x512xf32> to vector<8x128xf32>
    %46 = arith.negf %45 : vector<8x128xf32>
    %47 = math.exp %46 : vector<8x128xf32>
    %cst_34 = arith.constant 1.000000e+00 : f32
    %48 = vector.broadcast %cst_34 : f32 to vector<8x128xf32>
    %49 = arith.addf %48, %47 : vector<8x128xf32>
    %50 = arith.divf %48, %49 : vector<8x128xf32>
    %51 = arith.mulf %42, %24 : vector<8x128xf32>
    %52 = arith.mulf %36, %44 : vector<8x128xf32>
    %53 = arith.addf %51, %52 : vector<8x128xf32>
    %54 = math.tanh %53 : vector<8x128xf32>
    %55 = arith.mulf %50, %54 : vector<8x128xf32>
    %56 = arith.index_cast %c0_i32 : i32 to index
    %c0_35 = arith.constant 0 : index
    %c0_36 = arith.constant 0 : index
    %57 = vector.load %arg1[%56, %c0_35, %c0_36] : memref<8x8x1xf32, #tpu.memory_space<vmem>>, vector<1x8x1xf32>
    %58 = vector.shape_cast %57 : vector<1x8x1xf32> to vector<8x1xf32>
    %59 = vector.shape_cast %58 : vector<8x1xf32> to vector<8x1xf32>
    %60 = vector.broadcast %59 : vector<8x1xf32> to vector<8x128xf32>
    %61 = arith.mulf %60, %55 : vector<8x128xf32>
    %62 = arith.index_cast %c0_i32 : i32 to index
    %c0_37 = arith.constant 0 : index
    %c0_38 = arith.constant 0 : index
    %63 = vector.load %arg15[%62, %c0_37, %c0_38] : memref<8x8x128xf32, #tpu.memory_space<vmem>>, vector<1x8x128xf32>
    %64 = vector.shape_cast %63 : vector<1x8x128xf32> to vector<8x128xf32>
    %65 = vector.shape_cast %61 : vector<8x128xf32> to vector<1x8x128xf32>
    tpu.vector_store %arg15[%62, %c0_37, %c0_38], %65 {strides = array<i32>} : memref<8x8x128xf32, #tpu.memory_space<vmem>>, vector<1x8x128xf32>,
    %66 = arith.subf %55, %24 : vector<8x128xf32>
    %67 = arith.mulf %60, %66 : vector<8x128xf32>
    %68 = arith.addf %24, %67 : vector<8x128xf32>
    %69 = arith.subf %53, %24 : vector<8x128xf32>
    %70 = arith.mulf %60, %69 : vector<8x128xf32>
    %71 = arith.addf %24, %70 : vector<8x128xf32>
    %c1_i32 = arith.constant 1 : i32
    %72 = arith.index_cast %c1_i32 : i32 to index
    %c0_39 = arith.constant 0 : index
    %c0_40 = arith.constant 0 : index
    %73 = vector.load %arg17[%72, %c0_39, %c0_40] : memref<8x8x512xf32, #tpu.memory_space<vmem>>, vector<1x8x512xf32>
    %74 = vector.shape_cast %73 : vector<1x8x512xf32> to vector<8x512xf32>
    %75 = arith.truncf %68 : vector<8x128xf32> to vector<8x128xbf16>
    %cst_41 = arith.constant dense<0.000000e+00> : vector<8x512xf32>
    %76 = tpu.matmul %75, %0, %cst_41 {dimension_numbers = #tpu.dot_dimension_numbers<[1], [0], [0], [1], [0, 0, 1, 1], [], []>} : vector<8x128xbf16>, vector<128x512xbf16>, vector<8x512xf32> -> vector<8x512xf32>
    %77 = arith.addf %74, %76 : vector<8x512xf32>
    %78 = vector.extract_strided_slice %77 {offsets = [0, 0], sizes = [8, 128], strides = [1, 1]} : vector<8x512xf32> to vector<8x128xf32>
    %79 = arith.negf %78 : vector<8x128xf32>
    %80 = math.exp %79 : vector<8x128xf32>
    %cst_42 = arith.constant 1.000000e+00 : f32
    %81 = vector.broadcast %cst_42 : f32 to vector<8x128xf32>
    %82 = arith.addf %81, %80 : vector<8x128xf32>
    %83 = arith.divf %81, %82 : vector<8x128xf32>
    %84 = vector.extract_strided_slice %77 {offsets = [0, 128], sizes = [8, 128], strides = [1, 1]} : vector<8x512xf32> to vector<8x128xf32>
    %85 = arith.negf %84 : vector<8x128xf32>
    %86 = math.exp %85 : vector<8x128xf32>
    %cst_43 = arith.constant 1.000000e+00 : f32
    %87 = vector.broadcast %cst_43 : f32 to vector<8x128xf32>
    %88 = arith.addf %87, %86 : vector<8x128xf32>
    %89 = arith.divf %87, %88 : vector<8x128xf32>
    %90 = vector.extract_strided_slice %77 {offsets = [0, 256], sizes = [8, 128], strides = [1, 1]} : vector<8x512xf32> to vector<8x128xf32>
    %91 = math.tanh %90 : vector<8x128xf32>
    %92 = vector.extract_strided_slice %77 {offsets = [0, 384], sizes = [8, 128], strides = [1, 1]} : vector<8x512xf32> to vector<8x128xf32>
    %93 = arith.negf %92 : vector<8x128xf32>
    %94 = math.exp %93 : vector<8x128xf32>
    %cst_44 = arith.constant 1.000000e+00 : f32
    %95 = vector.broadcast %cst_44 : f32 to vector<8x128xf32>
    %96 = arith.addf %95, %94 : vector<8x128xf32>
    %97 = arith.divf %95, %96 : vector<8x128xf32>
    %98 = arith.mulf %89, %71 : vector<8x128xf32>
    %99 = arith.mulf %83, %91 : vector<8x128xf32>
    %100 = arith.addf %98, %99 : vector<8x128xf32>
    %101 = math.tanh %100 : vector<8x128xf32>
    %102 = arith.mulf %97, %101 : vector<8x128xf32>
    %103 = arith.index_cast %c1_i32 : i32 to index
    %c0_45 = arith.constant 0 : index
    %c0_46 = arith.constant 0 : index
    %104 = vector.load %arg1[%103, %c0_45, %c0_46] : memref<8x8x1xf32, #tpu.memory_space<vmem>>, vector<1x8x1xf32>
    %105 = vector.shape_cast %104 : vector<1x8x1xf32> to vector<8x1xf32>
    %106 = vector.shape_cast %105 : vector<8x1xf32> to vector<8x1xf32>
    %107 = vector.broadcast %106 : vector<8x1xf32> to vector<8x128xf32>
    %108 = arith.mulf %107, %102 : vector<8x128xf32>
    %109 = arith.index_cast %c1_i32 : i32 to index
    %c0_47 = arith.constant 0 : index
    %c0_48 = arith.constant 0 : index
    %110 = vector.load %arg15[%109, %c0_47, %c0_48] : memref<8x8x128xf32, #tpu.memory_space<vmem>>, vector<1x8x128xf32>
    %111 = vector.shape_cast %110 : vector<1x8x128xf32> to vector<8x128xf32>
    %112 = vector.shape_cast %108 : vector<8x128xf32> to vector<1x8x128xf32>
    tpu.vector_store %arg15[%109, %c0_47, %c0_48], %112 {strides = array<i32>} : memref<8x8x128xf32, #tpu.memory_space<vmem>>, vector<1x8x128xf32>,
    %113 = arith.subf %102, %68 : vector<8x128xf32>
    %114 = arith.mulf %107, %113 : vector<8x128xf32>
    %115 = arith.addf %68, %114 : vector<8x128xf32>
    %116 = arith.subf %100, %71 : vector<8x128xf32>
    %117 = arith.mulf %107, %116 : vector<8x128xf32>
    %118 = arith.addf %71, %117 : vector<8x128xf32>
    %c2_i32 = arith.constant 2 : i32
    %119 = arith.index_cast %c2_i32 : i32 to index
    %c0_49 = arith.constant 0 : index
    %c0_50 = arith.constant 0 : index
    %120 = vector.load %arg17[%119, %c0_49, %c0_50] : memref<8x8x512xf32, #tpu.memory_space<vmem>>, vector<1x8x512xf32>
    %121 = vector.shape_cast %120 : vector<1x8x512xf32> to vector<8x512xf32>
    %122 = arith.truncf %115 : vector<8x128xf32> to vector<8x128xbf16>
    %cst_51 = arith.constant dense<0.000000e+00> : vector<8x512xf32>
    %123 = tpu.matmul %122, %0, %cst_51 {dimension_numbers = #tpu.dot_dimension_numbers<[1], [0], [0], [1], [0, 0, 1, 1], [], []>} : vector<8x128xbf16>, vector<128x512xbf16>, vector<8x512xf32> -> vector<8x512xf32>
    %124 = arith.addf %121, %123 : vector<8x512xf32>
    %125 = vector.extract_strided_slice %124 {offsets = [0, 0], sizes = [8, 128], strides = [1, 1]} : vector<8x512xf32> to vector<8x128xf32>
    %126 = arith.negf %125 : vector<8x128xf32>
    %127 = math.exp %126 : vector<8x128xf32>
    %cst_52 = arith.constant 1.000000e+00 : f32
    %128 = vector.broadcast %cst_52 : f32 to vector<8x128xf32>
    %129 = arith.addf %128, %127 : vector<8x128xf32>
    %130 = arith.divf %128, %129 : vector<8x128xf32>
    %131 = vector.extract_strided_slice %124 {offsets = [0, 128], sizes = [8, 128], strides = [1, 1]} : vector<8x512xf32> to vector<8x128xf32>
    %132 = arith.negf %131 : vector<8x128xf32>
    %133 = math.exp %132 : vector<8x128xf32>
    %cst_53 = arith.constant 1.000000e+00 : f32
    %134 = vector.broadcast %cst_53 : f32 to vector<8x128xf32>
    %135 = arith.addf %134, %133 : vector<8x128xf32>
    %136 = arith.divf %134, %135 : vector<8x128xf32>
    %137 = vector.extract_strided_slice %124 {offsets = [0, 256], sizes = [8, 128], strides = [1, 1]} : vector<8x512xf32> to vector<8x128xf32>
    %138 = math.tanh %137 : vector<8x128xf32>
    %139 = vector.extract_strided_slice %124 {offsets = [0, 384], sizes = [8, 128], strides = [1, 1]} : vector<8x512xf32> to vector<8x128xf32>
    %140 = arith.negf %139 : vector<8x128xf32>
    %141 = math.exp %140 : vector<8x128xf32>
    %cst_54 = arith.constant 1.000000e+00 : f32
    %142 = vector.broadcast %cst_54 : f32 to vector<8x128xf32>
    %143 = arith.addf %142, %141 : vector<8x128xf32>
    %144 = arith.divf %142, %143 : vector<8x128xf32>
    %145 = arith.mulf %136, %118 : vector<8x128xf32>
    %146 = arith.mulf %130, %138 : vector<8x128xf32>
    %147 = arith.addf %145, %146 : vector<8x128xf32>
    %148 = math.tanh %147 : vector<8x128xf32>
    %149 = arith.mulf %144, %148 : vector<8x128xf32>
    %150 = arith.index_cast %c2_i32 : i32 to index
    %c0_55 = arith.constant 0 : index
    %c0_56 = arith.constant 0 : index
    %151 = vector.load %arg1[%150, %c0_55, %c0_56] : memref<8x8x1xf32, #tpu.memory_space<vmem>>, vector<1x8x1xf32>
    %152 = vector.shape_cast %151 : vector<1x8x1xf32> to vector<8x1xf32>
    %153 = vector.shape_cast %152 : vector<8x1xf32> to vector<8x1xf32>
    %154 = vector.broadcast %153 : vector<8x1xf32> to vector<8x128xf32>
    %155 = arith.mulf %154, %149 : vector<8x128xf32>
    %156 = arith.index_cast %c2_i32 : i32 to index
    %c0_57 = arith.constant 0 : index
    %c0_58 = arith.constant 0 : index
    %157 = vector.load %arg15[%156, %c0_57, %c0_58] : memref<8x8x128xf32, #tpu.memory_space<vmem>>, vector<1x8x128xf32>
    %158 = vector.shape_cast %157 : vector<1x8x128xf32> to vector<8x128xf32>
    %159 = vector.shape_cast %155 : vector<8x128xf32> to vector<1x8x128xf32>
    tpu.vector_store %arg15[%156, %c0_57, %c0_58], %159 {strides = array<i32>} : memref<8x8x128xf32, #tpu.memory_space<vmem>>, vector<1x8x128xf32>,
    %160 = arith.subf %149, %115 : vector<8x128xf32>
    %161 = arith.mulf %154, %160 : vector<8x128xf32>
    %162 = arith.addf %115, %161 : vector<8x128xf32>
    %163 = arith.subf %147, %118 : vector<8x128xf32>
    %164 = arith.mulf %154, %163 : vector<8x128xf32>
    %165 = arith.addf %118, %164 : vector<8x128xf32>
    %c3_i32 = arith.constant 3 : i32
    %166 = arith.index_cast %c3_i32 : i32 to index
    %c0_59 = arith.constant 0 : index
    %c0_60 = arith.constant 0 : index
    %167 = vector.load %arg17[%166, %c0_59, %c0_60] : memref<8x8x512xf32, #tpu.memory_space<vmem>>, vector<1x8x512xf32>
    %168 = vector.shape_cast %167 : vector<1x8x512xf32> to vector<8x512xf32>
    %169 = arith.truncf %162 : vector<8x128xf32> to vector<8x128xbf16>
    %cst_61 = arith.constant dense<0.000000e+00> : vector<8x512xf32>
    %170 = tpu.matmul %169, %0, %cst_61 {dimension_numbers = #tpu.dot_dimension_numbers<[1], [0], [0], [1], [0, 0, 1, 1], [], []>} : vector<8x128xbf16>, vector<128x512xbf16>, vector<8x512xf32> -> vector<8x512xf32>
    %171 = arith.addf %168, %170 : vector<8x512xf32>
    %172 = vector.extract_strided_slice %171 {offsets = [0, 0], sizes = [8, 128], strides = [1, 1]} : vector<8x512xf32> to vector<8x128xf32>
    %173 = arith.negf %172 : vector<8x128xf32>
    %174 = math.exp %173 : vector<8x128xf32>
    %cst_62 = arith.constant 1.000000e+00 : f32
    %175 = vector.broadcast %cst_62 : f32 to vector<8x128xf32>
    %176 = arith.addf %175, %174 : vector<8x128xf32>
    %177 = arith.divf %175, %176 : vector<8x128xf32>
    %178 = vector.extract_strided_slice %171 {offsets = [0, 128], sizes = [8, 128], strides = [1, 1]} : vector<8x512xf32> to vector<8x128xf32>
    %179 = arith.negf %178 : vector<8x128xf32>
    %180 = math.exp %179 : vector<8x128xf32>
    %cst_63 = arith.constant 1.000000e+00 : f32
    %181 = vector.broadcast %cst_63 : f32 to vector<8x128xf32>
    %182 = arith.addf %181, %180 : vector<8x128xf32>
    %183 = arith.divf %181, %182 : vector<8x128xf32>
    %184 = vector.extract_strided_slice %171 {offsets = [0, 256], sizes = [8, 128], strides = [1, 1]} : vector<8x512xf32> to vector<8x128xf32>
    %185 = math.tanh %184 : vector<8x128xf32>
    %186 = vector.extract_strided_slice %171 {offsets = [0, 384], sizes = [8, 128], strides = [1, 1]} : vector<8x512xf32> to vector<8x128xf32>
    %187 = arith.negf %186 : vector<8x128xf32>
    %188 = math.exp %187 : vector<8x128xf32>
    %cst_64 = arith.constant 1.000000e+00 : f32
    %189 = vector.broadcast %cst_64 : f32 to vector<8x128xf32>
    %190 = arith.addf %189, %188 : vector<8x128xf32>
    %191 = arith.divf %189, %190 : vector<8x128xf32>
    %192 = arith.mulf %183, %165 : vector<8x128xf32>
    %193 = arith.mulf %177, %185 : vector<8x128xf32>
    %194 = arith.addf %192, %193 : vector<8x128xf32>
    %195 = math.tanh %194 : vector<8x128xf32>
    %196 = arith.mulf %191, %195 : vector<8x128xf32>
    %197 = arith.index_cast %c3_i32 : i32 to index
    %c0_65 = arith.constant 0 : index
    %c0_66 = arith.constant 0 : index
    %198 = vector.load %arg1[%197, %c0_65, %c0_66] : memref<8x8x1xf32, #tpu.memory_space<vmem>>, vector<1x8x1xf32>
    %199 = vector.shape_cast %198 : vector<1x8x1xf32> to vector<8x1xf32>
    %200 = vector.shape_cast %199 : vector<8x1xf32> to vector<8x1xf32>
    %201 = vector.broadcast %200 : vector<8x1xf32> to vector<8x128xf32>
    %202 = arith.mulf %201, %196 : vector<8x128xf32>
    %203 = arith.index_cast %c3_i32 : i32 to index
    %c0_67 = arith.constant 0 : index
    %c0_68 = arith.constant 0 : index
    %204 = vector.load %arg15[%203, %c0_67, %c0_68] : memref<8x8x128xf32, #tpu.memory_space<vmem>>, vector<1x8x128xf32>
    %205 = vector.shape_cast %204 : vector<1x8x128xf32> to vector<8x128xf32>
    %206 = vector.shape_cast %202 : vector<8x128xf32> to vector<1x8x128xf32>
    tpu.vector_store %arg15[%203, %c0_67, %c0_68], %206 {strides = array<i32>} : memref<8x8x128xf32, #tpu.memory_space<vmem>>, vector<1x8x128xf32>,
    %207 = arith.subf %196, %162 : vector<8x128xf32>
    %208 = arith.mulf %201, %207 : vector<8x128xf32>
    %209 = arith.addf %162, %208 : vector<8x128xf32>
    %210 = arith.subf %194, %165 : vector<8x128xf32>
    %211 = arith.mulf %201, %210 : vector<8x128xf32>
    %212 = arith.addf %165, %211 : vector<8x128xf32>
    %c4_i32 = arith.constant 4 : i32
    %213 = arith.index_cast %c4_i32 : i32 to index
    %c0_69 = arith.constant 0 : index
    %c0_70 = arith.constant 0 : index
    %214 = vector.load %arg17[%213, %c0_69, %c0_70] : memref<8x8x512xf32, #tpu.memory_space<vmem>>, vector<1x8x512xf32>
    %215 = vector.shape_cast %214 : vector<1x8x512xf32> to vector<8x512xf32>
    %216 = arith.truncf %209 : vector<8x128xf32> to vector<8x128xbf16>
    %cst_71 = arith.constant dense<0.000000e+00> : vector<8x512xf32>
    %217 = tpu.matmul %216, %0, %cst_71 {dimension_numbers = #tpu.dot_dimension_numbers<[1], [0], [0], [1], [0, 0, 1, 1], [], []>} : vector<8x128xbf16>, vector<128x512xbf16>, vector<8x512xf32> -> vector<8x512xf32>
    %218 = arith.addf %215, %217 : vector<8x512xf32>
    %219 = vector.extract_strided_slice %218 {offsets = [0, 0], sizes = [8, 128], strides = [1, 1]} : vector<8x512xf32> to vector<8x128xf32>
    %220 = arith.negf %219 : vector<8x128xf32>
    %221 = math.exp %220 : vector<8x128xf32>
    %cst_72 = arith.constant 1.000000e+00 : f32
    %222 = vector.broadcast %cst_72 : f32 to vector<8x128xf32>
    %223 = arith.addf %222, %221 : vector<8x128xf32>
    %224 = arith.divf %222, %223 : vector<8x128xf32>
    %225 = vector.extract_strided_slice %218 {offsets = [0, 128], sizes = [8, 128], strides = [1, 1]} : vector<8x512xf32> to vector<8x128xf32>
    %226 = arith.negf %225 : vector<8x128xf32>
    %227 = math.exp %226 : vector<8x128xf32>
    %cst_73 = arith.constant 1.000000e+00 : f32
    %228 = vector.broadcast %cst_73 : f32 to vector<8x128xf32>
    %229 = arith.addf %228, %227 : vector<8x128xf32>
    %230 = arith.divf %228, %229 : vector<8x128xf32>
    %231 = vector.extract_strided_slice %218 {offsets = [0, 256], sizes = [8, 128], strides = [1, 1]} : vector<8x512xf32> to vector<8x128xf32>
    %232 = math.tanh %231 : vector<8x128xf32>
    %233 = vector.extract_strided_slice %218 {offsets = [0, 384], sizes = [8, 128], strides = [1, 1]} : vector<8x512xf32> to vector<8x128xf32>
    %234 = arith.negf %233 : vector<8x128xf32>
    %235 = math.exp %234 : vector<8x128xf32>
    %cst_74 = arith.constant 1.000000e+00 : f32
    %236 = vector.broadcast %cst_74 : f32 to vector<8x128xf32>
    %237 = arith.addf %236, %235 : vector<8x128xf32>
    %238 = arith.divf %236, %237 : vector<8x128xf32>
    %239 = arith.mulf %230, %212 : vector<8x128xf32>
    %240 = arith.mulf %224, %232 : vector<8x128xf32>
    %241 = arith.addf %239, %240 : vector<8x128xf32>
    %242 = math.tanh %241 : vector<8x128xf32>
    %243 = arith.mulf %238, %242 : vector<8x128xf32>
    %244 = arith.index_cast %c4_i32 : i32 to index
    %c0_75 = arith.constant 0 : index
    %c0_76 = arith.constant 0 : index
    %245 = vector.load %arg1[%244, %c0_75, %c0_76] : memref<8x8x1xf32, #tpu.memory_space<vmem>>, vector<1x8x1xf32>
    %246 = vector.shape_cast %245 : vector<1x8x1xf32> to vector<8x1xf32>
    %247 = vector.shape_cast %246 : vector<8x1xf32> to vector<8x1xf32>
    %248 = vector.broadcast %247 : vector<8x1xf32> to vector<8x128xf32>
    %249 = arith.mulf %248, %243 : vector<8x128xf32>
    %250 = arith.index_cast %c4_i32 : i32 to index
    %c0_77 = arith.constant 0 : index
    %c0_78 = arith.constant 0 : index
    %251 = vector.load %arg15[%250, %c0_77, %c0_78] : memref<8x8x128xf32, #tpu.memory_space<vmem>>, vector<1x8x128xf32>
    %252 = vector.shape_cast %251 : vector<1x8x128xf32> to vector<8x128xf32>
    %253 = vector.shape_cast %249 : vector<8x128xf32> to vector<1x8x128xf32>
    tpu.vector_store %arg15[%250, %c0_77, %c0_78], %253 {strides = array<i32>} : memref<8x8x128xf32, #tpu.memory_space<vmem>>, vector<1x8x128xf32>,
    %254 = arith.subf %243, %209 : vector<8x128xf32>
    %255 = arith.mulf %248, %254 : vector<8x128xf32>
    %256 = arith.addf %209, %255 : vector<8x128xf32>
    %257 = arith.subf %241, %212 : vector<8x128xf32>
    %258 = arith.mulf %248, %257 : vector<8x128xf32>
    %259 = arith.addf %212, %258 : vector<8x128xf32>
    %c5_i32 = arith.constant 5 : i32
    %260 = arith.index_cast %c5_i32 : i32 to index
    %c0_79 = arith.constant 0 : index
    %c0_80 = arith.constant 0 : index
    %261 = vector.load %arg17[%260, %c0_79, %c0_80] : memref<8x8x512xf32, #tpu.memory_space<vmem>>, vector<1x8x512xf32>
    %262 = vector.shape_cast %261 : vector<1x8x512xf32> to vector<8x512xf32>
    %263 = arith.truncf %256 : vector<8x128xf32> to vector<8x128xbf16>
    %cst_81 = arith.constant dense<0.000000e+00> : vector<8x512xf32>
    %264 = tpu.matmul %263, %0, %cst_81 {dimension_numbers = #tpu.dot_dimension_numbers<[1], [0], [0], [1], [0, 0, 1, 1], [], []>} : vector<8x128xbf16>, vector<128x512xbf16>, vector<8x512xf32> -> vector<8x512xf32>
    %265 = arith.addf %262, %264 : vector<8x512xf32>
    %266 = vector.extract_strided_slice %265 {offsets = [0, 0], sizes = [8, 128], strides = [1, 1]} : vector<8x512xf32> to vector<8x128xf32>
    %267 = arith.negf %266 : vector<8x128xf32>
    %268 = math.exp %267 : vector<8x128xf32>
    %cst_82 = arith.constant 1.000000e+00 : f32
    %269 = vector.broadcast %cst_82 : f32 to vector<8x128xf32>
    %270 = arith.addf %269, %268 : vector<8x128xf32>
    %271 = arith.divf %269, %270 : vector<8x128xf32>
    %272 = vector.extract_strided_slice %265 {offsets = [0, 128], sizes = [8, 128], strides = [1, 1]} : vector<8x512xf32> to vector<8x128xf32>
    %273 = arith.negf %272 : vector<8x128xf32>
    %274 = math.exp %273 : vector<8x128xf32>
    %cst_83 = arith.constant 1.000000e+00 : f32
    %275 = vector.broadcast %cst_83 : f32 to vector<8x128xf32>
    %276 = arith.addf %275, %274 : vector<8x128xf32>
    %277 = arith.divf %275, %276 : vector<8x128xf32>
    %278 = vector.extract_strided_slice %265 {offsets = [0, 256], sizes = [8, 128], strides = [1, 1]} : vector<8x512xf32> to vector<8x128xf32>
    %279 = math.tanh %278 : vector<8x128xf32>
    %280 = vector.extract_strided_slice %265 {offsets = [0, 384], sizes = [8, 128], strides = [1, 1]} : vector<8x512xf32> to vector<8x128xf32>
    %281 = arith.negf %280 : vector<8x128xf32>
    %282 = math.exp %281 : vector<8x128xf32>
    %cst_84 = arith.constant 1.000000e+00 : f32
    %283 = vector.broadcast %cst_84 : f32 to vector<8x128xf32>
    %284 = arith.addf %283, %282 : vector<8x128xf32>
    %285 = arith.divf %283, %284 : vector<8x128xf32>
    %286 = arith.mulf %277, %259 : vector<8x128xf32>
    %287 = arith.mulf %271, %279 : vector<8x128xf32>
    %288 = arith.addf %286, %287 : vector<8x128xf32>
    %289 = math.tanh %288 : vector<8x128xf32>
    %290 = arith.mulf %285, %289 : vector<8x128xf32>
    %291 = arith.index_cast %c5_i32 : i32 to index
    %c0_85 = arith.constant 0 : index
    %c0_86 = arith.constant 0 : index
    %292 = vector.load %arg1[%291, %c0_85, %c0_86] : memref<8x8x1xf32, #tpu.memory_space<vmem>>, vector<1x8x1xf32>
    %293 = vector.shape_cast %292 : vector<1x8x1xf32> to vector<8x1xf32>
    %294 = vector.shape_cast %293 : vector<8x1xf32> to vector<8x1xf32>
    %295 = vector.broadcast %294 : vector<8x1xf32> to vector<8x128xf32>
    %296 = arith.mulf %295, %290 : vector<8x128xf32>
    %297 = arith.index_cast %c5_i32 : i32 to index
    %c0_87 = arith.constant 0 : index
    %c0_88 = arith.constant 0 : index
    %298 = vector.load %arg15[%297, %c0_87, %c0_88] : memref<8x8x128xf32, #tpu.memory_space<vmem>>, vector<1x8x128xf32>
    %299 = vector.shape_cast %298 : vector<1x8x128xf32> to vector<8x128xf32>
    %300 = vector.shape_cast %296 : vector<8x128xf32> to vector<1x8x128xf32>
    tpu.vector_store %arg15[%297, %c0_87, %c0_88], %300 {strides = array<i32>} : memref<8x8x128xf32, #tpu.memory_space<vmem>>, vector<1x8x128xf32>,
    %301 = arith.subf %290, %256 : vector<8x128xf32>
    %302 = arith.mulf %295, %301 : vector<8x128xf32>
    %303 = arith.addf %256, %302 : vector<8x128xf32>
    %304 = arith.subf %288, %259 : vector<8x128xf32>
    %305 = arith.mulf %295, %304 : vector<8x128xf32>
    %306 = arith.addf %259, %305 : vector<8x128xf32>
    %c6_i32 = arith.constant 6 : i32
    %307 = arith.index_cast %c6_i32 : i32 to index
    %c0_89 = arith.constant 0 : index
    %c0_90 = arith.constant 0 : index
    %308 = vector.load %arg17[%307, %c0_89, %c0_90] : memref<8x8x512xf32, #tpu.memory_space<vmem>>, vector<1x8x512xf32>
    %309 = vector.shape_cast %308 : vector<1x8x512xf32> to vector<8x512xf32>
    %310 = arith.truncf %303 : vector<8x128xf32> to vector<8x128xbf16>
    %cst_91 = arith.constant dense<0.000000e+00> : vector<8x512xf32>
    %311 = tpu.matmul %310, %0, %cst_91 {dimension_numbers = #tpu.dot_dimension_numbers<[1], [0], [0], [1], [0, 0, 1, 1], [], []>} : vector<8x128xbf16>, vector<128x512xbf16>, vector<8x512xf32> -> vector<8x512xf32>
    %312 = arith.addf %309, %311 : vector<8x512xf32>
    %313 = vector.extract_strided_slice %312 {offsets = [0, 0], sizes = [8, 128], strides = [1, 1]} : vector<8x512xf32> to vector<8x128xf32>
    %314 = arith.negf %313 : vector<8x128xf32>
    %315 = math.exp %314 : vector<8x128xf32>
    %cst_92 = arith.constant 1.000000e+00 : f32
    %316 = vector.broadcast %cst_92 : f32 to vector<8x128xf32>
    %317 = arith.addf %316, %315 : vector<8x128xf32>
    %318 = arith.divf %316, %317 : vector<8x128xf32>
    %319 = vector.extract_strided_slice %312 {offsets = [0, 128], sizes = [8, 128], strides = [1, 1]} : vector<8x512xf32> to vector<8x128xf32>
    %320 = arith.negf %319 : vector<8x128xf32>
    %321 = math.exp %320 : vector<8x128xf32>
    %cst_93 = arith.constant 1.000000e+00 : f32
    %322 = vector.broadcast %cst_93 : f32 to vector<8x128xf32>
    %323 = arith.addf %322, %321 : vector<8x128xf32>
    %324 = arith.divf %322, %323 : vector<8x128xf32>
    %325 = vector.extract_strided_slice %312 {offsets = [0, 256], sizes = [8, 128], strides = [1, 1]} : vector<8x512xf32> to vector<8x128xf32>
    %326 = math.tanh %325 : vector<8x128xf32>
    %327 = vector.extract_strided_slice %312 {offsets = [0, 384], sizes = [8, 128], strides = [1, 1]} : vector<8x512xf32> to vector<8x128xf32>
    %328 = arith.negf %327 : vector<8x128xf32>
    %329 = math.exp %328 : vector<8x128xf32>
    %cst_94 = arith.constant 1.000000e+00 : f32
    %330 = vector.broadcast %cst_94 : f32 to vector<8x128xf32>
    %331 = arith.addf %330, %329 : vector<8x128xf32>
    %332 = arith.divf %330, %331 : vector<8x128xf32>
    %333 = arith.mulf %324, %306 : vector<8x128xf32>
    %334 = arith.mulf %318, %326 : vector<8x128xf32>
    %335 = arith.addf %333, %334 : vector<8x128xf32>
    %336 = math.tanh %335 : vector<8x128xf32>
    %337 = arith.mulf %332, %336 : vector<8x128xf32>
    %338 = arith.index_cast %c6_i32 : i32 to index
    %c0_95 = arith.constant 0 : index
    %c0_96 = arith.constant 0 : index
    %339 = vector.load %arg1[%338, %c0_95, %c0_96] : memref<8x8x1xf32, #tpu.memory_space<vmem>>, vector<1x8x1xf32>
    %340 = vector.shape_cast %339 : vector<1x8x1xf32> to vector<8x1xf32>
    %341 = vector.shape_cast %340 : vector<8x1xf32> to vector<8x1xf32>
    %342 = vector.broadcast %341 : vector<8x1xf32> to vector<8x128xf32>
    %343 = arith.mulf %342, %337 : vector<8x128xf32>
    %344 = arith.index_cast %c6_i32 : i32 to index
    %c0_97 = arith.constant 0 : index
    %c0_98 = arith.constant 0 : index
    %345 = vector.load %arg15[%344, %c0_97, %c0_98] : memref<8x8x128xf32, #tpu.memory_space<vmem>>, vector<1x8x128xf32>
    %346 = vector.shape_cast %345 : vector<1x8x128xf32> to vector<8x128xf32>
    %347 = vector.shape_cast %343 : vector<8x128xf32> to vector<1x8x128xf32>
    tpu.vector_store %arg15[%344, %c0_97, %c0_98], %347 {strides = array<i32>} : memref<8x8x128xf32, #tpu.memory_space<vmem>>, vector<1x8x128xf32>,
    %348 = arith.subf %337, %303 : vector<8x128xf32>
    %349 = arith.mulf %342, %348 : vector<8x128xf32>
    %350 = arith.addf %303, %349 : vector<8x128xf32>
    %351 = arith.subf %335, %306 : vector<8x128xf32>
    %352 = arith.mulf %342, %351 : vector<8x128xf32>
    %353 = arith.addf %306, %352 : vector<8x128xf32>
    %c7_i32 = arith.constant 7 : i32
    %354 = arith.index_cast %c7_i32 : i32 to index
    %c0_99 = arith.constant 0 : index
    %c0_100 = arith.constant 0 : index
    %355 = vector.load %arg17[%354, %c0_99, %c0_100] : memref<8x8x512xf32, #tpu.memory_space<vmem>>, vector<1x8x512xf32>
    %356 = vector.shape_cast %355 : vector<1x8x512xf32> to vector<8x512xf32>
    %357 = arith.truncf %350 : vector<8x128xf32> to vector<8x128xbf16>
    %cst_101 = arith.constant dense<0.000000e+00> : vector<8x512xf32>
    %358 = tpu.matmul %357, %0, %cst_101 {dimension_numbers = #tpu.dot_dimension_numbers<[1], [0], [0], [1], [0, 0, 1, 1], [], []>} : vector<8x128xbf16>, vector<128x512xbf16>, vector<8x512xf32> -> vector<8x512xf32>
    %359 = arith.addf %356, %358 : vector<8x512xf32>
    %360 = vector.extract_strided_slice %359 {offsets = [0, 0], sizes = [8, 128], strides = [1, 1]} : vector<8x512xf32> to vector<8x128xf32>
    %361 = arith.negf %360 : vector<8x128xf32>
    %362 = math.exp %361 : vector<8x128xf32>
    %cst_102 = arith.constant 1.000000e+00 : f32
    %363 = vector.broadcast %cst_102 : f32 to vector<8x128xf32>
    %364 = arith.addf %363, %362 : vector<8x128xf32>
    %365 = arith.divf %363, %364 : vector<8x128xf32>
    %366 = vector.extract_strided_slice %359 {offsets = [0, 128], sizes = [8, 128], strides = [1, 1]} : vector<8x512xf32> to vector<8x128xf32>
    %367 = arith.negf %366 : vector<8x128xf32>
    %368 = math.exp %367 : vector<8x128xf32>
    %cst_103 = arith.constant 1.000000e+00 : f32
    %369 = vector.broadcast %cst_103 : f32 to vector<8x128xf32>
    %370 = arith.addf %369, %368 : vector<8x128xf32>
    %371 = arith.divf %369, %370 : vector<8x128xf32>
    %372 = vector.extract_strided_slice %359 {offsets = [0, 256], sizes = [8, 128], strides = [1, 1]} : vector<8x512xf32> to vector<8x128xf32>
    %373 = math.tanh %372 : vector<8x128xf32>
    %374 = vector.extract_strided_slice %359 {offsets = [0, 384], sizes = [8, 128], strides = [1, 1]} : vector<8x512xf32> to vector<8x128xf32>
    %375 = arith.negf %374 : vector<8x128xf32>
    %376 = math.exp %375 : vector<8x128xf32>
    %cst_104 = arith.constant 1.000000e+00 : f32
    %377 = vector.broadcast %cst_104 : f32 to vector<8x128xf32>
    %378 = arith.addf %377, %376 : vector<8x128xf32>
    %379 = arith.divf %377, %378 : vector<8x128xf32>
    %380 = arith.mulf %371, %353 : vector<8x128xf32>
    %381 = arith.mulf %365, %373 : vector<8x128xf32>
    %382 = arith.addf %380, %381 : vector<8x128xf32>
    %383 = math.tanh %382 : vector<8x128xf32>
    %384 = arith.mulf %379, %383 : vector<8x128xf32>
    %385 = arith.index_cast %c7_i32 : i32 to index
    %c0_105 = arith.constant 0 : index
    %c0_106 = arith.constant 0 : index
    %386 = vector.load %arg1[%385, %c0_105, %c0_106] : memref<8x8x1xf32, #tpu.memory_space<vmem>>, vector<1x8x1xf32>
    %387 = vector.shape_cast %386 : vector<1x8x1xf32> to vector<8x1xf32>
    %388 = vector.shape_cast %387 : vector<8x1xf32> to vector<8x1xf32>
    %389 = vector.broadcast %388 : vector<8x1xf32> to vector<8x128xf32>
    %390 = arith.mulf %389, %384 : vector<8x128xf32>
    %391 = arith.index_cast %c7_i32 : i32 to index
    %c0_107 = arith.constant 0 : index
    %c0_108 = arith.constant 0 : index
    %392 = vector.load %arg15[%391, %c0_107, %c0_108] : memref<8x8x128xf32, #tpu.memory_space<vmem>>, vector<1x8x128xf32>
    %393 = vector.shape_cast %392 : vector<1x8x128xf32> to vector<8x128xf32>
    %394 = vector.shape_cast %390 : vector<8x128xf32> to vector<1x8x128xf32>
    tpu.vector_store %arg15[%391, %c0_107, %c0_108], %394 {strides = array<i32>} : memref<8x8x128xf32, #tpu.memory_space<vmem>>, vector<1x8x128xf32>,
    %395 = arith.subf %384, %350 : vector<8x128xf32>
    %396 = arith.mulf %389, %395 : vector<8x128xf32>
    %397 = arith.addf %350, %396 : vector<8x128xf32>
    %398 = arith.subf %382, %353 : vector<8x128xf32>
    %399 = arith.mulf %389, %398 : vector<8x128xf32>
    %400 = arith.addf %353, %399 : vector<8x128xf32>
    %c8_i32 = arith.constant 8 : i32
    %c0_i32_109 = arith.constant 0 : i32
    %401 = arith.index_cast %c0_i32_109 : i32 to index
    %c0_110 = arith.constant 0 : index
    %c0_111 = arith.constant 0 : index
    %402 = vector.load %arg18[%401, %c0_110, %c0_111] : memref<5x8x512xf32, #tpu.memory_space<vmem>>, vector<1x8x512xf32>
    %403 = vector.shape_cast %402 : vector<1x8x512xf32> to vector<8x512xf32>
    %404 = arith.truncf %397 : vector<8x128xf32> to vector<8x128xbf16>
    %cst_112 = arith.constant dense<0.000000e+00> : vector<8x512xf32>
    %405 = tpu.matmul %404, %1, %cst_112 {dimension_numbers = #tpu.dot_dimension_numbers<[1], [0], [0], [1], [0, 0, 1, 1], [], []>} : vector<8x128xbf16>, vector<128x512xbf16>, vector<8x512xf32> -> vector<8x512xf32>
    %406 = arith.addf %403, %405 : vector<8x512xf32>
    %407 = vector.extract_strided_slice %406 {offsets = [0, 0], sizes = [8, 128], strides = [1, 1]} : vector<8x512xf32> to vector<8x128xf32>
    %408 = arith.negf %407 : vector<8x128xf32>
    %409 = math.exp %408 : vector<8x128xf32>
    %cst_113 = arith.constant 1.000000e+00 : f32
    %410 = vector.broadcast %cst_113 : f32 to vector<8x128xf32>
    %411 = arith.addf %410, %409 : vector<8x128xf32>
    %412 = arith.divf %410, %411 : vector<8x128xf32>
    %413 = vector.extract_strided_slice %406 {offsets = [0, 128], sizes = [8, 128], strides = [1, 1]} : vector<8x512xf32> to vector<8x128xf32>
    %414 = arith.negf %413 : vector<8x128xf32>
    %415 = math.exp %414 : vector<8x128xf32>
    %cst_114 = arith.constant 1.000000e+00 : f32
    %416 = vector.broadcast %cst_114 : f32 to vector<8x128xf32>
    %417 = arith.addf %416, %415 : vector<8x128xf32>
    %418 = arith.divf %416, %417 : vector<8x128xf32>
    %419 = vector.extract_strided_slice %406 {offsets = [0, 256], sizes = [8, 128], strides = [1, 1]} : vector<8x512xf32> to vector<8x128xf32>
    %420 = math.tanh %419 : vector<8x128xf32>
    %421 = vector.extract_strided_slice %406 {offsets = [0, 384], sizes = [8, 128], strides = [1, 1]} : vector<8x512xf32> to vector<8x128xf32>
    %422 = arith.negf %421 : vector<8x128xf32>
    %423 = math.exp %422 : vector<8x128xf32>
    %cst_115 = arith.constant 1.000000e+00 : f32
    %424 = vector.broadcast %cst_115 : f32 to vector<8x128xf32>
    %425 = arith.addf %424, %423 : vector<8x128xf32>
    %426 = arith.divf %424, %425 : vector<8x128xf32>
    %427 = arith.mulf %418, %400 : vector<8x128xf32>
    %428 = arith.mulf %412, %420 : vector<8x128xf32>
    %429 = arith.addf %427, %428 : vector<8x128xf32>
    %430 = math.tanh %429 : vector<8x128xf32>
    %431 = arith.mulf %426, %430 : vector<8x128xf32>
    %c0_116 = arith.constant 0 : index
    %c0_117 = arith.constant 0 : index
    %c0_118 = arith.constant 0 : index
    %432 = vector.load %arg15[%c0_116, %c0_117, %c0_118] : memref<8x8x128xf32, #tpu.memory_space<vmem>>, vector<8x8x128xf32>
    %433 = vector.shape_cast %431 : vector<8x128xf32> to vector<1x8x128xf32>
    %434 = vector.broadcast %433 : vector<1x8x128xf32> to vector<8x8x128xf32>
    %435 = arith.mulf %432, %434 : vector<8x8x128xf32>
    %cst_119 = arith.constant dense<0.000000e+00> : vector<8x8xf32>
    %436 = vector.multi_reduction <add>, %435, %cst_119 [2] : vector<8x8x128xf32> to vector<8x8xf32>
    %437 = vector.shape_cast %436 : vector<8x8xf32> to vector<8x8x1xf32>
    %cst_120 = arith.constant dense<0xFF800000> : vector<8x1xf32>
    %438 = vector.multi_reduction <maximumf>, %437, %cst_120 [0] : vector<8x8x1xf32> to vector<8x1xf32>
    %439 = vector.shape_cast %438 : vector<8x1xf32> to vector<1x8x1xf32>
    %440 = vector.broadcast %439 : vector<1x8x1xf32> to vector<8x8x1xf32>
    %441 = arith.subf %437, %440 : vector<8x8x1xf32>
    %442 = math.exp %441 : vector<8x8x1xf32>
    %cst_121 = arith.constant dense<0.000000e+00> : vector<8x1xf32>
    %443 = vector.multi_reduction <add>, %442, %cst_121 [0] : vector<8x8x1xf32> to vector<8x1xf32>
    %444 = vector.shape_cast %443 : vector<8x1xf32> to vector<1x8x1xf32>
    %445 = vector.broadcast %444 : vector<1x8x1xf32> to vector<8x8x1xf32>
    %446 = arith.divf %442, %445 : vector<8x8x1xf32>
    %447 = vector.broadcast %446 : vector<8x8x1xf32> to vector<8x8x128xf32>
    %448 = arith.mulf %447, %432 : vector<8x8x128xf32>
    %cst_122 = arith.constant dense<0.000000e+00> : vector<8x128xf32>
    %449 = vector.multi_reduction <add>, %448, %cst_122 [0] : vector<8x8x128xf32> to vector<8x128xf32>
    %450 = tpu.concatenate %449, %431 in 1 : vector<8x128xf32>, vector<8x128xf32> -> vector<8x256xf32>
    %451 = arith.truncf %450 : vector<8x256xf32> to vector<8x256xbf16>
    %cst_123 = arith.constant dense<0.000000e+00> : vector<8x128xf32>
    %452 = tpu.matmul %451, %2, %cst_123 {dimension_numbers = #tpu.dot_dimension_numbers<[1], [0], [0], [1], [0, 0, 1, 1], [], []>} : vector<8x256xbf16>, vector<256x128xbf16>, vector<8x128xf32> -> vector<8x128xf32>
    %453 = vector.broadcast %3 : vector<1x128xf32> to vector<8x128xf32>
    %454 = arith.addf %452, %453 : vector<8x128xf32>
    %455 = math.tanh %454 : vector<8x128xf32>
    %456 = arith.index_cast %c0_i32_109 : i32 to index
    %c0_124 = arith.constant 0 : index
    %c0_125 = arith.constant 0 : index
    %457 = vector.load %arg16[%456, %c0_124, %c0_125] : memref<5x8x128xf32, #tpu.memory_space<vmem>>, vector<1x8x128xf32>
    %458 = vector.shape_cast %457 : vector<1x8x128xf32> to vector<8x128xf32>
    %459 = vector.shape_cast %455 : vector<8x128xf32> to vector<1x8x128xf32>
    tpu.vector_store %arg16[%456, %c0_124, %c0_125], %459 {strides = array<i32>} : memref<5x8x128xf32, #tpu.memory_space<vmem>>, vector<1x8x128xf32>,
    %c1_i32_126 = arith.constant 1 : i32
    %460 = arith.index_cast %c1_i32_126 : i32 to index
    %c0_127 = arith.constant 0 : index
    %c0_128 = arith.constant 0 : index
    %461 = vector.load %arg18[%460, %c0_127, %c0_128] : memref<5x8x512xf32, #tpu.memory_space<vmem>>, vector<1x8x512xf32>
    %462 = vector.shape_cast %461 : vector<1x8x512xf32> to vector<8x512xf32>
    %463 = arith.truncf %431 : vector<8x128xf32> to vector<8x128xbf16>
    %cst_129 = arith.constant dense<0.000000e+00> : vector<8x512xf32>
    %464 = tpu.matmul %463, %1, %cst_129 {dimension_numbers = #tpu.dot_dimension_numbers<[1], [0], [0], [1], [0, 0, 1, 1], [], []>} : vector<8x128xbf16>, vector<128x512xbf16>, vector<8x512xf32> -> vector<8x512xf32>
    %465 = arith.addf %462, %464 : vector<8x512xf32>
    %466 = vector.extract_strided_slice %465 {offsets = [0, 0], sizes = [8, 128], strides = [1, 1]} : vector<8x512xf32> to vector<8x128xf32>
    %467 = arith.negf %466 : vector<8x128xf32>
    %468 = math.exp %467 : vector<8x128xf32>
    %cst_130 = arith.constant 1.000000e+00 : f32
    %469 = vector.broadcast %cst_130 : f32 to vector<8x128xf32>
    %470 = arith.addf %469, %468 : vector<8x128xf32>
    %471 = arith.divf %469, %470 : vector<8x128xf32>
    %472 = vector.extract_strided_slice %465 {offsets = [0, 128], sizes = [8, 128], strides = [1, 1]} : vector<8x512xf32> to vector<8x128xf32>
    %473 = arith.negf %472 : vector<8x128xf32>
    %474 = math.exp %473 : vector<8x128xf32>
    %cst_131 = arith.constant 1.000000e+00 : f32
    %475 = vector.broadcast %cst_131 : f32 to vector<8x128xf32>
    %476 = arith.addf %475, %474 : vector<8x128xf32>
    %477 = arith.divf %475, %476 : vector<8x128xf32>
    %478 = vector.extract_strided_slice %465 {offsets = [0, 256], sizes = [8, 128], strides = [1, 1]} : vector<8x512xf32> to vector<8x128xf32>
    %479 = math.tanh %478 : vector<8x128xf32>
    %480 = vector.extract_strided_slice %465 {offsets = [0, 384], sizes = [8, 128], strides = [1, 1]} : vector<8x512xf32> to vector<8x128xf32>
    %481 = arith.negf %480 : vector<8x128xf32>
    %482 = math.exp %481 : vector<8x128xf32>
    %cst_132 = arith.constant 1.000000e+00 : f32
    %483 = vector.broadcast %cst_132 : f32 to vector<8x128xf32>
    %484 = arith.addf %483, %482 : vector<8x128xf32>
    %485 = arith.divf %483, %484 : vector<8x128xf32>
    %486 = arith.mulf %477, %429 : vector<8x128xf32>
    %487 = arith.mulf %471, %479 : vector<8x128xf32>
    %488 = arith.addf %486, %487 : vector<8x128xf32>
    %489 = math.tanh %488 : vector<8x128xf32>
    %490 = arith.mulf %485, %489 : vector<8x128xf32>
    %c0_133 = arith.constant 0 : index
    %c0_134 = arith.constant 0 : index
    %c0_135 = arith.constant 0 : index
    %491 = vector.load %arg15[%c0_133, %c0_134, %c0_135] : memref<8x8x128xf32, #tpu.memory_space<vmem>>, vector<8x8x128xf32>
    %492 = vector.shape_cast %490 : vector<8x128xf32> to vector<1x8x128xf32>
    %493 = vector.broadcast %492 : vector<1x8x128xf32> to vector<8x8x128xf32>
    %494 = arith.mulf %491, %493 : vector<8x8x128xf32>
    %cst_136 = arith.constant dense<0.000000e+00> : vector<8x8xf32>
    %495 = vector.multi_reduction <add>, %494, %cst_136 [2] : vector<8x8x128xf32> to vector<8x8xf32>
    %496 = vector.shape_cast %495 : vector<8x8xf32> to vector<8x8x1xf32>
    %cst_137 = arith.constant dense<0xFF800000> : vector<8x1xf32>
    %497 = vector.multi_reduction <maximumf>, %496, %cst_137 [0] : vector<8x8x1xf32> to vector<8x1xf32>
    %498 = vector.shape_cast %497 : vector<8x1xf32> to vector<1x8x1xf32>
    %499 = vector.broadcast %498 : vector<1x8x1xf32> to vector<8x8x1xf32>
    %500 = arith.subf %496, %499 : vector<8x8x1xf32>
    %501 = math.exp %500 : vector<8x8x1xf32>
    %cst_138 = arith.constant dense<0.000000e+00> : vector<8x1xf32>
    %502 = vector.multi_reduction <add>, %501, %cst_138 [0] : vector<8x8x1xf32> to vector<8x1xf32>
    %503 = vector.shape_cast %502 : vector<8x1xf32> to vector<1x8x1xf32>
    %504 = vector.broadcast %503 : vector<1x8x1xf32> to vector<8x8x1xf32>
    %505 = arith.divf %501, %504 : vector<8x8x1xf32>
    %506 = vector.broadcast %505 : vector<8x8x1xf32> to vector<8x8x128xf32>
    %507 = arith.mulf %506, %491 : vector<8x8x128xf32>
    %cst_139 = arith.constant dense<0.000000e+00> : vector<8x128xf32>
    %508 = vector.multi_reduction <add>, %507, %cst_139 [0] : vector<8x8x128xf32> to vector<8x128xf32>
    %509 = tpu.concatenate %508, %490 in 1 : vector<8x128xf32>, vector<8x128xf32> -> vector<8x256xf32>
    %510 = arith.truncf %509 : vector<8x256xf32> to vector<8x256xbf16>
    %cst_140 = arith.constant dense<0.000000e+00> : vector<8x128xf32>
    %511 = tpu.matmul %510, %2, %cst_140 {dimension_numbers = #tpu.dot_dimension_numbers<[1], [0], [0], [1], [0, 0, 1, 1], [], []>} : vector<8x256xbf16>, vector<256x128xbf16>, vector<8x128xf32> -> vector<8x128xf32>
    %512 = vector.broadcast %3 : vector<1x128xf32> to vector<8x128xf32>
    %513 = arith.addf %511, %512 : vector<8x128xf32>
    %514 = math.tanh %513 : vector<8x128xf32>
    %515 = arith.index_cast %c1_i32_126 : i32 to index
    %c0_141 = arith.constant 0 : index
    %c0_142 = arith.constant 0 : index
    %516 = vector.load %arg16[%515, %c0_141, %c0_142] : memref<5x8x128xf32, #tpu.memory_space<vmem>>, vector<1x8x128xf32>
    %517 = vector.shape_cast %516 : vector<1x8x128xf32> to vector<8x128xf32>
    %518 = vector.shape_cast %514 : vector<8x128xf32> to vector<1x8x128xf32>
    tpu.vector_store %arg16[%515, %c0_141, %c0_142], %518 {strides = array<i32>} : memref<5x8x128xf32, #tpu.memory_space<vmem>>, vector<1x8x128xf32>,
    %c2_i32_143 = arith.constant 2 : i32
    %519 = arith.index_cast %c2_i32_143 : i32 to index
    %c0_144 = arith.constant 0 : index
    %c0_145 = arith.constant 0 : index
    %520 = vector.load %arg18[%519, %c0_144, %c0_145] : memref<5x8x512xf32, #tpu.memory_space<vmem>>, vector<1x8x512xf32>
    %521 = vector.shape_cast %520 : vector<1x8x512xf32> to vector<8x512xf32>
    %522 = arith.truncf %490 : vector<8x128xf32> to vector<8x128xbf16>
    %cst_146 = arith.constant dense<0.000000e+00> : vector<8x512xf32>
    %523 = tpu.matmul %522, %1, %cst_146 {dimension_numbers = #tpu.dot_dimension_numbers<[1], [0], [0], [1], [0, 0, 1, 1], [], []>} : vector<8x128xbf16>, vector<128x512xbf16>, vector<8x512xf32> -> vector<8x512xf32>
    %524 = arith.addf %521, %523 : vector<8x512xf32>
    %525 = vector.extract_strided_slice %524 {offsets = [0, 0], sizes = [8, 128], strides = [1, 1]} : vector<8x512xf32> to vector<8x128xf32>
    %526 = arith.negf %525 : vector<8x128xf32>
    %527 = math.exp %526 : vector<8x128xf32>
    %cst_147 = arith.constant 1.000000e+00 : f32
    %528 = vector.broadcast %cst_147 : f32 to vector<8x128xf32>
    %529 = arith.addf %528, %527 : vector<8x128xf32>
    %530 = arith.divf %528, %529 : vector<8x128xf32>
    %531 = vector.extract_strided_slice %524 {offsets = [0, 128], sizes = [8, 128], strides = [1, 1]} : vector<8x512xf32> to vector<8x128xf32>
    %532 = arith.negf %531 : vector<8x128xf32>
    %533 = math.exp %532 : vector<8x128xf32>
    %cst_148 = arith.constant 1.000000e+00 : f32
    %534 = vector.broadcast %cst_148 : f32 to vector<8x128xf32>
    %535 = arith.addf %534, %533 : vector<8x128xf32>
    %536 = arith.divf %534, %535 : vector<8x128xf32>
    %537 = vector.extract_strided_slice %524 {offsets = [0, 256], sizes = [8, 128], strides = [1, 1]} : vector<8x512xf32> to vector<8x128xf32>
    %538 = math.tanh %537 : vector<8x128xf32>
    %539 = vector.extract_strided_slice %524 {offsets = [0, 384], sizes = [8, 128], strides = [1, 1]} : vector<8x512xf32> to vector<8x128xf32>
    %540 = arith.negf %539 : vector<8x128xf32>
    %541 = math.exp %540 : vector<8x128xf32>
    %cst_149 = arith.constant 1.000000e+00 : f32
    %542 = vector.broadcast %cst_149 : f32 to vector<8x128xf32>
    %543 = arith.addf %542, %541 : vector<8x128xf32>
    %544 = arith.divf %542, %543 : vector<8x128xf32>
    %545 = arith.mulf %536, %488 : vector<8x128xf32>
    %546 = arith.mulf %530, %538 : vector<8x128xf32>
    %547 = arith.addf %545, %546 : vector<8x128xf32>
    %548 = math.tanh %547 : vector<8x128xf32>
    %549 = arith.mulf %544, %548 : vector<8x128xf32>
    %c0_150 = arith.constant 0 : index
    %c0_151 = arith.constant 0 : index
    %c0_152 = arith.constant 0 : index
    %550 = vector.load %arg15[%c0_150, %c0_151, %c0_152] : memref<8x8x128xf32, #tpu.memory_space<vmem>>, vector<8x8x128xf32>
    %551 = vector.shape_cast %549 : vector<8x128xf32> to vector<1x8x128xf32>
    %552 = vector.broadcast %551 : vector<1x8x128xf32> to vector<8x8x128xf32>
    %553 = arith.mulf %550, %552 : vector<8x8x128xf32>
    %cst_153 = arith.constant dense<0.000000e+00> : vector<8x8xf32>
    %554 = vector.multi_reduction <add>, %553, %cst_153 [2] : vector<8x8x128xf32> to vector<8x8xf32>
    %555 = vector.shape_cast %554 : vector<8x8xf32> to vector<8x8x1xf32>
    %cst_154 = arith.constant dense<0xFF800000> : vector<8x1xf32>
    %556 = vector.multi_reduction <maximumf>, %555, %cst_154 [0] : vector<8x8x1xf32> to vector<8x1xf32>
    %557 = vector.shape_cast %556 : vector<8x1xf32> to vector<1x8x1xf32>
    %558 = vector.broadcast %557 : vector<1x8x1xf32> to vector<8x8x1xf32>
    %559 = arith.subf %555, %558 : vector<8x8x1xf32>
    %560 = math.exp %559 : vector<8x8x1xf32>
    %cst_155 = arith.constant dense<0.000000e+00> : vector<8x1xf32>
    %561 = vector.multi_reduction <add>, %560, %cst_155 [0] : vector<8x8x1xf32> to vector<8x1xf32>
    %562 = vector.shape_cast %561 : vector<8x1xf32> to vector<1x8x1xf32>
    %563 = vector.broadcast %562 : vector<1x8x1xf32> to vector<8x8x1xf32>
    %564 = arith.divf %560, %563 : vector<8x8x1xf32>
    %565 = vector.broadcast %564 : vector<8x8x1xf32> to vector<8x8x128xf32>
    %566 = arith.mulf %565, %550 : vector<8x8x128xf32>
    %cst_156 = arith.constant dense<0.000000e+00> : vector<8x128xf32>
    %567 = vector.multi_reduction <add>, %566, %cst_156 [0] : vector<8x8x128xf32> to vector<8x128xf32>
    %568 = tpu.concatenate %567, %549 in 1 : vector<8x128xf32>, vector<8x128xf32> -> vector<8x256xf32>
    %569 = arith.truncf %568 : vector<8x256xf32> to vector<8x256xbf16>
    %cst_157 = arith.constant dense<0.000000e+00> : vector<8x128xf32>
    %570 = tpu.matmul %569, %2, %cst_157 {dimension_numbers = #tpu.dot_dimension_numbers<[1], [0], [0], [1], [0, 0, 1, 1], [], []>} : vector<8x256xbf16>, vector<256x128xbf16>, vector<8x128xf32> -> vector<8x128xf32>
    %571 = vector.broadcast %3 : vector<1x128xf32> to vector<8x128xf32>
    %572 = arith.addf %570, %571 : vector<8x128xf32>
    %573 = math.tanh %572 : vector<8x128xf32>
    %574 = arith.index_cast %c2_i32_143 : i32 to index
    %c0_158 = arith.constant 0 : index
    %c0_159 = arith.constant 0 : index
    %575 = vector.load %arg16[%574, %c0_158, %c0_159] : memref<5x8x128xf32, #tpu.memory_space<vmem>>, vector<1x8x128xf32>
    %576 = vector.shape_cast %575 : vector<1x8x128xf32> to vector<8x128xf32>
    %577 = vector.shape_cast %573 : vector<8x128xf32> to vector<1x8x128xf32>
    tpu.vector_store %arg16[%574, %c0_158, %c0_159], %577 {strides = array<i32>} : memref<5x8x128xf32, #tpu.memory_space<vmem>>, vector<1x8x128xf32>,
    %c3_i32_160 = arith.constant 3 : i32
    %578 = arith.index_cast %c3_i32_160 : i32 to index
    %c0_161 = arith.constant 0 : index
    %c0_162 = arith.constant 0 : index
    %579 = vector.load %arg18[%578, %c0_161, %c0_162] : memref<5x8x512xf32, #tpu.memory_space<vmem>>, vector<1x8x512xf32>
    %580 = vector.shape_cast %579 : vector<1x8x512xf32> to vector<8x512xf32>
    %581 = arith.truncf %549 : vector<8x128xf32> to vector<8x128xbf16>
    %cst_163 = arith.constant dense<0.000000e+00> : vector<8x512xf32>
    %582 = tpu.matmul %581, %1, %cst_163 {dimension_numbers = #tpu.dot_dimension_numbers<[1], [0], [0], [1], [0, 0, 1, 1], [], []>} : vector<8x128xbf16>, vector<128x512xbf16>, vector<8x512xf32> -> vector<8x512xf32>
    %583 = arith.addf %580, %582 : vector<8x512xf32>
    %584 = vector.extract_strided_slice %583 {offsets = [0, 0], sizes = [8, 128], strides = [1, 1]} : vector<8x512xf32> to vector<8x128xf32>
    %585 = arith.negf %584 : vector<8x128xf32>
    %586 = math.exp %585 : vector<8x128xf32>
    %cst_164 = arith.constant 1.000000e+00 : f32
    %587 = vector.broadcast %cst_164 : f32 to vector<8x128xf32>
    %588 = arith.addf %587, %586 : vector<8x128xf32>
    %589 = arith.divf %587, %588 : vector<8x128xf32>
    %590 = vector.extract_strided_slice %583 {offsets = [0, 128], sizes = [8, 128], strides = [1, 1]} : vector<8x512xf32> to vector<8x128xf32>
    %591 = arith.negf %590 : vector<8x128xf32>
    %592 = math.exp %591 : vector<8x128xf32>
    %cst_165 = arith.constant 1.000000e+00 : f32
    %593 = vector.broadcast %cst_165 : f32 to vector<8x128xf32>
    %594 = arith.addf %593, %592 : vector<8x128xf32>
    %595 = arith.divf %593, %594 : vector<8x128xf32>
    %596 = vector.extract_strided_slice %583 {offsets = [0, 256], sizes = [8, 128], strides = [1, 1]} : vector<8x512xf32> to vector<8x128xf32>
    %597 = math.tanh %596 : vector<8x128xf32>
    %598 = vector.extract_strided_slice %583 {offsets = [0, 384], sizes = [8, 128], strides = [1, 1]} : vector<8x512xf32> to vector<8x128xf32>
    %599 = arith.negf %598 : vector<8x128xf32>
    %600 = math.exp %599 : vector<8x128xf32>
    %cst_166 = arith.constant 1.000000e+00 : f32
    %601 = vector.broadcast %cst_166 : f32 to vector<8x128xf32>
    %602 = arith.addf %601, %600 : vector<8x128xf32>
    %603 = arith.divf %601, %602 : vector<8x128xf32>
    %604 = arith.mulf %595, %547 : vector<8x128xf32>
    %605 = arith.mulf %589, %597 : vector<8x128xf32>
    %606 = arith.addf %604, %605 : vector<8x128xf32>
    %607 = math.tanh %606 : vector<8x128xf32>
    %608 = arith.mulf %603, %607 : vector<8x128xf32>
    %c0_167 = arith.constant 0 : index
    %c0_168 = arith.constant 0 : index
    %c0_169 = arith.constant 0 : index
    %609 = vector.load %arg15[%c0_167, %c0_168, %c0_169] : memref<8x8x128xf32, #tpu.memory_space<vmem>>, vector<8x8x128xf32>
    %610 = vector.shape_cast %608 : vector<8x128xf32> to vector<1x8x128xf32>
    %611 = vector.broadcast %610 : vector<1x8x128xf32> to vector<8x8x128xf32>
    %612 = arith.mulf %609, %611 : vector<8x8x128xf32>
    %cst_170 = arith.constant dense<0.000000e+00> : vector<8x8xf32>
    %613 = vector.multi_reduction <add>, %612, %cst_170 [2] : vector<8x8x128xf32> to vector<8x8xf32>
    %614 = vector.shape_cast %613 : vector<8x8xf32> to vector<8x8x1xf32>
    %cst_171 = arith.constant dense<0xFF800000> : vector<8x1xf32>
    %615 = vector.multi_reduction <maximumf>, %614, %cst_171 [0] : vector<8x8x1xf32> to vector<8x1xf32>
    %616 = vector.shape_cast %615 : vector<8x1xf32> to vector<1x8x1xf32>
    %617 = vector.broadcast %616 : vector<1x8x1xf32> to vector<8x8x1xf32>
    %618 = arith.subf %614, %617 : vector<8x8x1xf32>
    %619 = math.exp %618 : vector<8x8x1xf32>
    %cst_172 = arith.constant dense<0.000000e+00> : vector<8x1xf32>
    %620 = vector.multi_reduction <add>, %619, %cst_172 [0] : vector<8x8x1xf32> to vector<8x1xf32>
    %621 = vector.shape_cast %620 : vector<8x1xf32> to vector<1x8x1xf32>
    %622 = vector.broadcast %621 : vector<1x8x1xf32> to vector<8x8x1xf32>
    %623 = arith.divf %619, %622 : vector<8x8x1xf32>
    %624 = vector.broadcast %623 : vector<8x8x1xf32> to vector<8x8x128xf32>
    %625 = arith.mulf %624, %609 : vector<8x8x128xf32>
    %cst_173 = arith.constant dense<0.000000e+00> : vector<8x128xf32>
    %626 = vector.multi_reduction <add>, %625, %cst_173 [0] : vector<8x8x128xf32> to vector<8x128xf32>
    %627 = tpu.concatenate %626, %608 in 1 : vector<8x128xf32>, vector<8x128xf32> -> vector<8x256xf32>
    %628 = arith.truncf %627 : vector<8x256xf32> to vector<8x256xbf16>
    %cst_174 = arith.constant dense<0.000000e+00> : vector<8x128xf32>
    %629 = tpu.matmul %628, %2, %cst_174 {dimension_numbers = #tpu.dot_dimension_numbers<[1], [0], [0], [1], [0, 0, 1, 1], [], []>} : vector<8x256xbf16>, vector<256x128xbf16>, vector<8x128xf32> -> vector<8x128xf32>
    %630 = vector.broadcast %3 : vector<1x128xf32> to vector<8x128xf32>
    %631 = arith.addf %629, %630 : vector<8x128xf32>
    %632 = math.tanh %631 : vector<8x128xf32>
    %633 = arith.index_cast %c3_i32_160 : i32 to index
    %c0_175 = arith.constant 0 : index
    %c0_176 = arith.constant 0 : index
    %634 = vector.load %arg16[%633, %c0_175, %c0_176] : memref<5x8x128xf32, #tpu.memory_space<vmem>>, vector<1x8x128xf32>
    %635 = vector.shape_cast %634 : vector<1x8x128xf32> to vector<8x128xf32>
    %636 = vector.shape_cast %632 : vector<8x128xf32> to vector<1x8x128xf32>
    tpu.vector_store %arg16[%633, %c0_175, %c0_176], %636 {strides = array<i32>} : memref<5x8x128xf32, #tpu.memory_space<vmem>>, vector<1x8x128xf32>,
    %c4_i32_177 = arith.constant 4 : i32
    %637 = arith.index_cast %c4_i32_177 : i32 to index
    %c0_178 = arith.constant 0 : index
    %c0_179 = arith.constant 0 : index
    %638 = vector.load %arg18[%637, %c0_178, %c0_179] : memref<5x8x512xf32, #tpu.memory_space<vmem>>, vector<1x8x512xf32>
    %639 = vector.shape_cast %638 : vector<1x8x512xf32> to vector<8x512xf32>
    %640 = arith.truncf %608 : vector<8x128xf32> to vector<8x128xbf16>
    %cst_180 = arith.constant dense<0.000000e+00> : vector<8x512xf32>
    %641 = tpu.matmul %640, %1, %cst_180 {dimension_numbers = #tpu.dot_dimension_numbers<[1], [0], [0], [1], [0, 0, 1, 1], [], []>} : vector<8x128xbf16>, vector<128x512xbf16>, vector<8x512xf32> -> vector<8x512xf32>
    %642 = arith.addf %639, %641 : vector<8x512xf32>
    %643 = vector.extract_strided_slice %642 {offsets = [0, 0], sizes = [8, 128], strides = [1, 1]} : vector<8x512xf32> to vector<8x128xf32>
    %644 = arith.negf %643 : vector<8x128xf32>
    %645 = math.exp %644 : vector<8x128xf32>
    %cst_181 = arith.constant 1.000000e+00 : f32
    %646 = vector.broadcast %cst_181 : f32 to vector<8x128xf32>
    %647 = arith.addf %646, %645 : vector<8x128xf32>
    %648 = arith.divf %646, %647 : vector<8x128xf32>
    %649 = vector.extract_strided_slice %642 {offsets = [0, 128], sizes = [8, 128], strides = [1, 1]} : vector<8x512xf32> to vector<8x128xf32>
    %650 = arith.negf %649 : vector<8x128xf32>
    %651 = math.exp %650 : vector<8x128xf32>
    %cst_182 = arith.constant 1.000000e+00 : f32
    %652 = vector.broadcast %cst_182 : f32 to vector<8x128xf32>
    %653 = arith.addf %652, %651 : vector<8x128xf32>
    %654 = arith.divf %652, %653 : vector<8x128xf32>
    %655 = vector.extract_strided_slice %642 {offsets = [0, 256], sizes = [8, 128], strides = [1, 1]} : vector<8x512xf32> to vector<8x128xf32>
    %656 = math.tanh %655 : vector<8x128xf32>
    %657 = vector.extract_strided_slice %642 {offsets = [0, 384], sizes = [8, 128], strides = [1, 1]} : vector<8x512xf32> to vector<8x128xf32>
    %658 = arith.negf %657 : vector<8x128xf32>
    %659 = math.exp %658 : vector<8x128xf32>
    %cst_183 = arith.constant 1.000000e+00 : f32
    %660 = vector.broadcast %cst_183 : f32 to vector<8x128xf32>
    %661 = arith.addf %660, %659 : vector<8x128xf32>
    %662 = arith.divf %660, %661 : vector<8x128xf32>
    %663 = arith.mulf %654, %606 : vector<8x128xf32>
    %664 = arith.mulf %648, %656 : vector<8x128xf32>
    %665 = arith.addf %663, %664 : vector<8x128xf32>
    %666 = math.tanh %665 : vector<8x128xf32>
    %667 = arith.mulf %662, %666 : vector<8x128xf32>
    %c0_184 = arith.constant 0 : index
    %c0_185 = arith.constant 0 : index
    %c0_186 = arith.constant 0 : index
    %668 = vector.load %arg15[%c0_184, %c0_185, %c0_186] : memref<8x8x128xf32, #tpu.memory_space<vmem>>, vector<8x8x128xf32>
    %669 = vector.shape_cast %667 : vector<8x128xf32> to vector<1x8x128xf32>
    %670 = vector.broadcast %669 : vector<1x8x128xf32> to vector<8x8x128xf32>
    %671 = arith.mulf %668, %670 : vector<8x8x128xf32>
    %cst_187 = arith.constant dense<0.000000e+00> : vector<8x8xf32>
    %672 = vector.multi_reduction <add>, %671, %cst_187 [2] : vector<8x8x128xf32> to vector<8x8xf32>
    %673 = vector.shape_cast %672 : vector<8x8xf32> to vector<8x8x1xf32>
    %cst_188 = arith.constant dense<0xFF800000> : vector<8x1xf32>
    %674 = vector.multi_reduction <maximumf>, %673, %cst_188 [0] : vector<8x8x1xf32> to vector<8x1xf32>
    %675 = vector.shape_cast %674 : vector<8x1xf32> to vector<1x8x1xf32>
    %676 = vector.broadcast %675 : vector<1x8x1xf32> to vector<8x8x1xf32>
    %677 = arith.subf %673, %676 : vector<8x8x1xf32>
    %678 = math.exp %677 : vector<8x8x1xf32>
    %cst_189 = arith.constant dense<0.000000e+00> : vector<8x1xf32>
    %679 = vector.multi_reduction <add>, %678, %cst_189 [0] : vector<8x8x1xf32> to vector<8x1xf32>
    %680 = vector.shape_cast %679 : vector<8x1xf32> to vector<1x8x1xf32>
    %681 = vector.broadcast %680 : vector<1x8x1xf32> to vector<8x8x1xf32>
    %682 = arith.divf %678, %681 : vector<8x8x1xf32>
    %683 = vector.broadcast %682 : vector<8x8x1xf32> to vector<8x8x128xf32>
    %684 = arith.mulf %683, %668 : vector<8x8x128xf32>
    %cst_190 = arith.constant dense<0.000000e+00> : vector<8x128xf32>
    %685 = vector.multi_reduction <add>, %684, %cst_190 [0] : vector<8x8x128xf32> to vector<8x128xf32>
    %686 = tpu.concatenate %685, %667 in 1 : vector<8x128xf32>, vector<8x128xf32> -> vector<8x256xf32>
    %687 = arith.truncf %686 : vector<8x256xf32> to vector<8x256xbf16>
    %cst_191 = arith.constant dense<0.000000e+00> : vector<8x128xf32>
    %688 = tpu.matmul %687, %2, %cst_191 {dimension_numbers = #tpu.dot_dimension_numbers<[1], [0], [0], [1], [0, 0, 1, 1], [], []>} : vector<8x256xbf16>, vector<256x128xbf16>, vector<8x128xf32> -> vector<8x128xf32>
    %689 = vector.broadcast %3 : vector<1x128xf32> to vector<8x128xf32>
    %690 = arith.addf %688, %689 : vector<8x128xf32>
    %691 = math.tanh %690 : vector<8x128xf32>
    %692 = arith.index_cast %c4_i32_177 : i32 to index
    %c0_192 = arith.constant 0 : index
    %c0_193 = arith.constant 0 : index
    %693 = vector.load %arg16[%692, %c0_192, %c0_193] : memref<5x8x128xf32, #tpu.memory_space<vmem>>, vector<1x8x128xf32>
    %694 = vector.shape_cast %693 : vector<1x8x128xf32> to vector<8x128xf32>
    %695 = vector.shape_cast %691 : vector<8x128xf32> to vector<1x8x128xf32>
    tpu.vector_store %arg16[%692, %c0_192, %c0_193], %695 {strides = array<i32>} : memref<5x8x128xf32, #tpu.memory_space<vmem>>, vector<1x8x128xf32>,
    %c5_i32_194 = arith.constant 5 : i32
    %c0_195 = arith.constant 0 : index
    %c0_196 = arith.constant 0 : index
    %c0_197 = arith.constant 0 : index
    %696 = vector.load %arg16[%c0_195, %c0_196, %c0_197] : memref<5x8x128xf32, #tpu.memory_space<vmem>>, vector<5x8x128xf32>
    %697 = vector.shape_cast %696 : vector<5x8x128xf32> to vector<40x128xf32>
    %698 = arith.truncf %697 : vector<40x128xf32> to vector<40x128xbf16>
    %c0_198 = arith.constant 0 : index
    %c0_199 = arith.constant 0 : index
    %699 = vector.load %arg11[%c0_198, %c0_199] : memref<128x128xbf16, #tpu.memory_space<vmem>>, vector<128x128xbf16>
    %cst_200 = arith.constant dense<0.000000e+00> : vector<40x128xf32>
    %700 = tpu.matmul %698, %699, %cst_200 {dimension_numbers = #tpu.dot_dimension_numbers<[1], [0], [0], [1], [0, 0, 1, 1], [], []>} : vector<40x128xbf16>, vector<128x128xbf16>, vector<40x128xf32> -> vector<40x128xf32>
    %c0_201 = arith.constant 0 : index
    %c0_202 = arith.constant 0 : index
    %701 = vector.load %arg12[%c0_201, %c0_202] : memref<1x128xf32, #tpu.memory_space<vmem>>, vector<1x128xf32>
    %702 = vector.broadcast %701 : vector<1x128xf32> to vector<40x128xf32>
    %703 = arith.addf %700, %702 : vector<40x128xf32>
    %cst_203 = arith.constant dense<0xFF800000> : vector<40xf32>
    %704 = vector.multi_reduction <maximumf>, %703, %cst_203 [1] : vector<40x128xf32> to vector<40xf32>
    %705 = vector.shape_cast %704 : vector<40xf32> to vector<40x1xf32>
    %706 = vector.broadcast %705 : vector<40x1xf32> to vector<40x128xf32>
    %707 = arith.subf %703, %706 : vector<40x128xf32>
    %708 = math.exp %707 : vector<40x128xf32>
    %cst_204 = arith.constant dense<0.000000e+00> : vector<40xf32>
    %709 = vector.multi_reduction <add>, %708, %cst_204 [1] : vector<40x128xf32> to vector<40xf32>
    %710 = vector.shape_cast %709 : vector<40xf32> to vector<40x1xf32>
    %711 = math.log %710 : vector<40x1xf32>
    %712 = arith.addf %705, %711 : vector<40x1xf32>
    %713 = vector.broadcast %712 : vector<40x1xf32> to vector<40x128xf32>
    %714 = arith.subf %703, %713 : vector<40x128xf32>
    %715 = vector.shape_cast %714 : vector<40x128xf32> to vector<5x8x128xf32>
    %c0_205 = arith.constant 0 : index
    %c0_206 = arith.constant 0 : index
    %c0_207 = arith.constant 0 : index
    %716 = vector.load %arg13[%c0_205, %c0_206, %c0_207] : memref<5x8x128xf32, #tpu.memory_space<vmem>>, vector<5x8x128xf32>
    tpu.vector_store %arg13[%c0_205, %c0_206, %c0_207], %715 {strides = array<i32>} : memref<5x8x128xf32, #tpu.memory_space<vmem>>, vector<5x8x128xf32>,
    %717 = tpu.iota {dimensions = array<i32: 1>} : vector<40x128xi32>
    %718 = vector.broadcast %705 : vector<40x1xf32> to vector<40x128xf32>
    %719 = arith.cmpf oeq, %703, %718 : vector<40x128xf32>
    %c128_i32 = arith.constant 128 : i32
    %720 = vector.broadcast %c128_i32 : i32 to vector<40x128xi32>
    %721 = arith.select %719, %717, %720 : vector<40x128xi1>, vector<40x128xi32>
    %cst_208 = arith.constant dense<2147483647> : vector<40xi32>
    %722 = vector.multi_reduction <minsi>, %721, %cst_208 [1] : vector<40x128xi32> to vector<40xi32>
    %723 = vector.shape_cast %722 : vector<40xi32> to vector<5x8xi32>
    %c0_209 = arith.constant 0 : index
    %c0_210 = arith.constant 0 : index
    %724 = vector.load %arg14[%c0_209, %c0_210] : memref<5x8xi32, #tpu.memory_space<vmem>>, vector<5x8xi32>
    tpu.vector_store %arg14[%c0_209, %c0_210], %723 {strides = array<i32>} : memref<5x8xi32, #tpu.memory_space<vmem>>, vector<5x8xi32>,
    return
  }
}

</mosaic_0001>

<bundles_post_ra>
// kernel: net_forward.1
= control target key start
LH: loop header
LB: loop body
LE: loop exit
PB: predicated region body
PF: predicated region fallthrough
CT: control target
= control target key end

     0   :  { %v7277_v1 = vmov 0   ;;  %vm4948_vm0 = vmmov 0   ;;  %vm3949_vm11 = vcmask 1041409   ;;  %vm3951_vm12 = vcmask 1042434   ;;  %s7261_s3 = inlined_call_operand.vmem [shape: bf16[128,512], index: 3, kind: input, shape index: {}]   ;;  %s7262_s6 = inlined_call_operand.vmem [shape: bf16[128,512], index: 6, kind: input, shape index: {}]   ;;  %s7263_s0 = inlined_call_operand.vmem [shape: f32[8,8,128], index: 0, kind: input, shape index: {}]   ;;  %s7264_s4 = inlined_call_operand.vmem [shape: bf16[128,512], index: 4, kind: input, shape index: {}]   ;;  %s7265_s2 = inlined_call_operand.vmem [shape: f32[5,8,128], index: 2, kind: input, shape index: {}]   ;;  %s7266_s1 = inlined_call_operand.vmem [shape: f32[8,8,1], index: 1, kind: input, shape index: {}]   ;;  %s7267_s5 = inlined_call_operand.vmem [shape: f32[1,512], index: 5, kind: input, shape index: {}]   ;;  %s7268_s8 = inlined_call_operand.vmem [shape: f32[1,512], index: 8, kind: input, shape index: {}]   ;;  %s7269_s7 = inlined_call_operand.vmem [shape: bf16[128,512], index: 7, kind: input, shape index: {}]   ;;  %s7270_s9 = inlined_call_operand.vmem [shape: bf16[256,128], index: 9, kind: input, shape index: {}]   ;;  %s7271_s10 = inlined_call_operand.vmem [shape: f32[1,128], index: 10, kind: input, shape index: {}]   ;;  %s7272_s11 = inlined_call_operand.vmem [shape: bf16[128,128], index: 11, kind: input, shape index: {}]   ;;  %s7273_s12 = inlined_call_operand.vmem [shape: f32[1,128], index: 12, kind: input, shape index: {}]   ;;  %s7274_s13 = inlined_call_operand.vmem [shape: f32[5,8,128], index: 13, kind: output, shape index: {0}]   ;;  %s7275_s14 = inlined_call_operand.vmem [shape: s32[5,8], index: 14, kind: output, shape index: {1}]  }
   0x1   :  { %v4321_v0 = vld [vmem:[%s7261_s3 + $0xe4] ss:$16 sps:$4 sm:$0xff]   ;;  %402 = vmatprep.mubr.bf16.mxu0 %v7277_v1  ;;  %475 = vmatprep.mubr.bf16.mxu1 %v7277_v1  ;;  %v4323_v2 = vld [vmem:[%s7261_s3 + $0xec] ss:$16 sps:$4 sm:$0xff]   ;;  %v4325_v3 = vld [vmem:[%s7261_s3 + $0xe0] ss:$16 sps:$4 sm:$0xff]  }
   0x2   :  { %4319 = vset.pattern.permute.xlu0 %v7277_v1  ;;  %4320 = vset.pattern.permute.xlu1 %v7277_v1  ;;  %v4326_v4 = vld [vmem:[%s7261_s3 + $0xe8] ss:$16 sps:$4 sm:$0xff]   ;;  %v4327_v5 = vld [vmem:[%s7261_s3 + $0xc4] ss:$16 sps:$4 sm:$0xff]   ;;  %v4329_v6 = vld [vmem:[%s7261_s3 + $0xcc] ss:$16 sps:$4 sm:$0xff]  }
   0x3   :  { %370 = vmatprep.subr.bf16.mxu0 %v4321_v0  ;;  %443 = vmatprep.subr.bf16.mxu1 %v4323_v2  ;;  %v4331_v7 = vld [vmem:[%s7261_s3 + $0xc0] ss:$16 sps:$4 sm:$0xff]   ;;  %v4332_v8 = vld [vmem:[%s7261_s3 + $0xc8] ss:$16 sps:$4 sm:$0xff]   ;;  %v4333_v9 = vld [vmem:[%s7261_s3 + $0xa4] ss:$16 sps:$4 sm:$0xff]  }
   0x4   :  { %371 = vmatpush1.bf16.msra.mxu0 %v4325_v3  ;;  %444 = vmatpush1.bf16.msra.mxu1 %v4326_v4  ;;  %v4335_v10 = vld [vmem:[%s7261_s3 + $0xac] ss:$16 sps:$4 sm:$0xff]   ;;  %v4337_v11 = vld [vmem:[%s7261_s3 + $0xa0] ss:$16 sps:$4 sm:$0xff]   ;;  %v4338_v12 = vld [vmem:[%s7261_s3 + $0xa8] ss:$16 sps:$4 sm:$0xff]  }
   0x5   :  { %372 = vmatprep.subr.bf16.mxu0 %v4327_v5  ;;  %445 = vmatprep.subr.bf16.mxu1 %v4329_v6  ;;  %v4339_v13 = vld [vmem:[%s7261_s3 + $0x84] ss:$16 sps:$4 sm:$0xff]   ;;  %v4341_v14 = vld [vmem:[%s7261_s3 + $0x8c] ss:$16 sps:$4 sm:$0xff]   ;;  %v4343_v15 = vld [vmem:[%s7261_s3 + $0x80] ss:$16 sps:$4 sm:$0xff]  }
   0x6   :  { %v4344_v16 = vld [vmem:[%s7261_s3 + $0x88] ss:$16 sps:$4 sm:$0xff]   ;;  %v4345_v17 = vld [vmem:[%s7261_s3 + $0x64] ss:$16 sps:$4 sm:$0xff]   ;;  %v4347_v18 = vld [vmem:[%s7261_s3 + $0x6c] ss:$16 sps:$4 sm:$0xff]  }
   0x7   :  { %v4349_v19 = vld [vmem:[%s7261_s3 + $0x60] ss:$16 sps:$4 sm:$0xff]   ;;  %v4350_v20 = vld [vmem:[%s7261_s3 + $0x68] ss:$16 sps:$4 sm:$0xff]   ;;  %v4351_v21 = vld [vmem:[%s7261_s3 + $0x44] ss:$16 sps:$4 sm:$0xff]  }
   0x8   :  { %373 = vmatpush1.bf16.msra.mxu0 %v4331_v7  ;;  %446 = vmatpush1.bf16.msra.mxu1 %v4332_v8  ;;  %v4353_v22 = vld [vmem:[%s7261_s3 + $0x4c] ss:$16 sps:$4 sm:$0xff]   ;;  %v4355_v23 = vld [vmem:[%s7261_s3 + $0x40] ss:$16 sps:$4 sm:$0xff]   ;;  %v4356_v24 = vld [vmem:[%s7261_s3 + $0x48] ss:$16 sps:$4 sm:$0xff]  }
   0x9   :  { %374 = vmatprep.subr.bf16.mxu0 %v4333_v9  ;;  %447 = vmatprep.subr.bf16.mxu1 %v4335_v10  ;;  %v4357_v25 = vld [vmem:[%s7261_s3 + $0x24] ss:$16 sps:$4 sm:$0xff]   ;;  %v4359_v26 = vld [vmem:[%s7261_s3 + $0x2c] ss:$16 sps:$4 sm:$0xff]   ;;  %v4361_v27 = vld [vmem:[%s7261_s3 + $0x20] ss:$16 sps:$4 sm:$0xff]  }
   0xa   :  { %v4362_v28 = vld [vmem:[%s7261_s3 + $0x28] ss:$16 sps:$4 sm:$0xff]   ;;  %v4363_v29 = vld [vmem:[%s7261_s3 + $0x4] ss:$16 sps:$4 sm:$0xff]   ;;  %v4365_v30 = vld [vmem:[%s7261_s3 + $0xc] ss:$16 sps:$4 sm:$0xff]  }
   0xb   :  { %v4367_v31 = vld [vmem:[%s7261_s3] ss:$16 sps:$4 sm:$0xff]   ;;  %v4368_v32 = vld [vmem:[%s7261_s3 + $0x8] ss:$16 sps:$4 sm:$0xff]   ;;  %v4371_v35 = vld [vmem:[%s7262_s6 + $0xe4] ss:$16 sps:$4 sm:$0xff]  }
   0xc   :  { %375 = vmatpush1.bf16.msra.mxu0 %v4337_v11  ;;  %448 = vmatpush1.bf16.msra.mxu1 %v4338_v12  ;;  %v144_v33 = vld [vmem:[%s7263_s0] sm:$0xff]  ;;  %v145_v34 = vld [vmem:[%s7263_s0 + $0x8] sm:$0xff]  ;;  %v146_v44 = vld [vmem:[%s7263_s0 + $0x10] sm:$0xff]  ;;  %vm3953_vm13 = vcmask 1043459   ;;  %vm3955_vm14 = vcmask 1044484   ;;  %vm3957_vm15 = vcmask 61440  }
   0xd   :  { %376 = vmatprep.subr.bf16.mxu0 %v4339_v13  ;;  %449 = vmatprep.subr.bf16.mxu1 %v4341_v14  ;;  %v4374_v36 = vld [vmem:[%s7262_s6 + $0xec] ss:$16 sps:$4 sm:$0xff]   ;;  %v152_v37 = vpack.c.bf16 %v145_v34, %v144_v33  ;;  %v4369_v38 = vld [vmem:[%s7262_s6 + $0xe0] ss:$16 sps:$4 sm:$0xff]   ;;  %v4372_v39 = vld [vmem:[%s7262_s6 + $0xe8] ss:$16 sps:$4 sm:$0xff]  }
   0xe   :  { %v4377_v40 = vld [vmem:[%s7262_s6 + $0xc4] ss:$16 sps:$4 sm:$0xff]   ;;  %v4380_v41 = vld [vmem:[%s7262_s6 + $0xcc] ss:$16 sps:$4 sm:$0xff]   ;;  %v4375_v42 = vld [vmem:[%s7262_s6 + $0xc0] ss:$16 sps:$4 sm:$0xff]  }
   0xf   :  { %v4378_v43 = vld [vmem:[%s7262_s6 + $0xc8] ss:$16 sps:$4 sm:$0xff]   ;;  %v4383_v46 = vld [vmem:[%s7262_s6 + $0xa4] ss:$16 sps:$4 sm:$0xff]   ;;  %v4386_v47 = vld [vmem:[%s7262_s6 + $0xac] ss:$16 sps:$4 sm:$0xff]  }
  0x10   :  { %377 = vmatpush1.bf16.msra.mxu0 %v4343_v15  ;;  %450 = vmatpush1.bf16.msra.mxu1 %v4344_v16  ;;  %v147_v45 = vld [vmem:[%s7263_s0 + $0x18] sm:$0xff]  ;;  %v4381_v49 = vld [vmem:[%s7262_s6 + $0xa0] ss:$16 sps:$4 sm:$0xff]   ;;  %v4389_v51 = vld [vmem:[%s7262_s6 + $0x84] ss:$16 sps:$4 sm:$0xff]  }
  0x11   :  { %378 = vmatprep.subr.bf16.mxu0 %v4345_v17  ;;  %451 = vmatprep.subr.bf16.mxu1 %v4347_v18  ;;  %v153_v48 = vpack.c.bf16 %v147_v45, %v146_v44  ;;  %v4384_v50 = vld [vmem:[%s7262_s6 + $0xa8] ss:$16 sps:$4 sm:$0xff]   ;;  %v4392_v52 = vld [vmem:[%s7262_s6 + $0x8c] ss:$16 sps:$4 sm:$0xff]   ;;  %v4387_v53 = vld [vmem:[%s7262_s6 + $0x80] ss:$16 sps:$4 sm:$0xff]  }
  0x12   :  { %v4390_v54 = vld [vmem:[%s7262_s6 + $0x88] ss:$16 sps:$4 sm:$0xff]   ;;  %v148_v55 = vld [vmem:[%s7263_s0 + $0x20] sm:$0xff]  ;;  %v4398_v58 = vld [vmem:[%s7262_s6 + $0x6c] ss:$16 sps:$4 sm:$0xff]  }
  0x13   :  { %v149_v56 = vld [vmem:[%s7263_s0 + $0x28] sm:$0xff]  ;;  %v4395_v57 = vld [vmem:[%s7262_s6 + $0x64] ss:$16 sps:$4 sm:$0xff]   ;;  %v4393_v60 = vld [vmem:[%s7262_s6 + $0x60] ss:$16 sps:$4 sm:$0xff]  }
  0x14   :  { %379 = vmatpush1.bf16.msra.mxu0 %v4349_v19  ;;  %452 = vmatpush1.bf16.msra.mxu1 %v4350_v20  ;;  %v154_v59 = vpack.c.bf16 %v149_v56, %v148_v55  ;;  %v4396_v61 = vld [vmem:[%s7262_s6 + $0x68] ss:$16 sps:$4 sm:$0xff]   ;;  %v4401_v62 = vld [vmem:[%s7262_s6 + $0x44] ss:$16 sps:$4 sm:$0xff]   ;;  %v4404_v63 = vld [vmem:[%s7262_s6 + $0x4c] ss:$16 sps:$4 sm:$0xff]  }
  0x15   :  { %380 = vmatprep.subr.bf16.mxu0 %v4351_v21  ;;  %453 = vmatprep.subr.bf16.mxu1 %v4353_v22  ;;  %v4399_v0 = vld [vmem:[%s7262_s6 + $0x40] ss:$16 sps:$4 sm:$0xff]   ;;  %v4402_v2 = vld [vmem:[%s7262_s6 + $0x48] ss:$16 sps:$4 sm:$0xff]   ;;  %v4407_v5 = vld [vmem:[%s7262_s6 + $0x24] ss:$16 sps:$4 sm:$0xff]  }
  0x16   :  { %v150_v3 = vld [vmem:[%s7263_s0 + $0x30] sm:$0xff]  ;;  %v151_v4 = vld [vmem:[%s7263_s0 + $0x38] sm:$0xff]  ;;  %v548_v14 = vld [vmem:[%s7265_s2] sm:$0xff] }
  0x17   :  { %v4410_v6 = vld [vmem:[%s7262_s6 + $0x2c] ss:$16 sps:$4 sm:$0xff]   ;;  %v155_v7 = vpack.c.bf16 %v151_v4, %v150_v3  ;;  %v4405_v8 = vld [vmem:[%s7262_s6 + $0x20] ss:$16 sps:$4 sm:$0xff]   ;;  %v4408_v9 = vld [vmem:[%s7262_s6 + $0x28] ss:$16 sps:$4 sm:$0xff]  }
  0x18   :  { %381 = vmatpush1.bf16.msra.mxu0 %v4355_v23  ;;  %454 = vmatpush1.bf16.msra.mxu1 %v4356_v24  ;;  %v4413_v10 = vld [vmem:[%s7262_s6 + $0x4] ss:$16 sps:$4 sm:$0xff]   ;;  %v4416_v11 = vld [vmem:[%s7262_s6 + $0xc] ss:$16 sps:$4 sm:$0xff]   ;;  %v4411_v12 = vld [vmem:[%s7262_s6] ss:$16 sps:$4 sm:$0xff]  }
  0x19   :  { %382 = vmatprep.subr.bf16.mxu0 %v4357_v25  ;;  %455 = vmatprep.subr.bf16.mxu1 %v4359_v26  ;;  %v4414_v13 = vld [vmem:[%s7262_s6 + $0x8] ss:$16 sps:$4 sm:$0xff]   ;;  %v5259_v16 = vld [vmem:[%s7264_s4 + $0xe4] ss:$16 sps:$4 sm:$0xff]   ;;  %v5264_v17 = vld [vmem:[%s7264_s4 + $0xec] ss:$16 sps:$4 sm:$0xff]  }
  0x1a   :  { %v549_v15 = vld [vmem:[%s7265_s2 + $0x8] sm:$0xff]  ;;  %v5271_v19 = vld [vmem:[%s7264_s4 + $0xe0] ss:$16 sps:$4 sm:$0xff]   ;;  %v5283_v21 = vld [vmem:[%s7264_s4 + $0xc4] ss:$16 sps:$4 sm:$0xff]  }
  0x1b   :  { %v553_v18 = vpack.c.bf16 %v549_v15, %v548_v14  ;;  %v5276_v20 = vld [vmem:[%s7264_s4 + $0xe8] ss:$16 sps:$4 sm:$0xff]   ;;  %v5288_v22 = vld [vmem:[%s7264_s4 + $0xcc] ss:$16 sps:$4 sm:$0xff]   ;;  %v5293_v23 = vld [vmem:[%s7264_s4 + $0xc0] ss:$16 sps:$4 sm:$0xff]  }
  0x1c   :  { %383 = vmatpush1.bf16.msra.mxu0 %v4361_v27  ;;  %456 = vmatpush1.bf16.msra.mxu1 %v4362_v28  ;;  %v5298_v24 = vld [vmem:[%s7264_s4 + $0xc8] ss:$16 sps:$4 sm:$0xff]   ;;  %v550_v25 = vld [vmem:[%s7265_s2 + $0x10] sm:$0xff]  ;;  %v1186_v27 = vld [vmem:[%s7266_s1] sm:$0xff] }
  0x1d   :  { %384 = vmatprep.subr.bf16.mxu0 %v4363_v29  ;;  %457 = vmatprep.subr.bf16.mxu1 %v4365_v30  ;;  %v551_v26 = vld [vmem:[%s7265_s2 + $0x18] sm:$0xff]  ;;  %v5316_v28 = vld [vmem:[%s7264_s4 + $0xa4] ss:$16 sps:$4 sm:$0xff]   ;;  %v5466_v56 = vld [vmem:[%s7264_s4] ss:$16 sps:$4 sm:$0xff]  }
  0x1e   :  { %v5321_v29 = vld [vmem:[%s7264_s4 + $0xac] ss:$16 sps:$4 sm:$0xff]   ;;  %v554_v30 = vpack.c.bf16 %v551_v26, %v550_v25  ;;  %1189 = vperm.xlu0 %4319, %v1186_v27   ;;  %v5342_v33 = vld [vmem:[%s7264_s4 + $0x84] ss:$16 sps:$4 sm:$0xff]  }
  0x1f   :  { %v5347_v34 = vld [vmem:[%s7264_s4 + $0x8c] ss:$16 sps:$4 sm:$0xff]   ;;  %v5398_v44 = vld [vmem:[%s7264_s4 + $0x44] ss:$16 sps:$4 sm:$0xff]  }
  0x20   :  { %385 = vmatpush1.bf16.msra.mxu0 %v4367_v31  ;;  %458 = vmatpush1.bf16.msra.mxu1 %v4368_v32  ;;  %v5330_v31 = vld [vmem:[%s7264_s4 + $0xa0] ss:$16 sps:$4 sm:$0xff]   ;;  %v5335_v32 = vld [vmem:[%s7264_s4 + $0xa8] ss:$16 sps:$4 sm:$0xff]   ;;  %v5403_v45 = vld [vmem:[%s7264_s4 + $0x4c] ss:$16 sps:$4 sm:$0xff]  }
  0x21   :  { %770 = vmatprep.subr.bf16.mxu0 %v4371_v35  ;;  %831 = vmatprep.subr.bf16.mxu1 %v4374_v36  ;;  %v5352_v35 = vld [vmem:[%s7264_s4 + $0x80] ss:$16 sps:$4 sm:$0xff]   ;;  %v5359_v36 = vld [vmem:[%s7264_s4 + $0x88] ss:$16 sps:$4 sm:$0xff]   ;;  %v5459_v55 = vld [vmem:[%s7264_s4 + $0xc] ss:$16 sps:$4 sm:$0xff]  }
  0x23   :  { %403 = vmatmul.mubr.bf16.vlgmr.msra.gmra.mxu0 %v152_v37  ;;  %476 = vmatmul.mubr.bf16.vlgmr.msra.gmra.mxu1 %v152_v37  ;;  %v552_v37 = vld [vmem:[%s7265_s2 + $0x20] sm:$0xff] }
  0x24   :  { %771 = vmatpush1.bf16.msra.mxu0 %v4369_v38  ;;  %832 = vmatpush1.bf16.msra.mxu1 %v4372_v39  ;;  %v4069_v38 = vld [vmem:[%s7266_s1 + $0x8] sm:$0xff]  ;;  %v5372_v39 = vld [vmem:[%s7264_s4 + $0x64] ss:$16 sps:$4 sm:$0xff]  }
  0x25   :  { %772 = vmatprep.subr.bf16.mxu0 %v4377_v40  ;;  %833 = vmatprep.subr.bf16.mxu1 %v4380_v41  ;;  %v5377_v40 = vld [vmem:[%s7264_s4 + $0x6c] ss:$16 sps:$4 sm:$0xff]   ;;  %v555_v41 = vpack.c.bf16 %v552_v37, %v552_v37 }
  0x26   :  { %412 = vmatprep.mubr.bf16.mxu0 %v7277_v1  ;;  %485 = vmatprep.mubr.bf16.mxu1 %v7277_v1 }
  0x27   :  { %1317 = vperm.xlu0 %4319, %v4069_v38  }
  0x28   :  { %773 = vmatpush1.bf16.msra.mxu0 %v4375_v42  ;;  %834 = vmatpush1.bf16.msra.mxu1 %v4378_v43  ;;  %v5386_v42 = vld [vmem:[%s7264_s4 + $0x60] ss:$16 sps:$4 sm:$0xff]   ;;  %v5391_v43 = vld [vmem:[%s7264_s4 + $0x68] ss:$16 sps:$4 sm:$0xff]  }
  0x29   :  { %774 = vmatprep.subr.bf16.mxu0 %v4383_v46  ;;  %835 = vmatprep.subr.bf16.mxu1 %v4386_v47  ;;  %v5410_v46 = vld [vmem:[%s7264_s4 + $0x40] ss:$16 sps:$4 sm:$0xff]   ;;  %v5415_v47 = vld [vmem:[%s7264_s4 + $0x48] ss:$16 sps:$4 sm:$0xff]  }
  0x2b   :  { %413 = vmatmul.mubr.bf16.gmra.mxu0 %v153_v48  ;;  %486 = vmatmul.mubr.bf16.gmra.mxu1 %v153_v48  ;;  %v4081_v48 = vld [vmem:[%s7266_s1 + $0x20] sm:$0xff] }
  0x2c   :  { %775 = vmatpush1.bf16.msra.mxu0 %v4381_v49  ;;  %836 = vmatpush1.bf16.msra.mxu1 %v4384_v50  ;;  %v5425_v49 = vld [vmem:[%s7264_s4 + $0x24] ss:$16 sps:$4 sm:$0xff]   ;;  %v5430_v50 = vld [vmem:[%s7264_s4 + $0x2c] ss:$16 sps:$4 sm:$0xff]  }
  0x2d   :  { %776 = vmatprep.subr.bf16.mxu0 %v4389_v51  ;;  %837 = vmatprep.subr.bf16.mxu1 %v4392_v52  ;;  %v5439_v51 = vld [vmem:[%s7264_s4 + $0x20] ss:$16 sps:$4 sm:$0xff]   ;;  %v5444_v52 = vld [vmem:[%s7264_s4 + $0x28] ss:$16 sps:$4 sm:$0xff]  }
  0x2e   :  { %422 = vmatprep.mubr.bf16.mxu0 %v7277_v1  ;;  %495 = vmatprep.mubr.bf16.mxu1 %v7277_v1 }
  0x2f   :  { %1713 = vperm.xlu0 %4319, %v4081_v48  }
  0x30   :  { %777 = vmatpush1.bf16.msra.mxu0 %v4387_v53  ;;  %838 = vmatpush1.bf16.msra.mxu1 %v4390_v54  ;;  %v4089_v53 = vld [vmem:[%s7266_s1 + $0x30] sm:$0xff] }
  0x31   :  { %778 = vmatprep.subr.bf16.mxu0 %v4395_v57  ;;  %839 = vmatprep.subr.bf16.mxu1 %v4398_v58  ;;  %v5454_v54 = vld [vmem:[%s7264_s4 + $0x4] ss:$16 sps:$4 sm:$0xff]   ;;  %v5471_v57 = vld [vmem:[%s7264_s4 + $0x8] ss:$16 sps:$4 sm:$0xff]   ;;  %v7276_v58 = vlaneseq }
  0x33   :  { %423 = vmatmul.mubr.bf16.gmra.mxu0 %v154_v59  ;;  %496 = vmatmul.mubr.bf16.gmra.mxu1 %v154_v59  ;;  %v5516_v59 = vshrl.u32 %v7276_v58, 7 }
  0x34   :  { %779 = vmatpush1.bf16.msra.mxu0 %v4393_v60  ;;  %840 = vmatpush1.bf16.msra.mxu1 %v4396_v61 }
  0x35   :  { %780 = vmatprep.subr.bf16.mxu0 %v4401_v62  ;;  %841 = vmatprep.subr.bf16.mxu1 %v4404_v63  ;;  %7336 = vst [vmem:[#allocation6_spill] sm:$0xff] %v5516_v59  ;;  %v7281_v60 = vsub.s32 2, %v5516_v59  ;;  %v7282_v61 = vsub.s32 0, %v5516_v59  ;;  %v7279_v62 = vsub.s32 3, %v5516_v59  ;;  %v188_v63 = vld [vmem:[%s7267_s5] sm:$0xf] }
  0x36   :  { %432 = vmatprep.mubr.bf16.mxu0 %v7277_v1  ;;  %505 = vmatprep.mubr.bf16.mxu1 %v7277_v1  ;;  %v7280_v3 = vsub.s32 1, %v5516_v59 }
  0x37   :  { %1977 = vperm.xlu0 %4319, %v4089_v53   ;;  %v5531_v4 = vrot.slane %v188_v63, %v7281_v60 }
  0x38   :  { %781 = vmatpush1.bf16.msra.mxu0 %v4399_v0  ;;  %842 = vmatpush1.bf16.msra.mxu1 %v4402_v2 }
  0x39   :  { %782 = vmatprep.subr.bf16.mxu0 %v4407_v5  ;;  %843 = vmatprep.subr.bf16.mxu1 %v4410_v6 }
  0x3b   :  { %433 = vmatmul.mubr.bf16.gmra.mxu0 %v155_v7  ;;  %506 = vmatmul.mubr.bf16.gmra.mxu1 %v155_v7  ;;  %v5539_v7 = vrot.slane %v188_v63, %v7282_v61 }
  0x3c   :  { %783 = vmatpush1.bf16.msra.mxu0 %v4405_v8  ;;  %844 = vmatpush1.bf16.msra.mxu1 %v4408_v9  ;;  %v5543_v8 = vrot.slane %v188_v63, %v7279_v62 }
  0x3d   :  { %784 = vmatprep.subr.bf16.mxu0 %v4413_v10  ;;  %845 = vmatprep.subr.bf16.mxu1 %v4416_v11  ;;  %v5547_v11 = vrot.slane %v188_v63, %v7280_v3 }
  0x3e   :  { %802 = vmatprep.mubr.bf16.mxu0 %v7277_v1  ;;  %863 = vmatprep.mubr.bf16.mxu1 %v7277_v1 }
  0x40   :  { %785 = vmatpush1.bf16.msra.mxu0 %v4411_v12  ;;  %846 = vmatpush1.bf16.msra.mxu1 %v4414_v13 }
  0x41   :  { %1076 = vmatprep.subr.bf16.mxu0 %v5259_v16  ;;  %1117 = vmatprep.subr.bf16.mxu1 %v5264_v17 }
  0x43   :  { %803 = vmatmul.mubr.bf16.vlgmr.msra.gmra.mxu0 %v553_v18  ;;  %864 = vmatmul.mubr.bf16.vlgmr.msra.gmra.mxu1 %v553_v18 }
  0x44   :  { %1077 = vmatpush1.bf16.msra.mxu0 %v5271_v19  ;;  %1118 = vmatpush1.bf16.msra.mxu1 %v5276_v20 }
  0x45   :  { %1078 = vmatprep.subr.bf16.mxu0 %v5283_v21  ;;  %1119 = vmatprep.subr.bf16.mxu1 %v5288_v22 }
  0x46   :  { %812 = vmatprep.mubr.bf16.mxu0 %v7277_v1  ;;  %873 = vmatprep.mubr.bf16.mxu1 %v7277_v1 }
  0x48   :  { %1079 = vmatpush1.bf16.msra.mxu0 %v5293_v23  ;;  %1120 = vmatpush1.bf16.msra.mxu1 %v5298_v24 }
  0x49   :  { %1080 = vmatprep.subr.bf16.mxu0 %v5316_v28  ;;  %1121 = vmatprep.subr.bf16.mxu1 %v5321_v29 }
  0x4b   :  { %813 = vmatmul.mubr.bf16.gmra.mxu0 %v554_v30  ;;  %874 = vmatmul.mubr.bf16.gmra.mxu1 %v554_v30 }
  0x4c   :  { %1081 = vmatpush1.bf16.msra.mxu0 %v5330_v31  ;;  %1122 = vmatpush1.bf16.msra.mxu1 %v5335_v32 }
  0x4d   :  { %1082 = vmatprep.subr.bf16.mxu0 %v5342_v33  ;;  %1123 = vmatprep.subr.bf16.mxu1 %v5347_v34 }
  0x4e   :  { %822 = vmatprep.mubr.bf16.mxu0 %v7277_v1  ;;  %883 = vmatprep.mubr.bf16.mxu1 %v7277_v1 }
  0x50   :  { %1083 = vmatpush1.bf16.msra.mxu0 %v5352_v35  ;;  %1124 = vmatpush1.bf16.msra.mxu1 %v5359_v36 }
  0x51   :  { %1084 = vmatprep.subr.bf16.mxu0 %v5372_v39  ;;  %1125 = vmatprep.subr.bf16.mxu1 %v5377_v40 }
  0x53   :  { %823 = vmatmul.mubr.bf16.gmra.mxu0 %v555_v41  ;;  %884 = vmatmul.mubr.bf16.gmra.mxu1 %v555_v41 }
  0x54   :  { %1085 = vmatpush1.bf16.msra.mxu0 %v5386_v42  ;;  %1126 = vmatpush1.bf16.msra.mxu1 %v5391_v43 }
  0x55   :  { %1086 = vmatprep.subr.bf16.mxu0 %v5398_v44  ;;  %1127 = vmatprep.subr.bf16.mxu1 %v5403_v45 }
  0x56   :  { %1108 = vmatprep.mubr.bf16.mxu0 %v7277_v1  ;;  %1149 = vmatprep.mubr.bf16.mxu1 %v7277_v1 }
  0x58   :  { %1087 = vmatpush1.bf16.msra.mxu0 %v5410_v46  ;;  %1128 = vmatpush1.bf16.msra.mxu1 %v5415_v47 }
  0x59   :  { %1088 = vmatprep.subr.bf16.mxu0 %v5425_v49  ;;  %1129 = vmatprep.subr.bf16.mxu1 %v5430_v50 }
  0x5c   :  { %1089 = vmatpush1.bf16.msra.mxu0 %v5439_v51  ;;  %1130 = vmatpush1.bf16.msra.mxu1 %v5444_v52 }
  0x5d   :  { %1090 = vmatprep.subr.bf16.mxu0 %v5454_v54  ;;  %1131 = vmatprep.subr.bf16.mxu1 %v5459_v55 }
  0x60   :  { %1091 = vmatpush1.bf16.msra.mxu0 %v5466_v56  ;;  %1132 = vmatpush1.bf16.msra.mxu1 %v5471_v57 }
  0x61   :  { %1203 = vmatprep.subr.bf16.mxu0 %v5259_v16  ;;  %1244 = vmatprep.subr.bf16.mxu1 %v5264_v17 }
  0x63   :  { %1109 = vmatmul.mubr.bf16.vlgmr.msra.gmra.mxu0 %v7277_v1  ;;  %1150 = vmatmul.mubr.bf16.vlgmr.msra.gmra.mxu1 %v7277_v1 }
  0x64   :  { %1204 = vmatpush1.bf16.msra.mxu0 %v5271_v19  ;;  %1245 = vmatpush1.bf16.msra.mxu1 %v5276_v20 }
  0x65   :  { %1205 = vmatprep.subr.bf16.mxu0 %v5283_v21  ;;  %1246 = vmatprep.subr.bf16.mxu1 %v5288_v22 }
  0x66   :  { %1235 = vmatprep.mubr.bf16.mxu0 %v7277_v1  ;;  %1276 = vmatprep.mubr.bf16.mxu1 %v7277_v1 }
  0x68   :  { %1206 = vmatpush1.bf16.msra.mxu0 %v5293_v23  ;;  %1247 = vmatpush1.bf16.msra.mxu1 %v5298_v24 }
  0x69   :  { %1207 = vmatprep.subr.bf16.mxu0 %v5316_v28  ;;  %1248 = vmatprep.subr.bf16.mxu1 %v5321_v29 }
  0x6c   :  { %1208 = vmatpush1.bf16.msra.mxu0 %v5330_v31  ;;  %1249 = vmatpush1.bf16.msra.mxu1 %v5335_v32 }
  0x6d   :  { %1209 = vmatprep.subr.bf16.mxu0 %v5342_v33  ;;  %1250 = vmatprep.subr.bf16.mxu1 %v5347_v34 }
  0x70   :  { %1210 = vmatpush1.bf16.msra.mxu0 %v5352_v35  ;;  %1251 = vmatpush1.bf16.msra.mxu1 %v5359_v36 }
  0x71   :  { %1211 = vmatprep.subr.bf16.mxu0 %v5372_v39  ;;  %1252 = vmatprep.subr.bf16.mxu1 %v5377_v40 }
  0x74   :  { %1212 = vmatpush1.bf16.msra.mxu0 %v5386_v42  ;;  %1253 = vmatpush1.bf16.msra.mxu1 %v5391_v43 }
  0x75   :  { %1213 = vmatprep.subr.bf16.mxu0 %v5398_v44  ;;  %1254 = vmatprep.subr.bf16.mxu1 %v5403_v45 }
  0x78   :  { %1214 = vmatpush1.bf16.msra.mxu0 %v5410_v46  ;;  %1255 = vmatpush1.bf16.msra.mxu1 %v5415_v47 }
  0x79   :  { %1215 = vmatprep.subr.bf16.mxu0 %v5425_v49  ;;  %1256 = vmatprep.subr.bf16.mxu1 %v5430_v50 }
  0x7c   :  { %1216 = vmatpush1.bf16.msra.mxu0 %v5439_v51  ;;  %1257 = vmatpush1.bf16.msra.mxu1 %v5444_v52 }
  0x7d   :  { %1217 = vmatprep.subr.bf16.mxu0 %v5454_v54  ;;  %1258 = vmatprep.subr.bf16.mxu1 %v5459_v55 }
  0x80   :  { %1218 = vmatpush1.bf16.msra.mxu0 %v5466_v56  ;;  %1259 = vmatpush1.bf16.msra.mxu1 %v5471_v57 }
  0x81   :  { %1335 = vmatprep.subr.bf16.mxu0 %v5259_v16  ;;  %1376 = vmatprep.subr.bf16.mxu1 %v5264_v17 }
  0xe3   :  { %v5524_v0 = vpop.f32.mrf.mxu0  ;;  %v5526_v2 = vpop.f32.mrf.mxu1 }
  0xe5   :  { %v5533_v5 = vpop.f32.mrf.mxu0  ;;  %v5535_v6 = vpop.f32.mrf.mxu1 }
  0xe7   :  { %v408_v9 = vpop.f32.mrf.mxu0  ;;  %v481_v10 = vpop.f32.mrf.mxu1 }
  0xe8   :  { %v5550_v12 = vadd.f32 %v408_v9, %v5539_v7  ;;  %v5553_v13 = vadd.f32 %v481_v10, %v5531_v4 }
  0xe9   :  { %v410_v14 = vpop.f32.mrf.mxu0  ;;  %v483_v15 = vpop.f32.mrf.mxu1 }
  0xea   :  { %v5556_v18 = vadd.f32 %v410_v14, %v5547_v11  ;;  %v5559_v25 = vadd.f32 %v483_v15, %v5543_v8 }
  0xeb   :  { %v414_v26 = vpop.f32.mrf.mxu0  ;;  %v487_v27 = vpop.f32.mrf.mxu1 }
  0xec   :  { %v5562_v30 = vadd.f32 %v414_v26, %v5539_v7  ;;  %v5565_v37 = vadd.f32 %v487_v27, %v5531_v4 }
  0xed   :  { %v416_v38 = vpop.f32.mrf.mxu0  ;;  %v489_v41 = vpop.f32.mrf.mxu1 }
  0xee   :  { %7337 = vst [vmem:[#allocation7_spill] sm:$0xff] %v5562_v30  ;;  %7338 = vst [vmem:[#allocation8_spill] sm:$0xff] %v5565_v37  ;;  %v5568_v48 = vadd.f32 %v416_v38, %v5547_v11  ;;  %v5571_v53 = vadd.f32 %v489_v41, %v5543_v8 }
  0xef   :  { %v418_v63 = vpop.f32.mrf.mxu0  ;;  %v491_v9 = vpop.f32.mrf.mxu1 }
  0xf0   :  { %7339 = vst [vmem:[#allocation9_spill] sm:$0xff] %v5568_v48  ;;  %7340 = vst [vmem:[#allocation10_spill] sm:$0xff] %v5571_v53  ;;  %v5574_v10 = vadd.f32 %v418_v63, %v5539_v7  ;;  %v5577_v14 = vadd.f32 %v491_v9, %v5531_v4 }
  0xf1   :  { %v420_v15 = vpop.f32.mrf.mxu0  ;;  %v493_v26 = vpop.f32.mrf.mxu1 }
  0xf2   :  { %7341 = vst [vmem:[#allocation11_spill] sm:$0xff] %v5574_v10  ;;  %7342 = vst [vmem:[#allocation12_spill] sm:$0xff] %v5577_v14  ;;  %v5580_v27 = vadd.f32 %v420_v15, %v5547_v11  ;;  %v5583_v58 = vadd.f32 %v493_v26, %v5543_v8 }
  0xf3   :  { %v424_v38 = vpop.f32.mrf.mxu0  ;;  %v497_v1 = vpop.f32.mrf.mxu1 }
  0xf4   :  { %7343 = vst [vmem:[#allocation13_spill] sm:$0xff] %v5580_v27  ;;  %7344 = vst [vmem:[#allocation14_spill] sm:$0xff] %v5583_v58  ;;  %v5586_v41 = vadd.f32 %v424_v38, %v5539_v7  ;;  %v5589_v62 = vadd.f32 %v497_v1, %v5531_v4 }
  0xf5   :  { %v426_v63 = vpop.f32.mrf.mxu0  ;;  %v499_v3 = vpop.f32.mrf.mxu1 }
  0xf6   :  { %7345 = vst [vmem:[#allocation15_spill] sm:$0xff] %v5586_v41  ;;  %7346 = vst [vmem:[#allocation16_spill] sm:$0xff] %v5589_v62  ;;  %v5592_v9 = vadd.f32 %v426_v63, %v5547_v11  ;;  %v5595_v60 = vadd.f32 %v499_v3, %v5543_v8 }
  0xf7   :  { %v428_v15 = vpop.f32.mrf.mxu0  ;;  %v501_v61 = vpop.f32.mrf.mxu1 }
  0xf8   :  { %7347 = vst [vmem:[#allocation17_spill] sm:$0xff] %v5592_v9  ;;  %7348 = vst [vmem:[#allocation18_spill] sm:$0xff] %v5595_v60  ;;  %v5598_v26 = vadd.f32 %v428_v15, %v5539_v7  ;;  %v5601_v14 = vadd.f32 %v501_v61, %v5531_v4  ;;  %v588_v61 = vld [vmem:[%s7268_s8] sm:$0xf] }
  0xf9   :  { %v430_v38 = vpop.f32.mrf.mxu0  ;;  %v503_v41 = vpop.f32.mrf.mxu1 }
  0xfa   :  { %7349 = vst [vmem:[#allocation19_spill] sm:$0xff] %v5598_v26  ;;  %7350 = vst [vmem:[#allocation20_spill] sm:$0xff] %v5601_v14  ;;  %v5604_v1 = vadd.f32 %v430_v38, %v5547_v11  ;;  %v5607_v62 = vadd.f32 %v503_v41, %v5543_v8  ;;  %v7360_v26 = vsub.s32 2, %v5516_v59 }
  0xfb   :  { %v434_v63 = vpop.f32.mrf.mxu0  ;;  %v507_v9 = vpop.f32.mrf.mxu1 }
  0xfc   :  { %7351 = vst [vmem:[#allocation21_spill] sm:$0xff] %v5604_v1  ;;  %7352 = vst [vmem:[#allocation22_spill] sm:$0xff] %v5607_v62  ;;  %v5610_v3 = vadd.f32 %v434_v63, %v5539_v7  ;;  %v5613_v60 = vadd.f32 %v507_v9, %v5531_v4  ;;  %v7358_v9 = vsub.s32 0, %v5516_v59  ;;  %v601_v58 = vrot.slane %v588_v61, %v7360_v26 }
  0xfd   :  { %v436_v15 = vpop.f32.mrf.mxu0  ;;  %v509_v14 = vpop.f32.mrf.mxu1 }
  0xfe   :  { %7353 = vst [vmem:[#allocation23_spill] sm:$0xff] %v5610_v3  ;;  %7354 = vst [vmem:[#allocation24_spill] sm:$0xff] %v5613_v60  ;;  %v5619_v38 = vadd.f32 %v436_v15, %v5547_v11  ;;  %v5622_v41 = vadd.f32 %v509_v14, %v5543_v8  ;;  %v593_v60 = vrot.slane %v588_v61, %v7358_v9  ;;  %v7362_v14 = vsub.s32 1, %v5516_v59 }
  0xff   :  { %v438_v62 = vpop.f32.mrf.mxu0  ;;  %v511_v1 = vpop.f32.mrf.mxu1 }
 0x100   :  { %7355 = vst [vmem:[#allocation25_spill] sm:$0xff] %v5619_v38  ;;  %7356 = vst [vmem:[#allocation26_spill] sm:$0xff] %v5622_v41  ;;  %v5625_v63 = vadd.f32 %v438_v62, %v5539_v7  ;;  %v5630_v3 = vadd.f32 %v511_v1, %v5531_v4  ;;  %v597_v41 = vrot.slane %v588_v61, %v7362_v14 }
 0x101   :  { %v440_v27 = vpop.f32.mrf.mxu0  ;;  %v513_v15 = vpop.f32.mrf.mxu1 }
 0x102   :  { %7357 = vst [vmem:[#allocation27_spill] sm:$0xff] %v5625_v63  ;;  %7359 = vst [vmem:[#allocation28_spill] sm:$0xff] %v5630_v3  ;;  %v5635_v38 = vadd.f32 %v440_v27, %v5547_v11  ;;  %v5640_v62 = vadd.f32 %v513_v15, %v5543_v8  ;;  %v7364_v63 = vsub.s32 3, %v5516_v59 }
 0x103   :  { %v804_v10 = vpop.f32.mrf.mxu0  ;;  %v865_v1 = vpop.f32.mrf.mxu1 }
 0x104   :  { %7361 = vst [vmem:[#allocation29_spill] sm:$0xff] %v5635_v38  ;;  %7363 = vst [vmem:[#allocation30_spill] sm:$0xff] %v5640_v62  ;;  %v605_v9 = vrot.slane %v588_v61, %v7364_v63  ;;  %v5644_v3 = vadd.f32 %v804_v10, %v593_v60  ;;  %v5646_v37 = vadd.f32 %v865_v1, %v601_v58 }
 0x105   :  { %v806_v26 = vpop.f32.mrf.mxu0  ;;  %v867_v53 = vpop.f32.mrf.mxu1 }
 0x106   :  { %7365 = vst [vmem:[#allocation31_spill] sm:$0xff] %v5644_v3  ;;  %7366 = vst [vmem:[#allocation32_spill] sm:$0xff] %v5646_v37  ;;  %v5648_v48 = vadd.f32 %v806_v26, %v597_v41  ;;  %v5650_v27 = vadd.f32 %v867_v53, %v605_v9 }
 0x107   :  { %v808_v38 = vpop.f32.mrf.mxu0  ;;  %v869_v14 = vpop.f32.mrf.mxu1 }
 0x108   :  { %7367 = vst [vmem:[#allocation33_spill] sm:$0xff] %v5648_v48  ;;  %7368 = vst [vmem:[#allocation34_spill] sm:$0xff] %v5650_v27  ;;  %v5652_v30 = vadd.f32 %v808_v38, %v593_v60  ;;  %v5654_v15 = vadd.f32 %v869_v14, %v601_v58 }
 0x109   :  { %v810_v59 = vpop.f32.mrf.mxu0  ;;  %v871_v61 = vpop.f32.mrf.mxu1 }
 0x10a   :  { %7369 = vst [vmem:[#allocation35_spill] sm:$0xff] %v5652_v30  ;;  %7370 = vst [vmem:[#allocation36_spill] sm:$0xff] %v5654_v15  ;;  %v5656_v63 = vadd.f32 %v810_v59, %v597_v41  ;;  %v5658_v10 = vadd.f32 %v871_v61, %v605_v9 }
 0x10b   :  { %v814_v1 = vpop.f32.mrf.mxu0  ;;  %v875_v37 = vpop.f32.mrf.mxu1 }
 0x10c   :  { %7371 = vst [vmem:[#allocation37_spill] sm:$0xff] %v5656_v63  ;;  %7372 = vst [vmem:[#allocation38_spill] sm:$0xff] %v5658_v10  ;;  %v5660_v3 = vadd.f32 %v814_v1, %v593_v60  ;;  %v5662_v26 = vadd.f32 %v875_v37, %v601_v58 }
 0x10d   :  { %v816_v53 = vpop.f32.mrf.mxu0  ;;  %v877_v27 = vpop.f32.mrf.mxu1 }
 0x10e   :  { %7373 = vst [vmem:[#allocation39_spill] sm:$0xff] %v5660_v3  ;;  %7374 = vst [vmem:[#allocation40_spill] sm:$0xff] %v5662_v26  ;;  %v5664_v48 = vadd.f32 %v816_v53, %v597_v41  ;;  %v5666_v38 = vadd.f32 %v877_v27, %v605_v9 }
 0x10f   :  { %v818_v14 = vpop.f32.mrf.mxu0  ;;  %v879_v15 = vpop.f32.mrf.mxu1 }
 0x110   :  { %7375 = vst [vmem:[#allocation41_spill] sm:$0xff] %v5664_v48  ;;  %7376 = vst [vmem:[#allocation42_spill] sm:$0xff] %v5666_v38  ;;  %v5668_v30 = vadd.f32 %v818_v14, %v593_v60  ;;  %v5670_v59 = vadd.f32 %v879_v15, %v601_v58 }
 0x111   :  { %v820_v61 = vpop.f32.mrf.mxu0  ;;  %v881_v10 = vpop.f32.mrf.mxu1 }
 0x112   :  { %7377 = vst [vmem:[#allocation43_spill] sm:$0xff] %v5668_v30  ;;  %7378 = vst [vmem:[#allocation44_spill] sm:$0xff] %v5670_v59  ;;  %v5672_v63 = vadd.f32 %v820_v61, %v597_v41  ;;  %v5674_v1 = vadd.f32 %v881_v10, %v605_v9  ;;  %v405_v10 = vadd.f32 %v5524_v0, %v5539_v7 }
 0x113   :  { %v824_v37 = vpop.f32.mrf.mxu0  ;;  %v885_v26 = vpop.f32.mrf.mxu1  ;;  %v480_v0 = vadd.f32 %v5535_v6, %v5543_v8 }
 0x114   :  { %7379 = vst [vmem:[#allocation45_spill] sm:$0xff] %v5672_v63  ;;  %7380 = vst [vmem:[#allocation46_spill] sm:$0xff] %v5674_v1  ;;  %v5676_v3 = vadd.f32 %v824_v37, %v593_v60  ;;  %v5678_v53 = vadd.f32 %v885_v26, %v601_v58  ;;  %v407_v60 = vadd.f32 %v5533_v5, %v5547_v11 }
 0x115   :  { %v826_v27 = vpop.f32.mrf.mxu0  ;;  %v887_v38 = vpop.f32.mrf.mxu1 }
 0x116   :  { %7381 = vst [vmem:[#allocation47_spill] sm:$0xff] %v5676_v3  ;;  %7382 = vst [vmem:[#allocation48_spill] sm:$0xff] %v5678_v53  ;;  %v5680_v48 = vadd.f32 %v826_v27, %v597_v41  ;;  %v5682_v14 = vadd.f32 %v887_v38, %v605_v9 }
 0x117   :  { %v828_v15 = vpop.f32.mrf.mxu0  ;;  %v889_v59 = vpop.f32.mrf.mxu1 }
 0x118   :  { %7383 = vst [vmem:[#allocation49_spill] sm:$0xff] %v5680_v48  ;;  %7384 = vst [vmem:[#allocation50_spill] sm:$0xff] %v5682_v14 }
 0x119   :  { %v829_v30 = vpop.f32.mrf.mxu0  ;;  %v890_v62 = vpop.f32.mrf.mxu1 }
 0x11a   :  { %v478_v62 = vadd.f32 %v5526_v2, %v5531_v4 }
 0x123   :  { %v1110_v61 = vpop.f32.mrf.mxu0  ;;  %v1151_v1 = vpop.f32.mrf.mxu1 }
 0x124   :  { %v1158_v58 = vadd.f32 %v1110_v61, %v405_v10  ;;  %v1160_v5 = vadd.f32 %v1151_v1, %v478_v62  ;;  %v4085_v62 = vld [vmem:[%s7266_s1 + $0x28] sm:$0xff] }
 0x125   :  { %v1112_v26 = vpop.f32.mrf.mxu0  ;;  %v1153_v37 = vpop.f32.mrf.mxu1 }
 0x126   :  { %v4063_v53 = vmul.f32 -1.442695, %v1158_v58  ;;  %v1159_v41 = vadd.f32 %v1112_v26, %v407_v60  ;;  %v1161_v7 = vadd.f32 %v1153_v37, %v480_v0  ;;  %v4073_v0 = vld [vmem:[%s7266_s1 + $0x10] sm:$0xff] }
 0x127   :  { %v1114_v27 = vpop.f32.mrf.mxu0  ;;  %v1155_v9 = vpop.f32.mrf.mxu1  ;;  %1449 = vperm.xlu1 %4320, %v4073_v0  }
 0x128   :  { %4537 = vpow2.f32 %v4063_v53  ;;  %v4064_v38 = vmul.f32 -1.442695, %v1159_v41  ;;  %v4065_v11 = vmul.f32 -1.442695, %v1161_v7  ;;  %v5695_v9 = vpop.permute.xlu0 %1189  ;;  %v4077_v7 = vld [vmem:[%s7266_s1 + $0x18] sm:$0xff] }
 0x129   :  { %v1115_v59 = vpop.f32.mrf.mxu0  ;;  %v1156_v30 = vpop.f32.mrf.mxu1 }
 0x12a   :  { %4539 = vpow2.f32 %v4064_v38  ;;  %v7385_v30 = vmov 0  }
 0x12b   :  { %4541 = vtanh.f32 %v1160_v5  ;;  %1581 = vperm.xlu1 %4320, %v4077_v7   ;;  %v4093_v5 = vld [vmem:[%s7266_s1 + $0x38] sm:$0xff] }
 0x12c   :  { %4543 = vpow2.f32 %v4065_v11 }
 0x12f   :  { %1845 = vperm.xlu1 %4320, %v4085_v62  }
 0x133   :  { %2109 = vperm.xlu1 %4320, %v4093_v5  }
 0x135   :  { %v4538_v15 = vpop.eup %4537 }
 0x136   :  { %v1165_v10 = vadd.f32 1.0, %v4538_v15 }
 0x137   :  { %v4540_v61 = vpop.eup %4539 }
 0x138   :  { %4545 = vrcp.f32 %v1165_v10  ;;  %v1171_v53 = vadd.f32 1.0, %v4540_v61  ;;  %v4542_v60 = vpop.eup %4541 }
 0x139   :  { %v4544_v58 = vpop.eup %4543 }
 0x13a   :  { %4547 = vrcp.f32 %v1171_v53  ;;  %v1178_v6 = vadd.f32 1.0, %v4544_v58 }
 0x13c   :  { %4549 = vrcp.f32 %v1178_v6 }
 0x145   :  { %v4546_v26 = vpop.eup %4545 }
 0x146   :  { %v1182_v41 = vmul.f32 %v4546_v26, %v4542_v60 }
 0x147   :  { %v4548_v27 = vpop.eup %4547 }
 0x148   :  { %v1181_v8 = vmul.f32 0.0, %v4548_v27 }
 0x149   :  { %v4550_v2 = vpop.eup %4549 }
 0x14a   :  { %v5692_v37 = vadd.f32 %v1182_v41, %v1181_v8 }
 0x14c   :  { %4551 = vtanh.f32 %v5692_v37 }
 0x159   :  { %v4552_v4 = vpop.eup %4551 }
 0x15a   :  { %v1185_v1 = vmul.f32 %v4552_v4, %v4550_v2 }
 0x15c   :  { %v5698_v38 = vmul.f32 %v5695_v9, %v1185_v1 }
 0x15e   :  { %v1202_v59 = vpack.c.bf16 %v5698_v38, %v5698_v38 }
 0x160   :  { %1236 = vmatmul.mubr.bf16.vlgmr.msra.gmra.mxu0 %v1202_v59  ;;  %1277 = vmatmul.mubr.bf16.vlgmr.msra.gmra.mxu1 %v1202_v59 }
 0x161   :  { %1336 = vmatpush1.bf16.msra.mxu0 %v5271_v19  ;;  %1377 = vmatpush1.bf16.msra.mxu1 %v5276_v20 }
 0x162   :  { %1337 = vmatprep.subr.bf16.mxu0 %v5283_v21  ;;  %1378 = vmatprep.subr.bf16.mxu1 %v5288_v22 }
 0x163   :  { %1367 = vmatprep.mubr.bf16.mxu0 %v7385_v30  ;;  %1408 = vmatprep.mubr.bf16.mxu1 %v7385_v30 }
 0x165   :  { %1338 = vmatpush1.bf16.msra.mxu0 %v5293_v23  ;;  %1379 = vmatpush1.bf16.msra.mxu1 %v5298_v24 }
 0x166   :  { %1339 = vmatprep.subr.bf16.mxu0 %v5316_v28  ;;  %1380 = vmatprep.subr.bf16.mxu1 %v5321_v29 }
 0x169   :  { %1340 = vmatpush1.bf16.msra.mxu0 %v5330_v31  ;;  %1381 = vmatpush1.bf16.msra.mxu1 %v5335_v32 }
 0x16a   :  { %1341 = vmatprep.subr.bf16.mxu0 %v5342_v33  ;;  %1382 = vmatprep.subr.bf16.mxu1 %v5347_v34 }
 0x16d   :  { %1342 = vmatpush1.bf16.msra.mxu0 %v5352_v35  ;;  %1383 = vmatpush1.bf16.msra.mxu1 %v5359_v36 }
 0x16e   :  { %1343 = vmatprep.subr.bf16.mxu0 %v5372_v39  ;;  %1384 = vmatprep.subr.bf16.mxu1 %v5377_v40 }
 0x171   :  { %1344 = vmatpush1.bf16.msra.mxu0 %v5386_v42  ;;  %1385 = vmatpush1.bf16.msra.mxu1 %v5391_v43 }
 0x172   :  { %1345 = vmatprep.subr.bf16.mxu0 %v5398_v44  ;;  %1386 = vmatprep.subr.bf16.mxu1 %v5403_v45 }
 0x175   :  { %1346 = vmatpush1.bf16.msra.mxu0 %v5410_v46  ;;  %1387 = vmatpush1.bf16.msra.mxu1 %v5415_v47 }
 0x176   :  { %1347 = vmatprep.subr.bf16.mxu0 %v5425_v49  ;;  %1388 = vmatprep.subr.bf16.mxu1 %v5430_v50 }
 0x179   :  { %1348 = vmatpush1.bf16.msra.mxu0 %v5439_v51  ;;  %1389 = vmatpush1.bf16.msra.mxu1 %v5444_v52 }
 0x17a   :  { %1349 = vmatprep.subr.bf16.mxu0 %v5454_v54  ;;  %1390 = vmatprep.subr.bf16.mxu1 %v5459_v55 }
 0x17d   :  { %1350 = vmatpush1.bf16.msra.mxu0 %v5466_v56  ;;  %1391 = vmatpush1.bf16.msra.mxu1 %v5471_v57 }
 0x17e   :  { %1467 = vmatprep.subr.bf16.mxu0 %v5259_v16  ;;  %1508 = vmatprep.subr.bf16.mxu1 %v5264_v17 }
 0x220   :  { %v1237_v11 = vpop.f32.mrf.mxu0  ;;  %v1278_v15 = vpop.f32.mrf.mxu1 }
 0x221   :  { %v1285_v10 = vadd.f32 %v1237_v11, %v5550_v12  ;;  %v1287_v4 = vadd.f32 %v1278_v15, %v5553_v13  ;;  %v1195_v11 = vmul.f32 %v5695_v9, %v5692_v37 }
 0x222   :  { %v1239_v61 = vpop.f32.mrf.mxu0  ;;  %v1280_v53 = vpop.f32.mrf.mxu1 }
 0x223   :  { %v4066_v60 = vmul.f32 -1.442695, %v1285_v10  ;;  %v1286_v58 = vadd.f32 %v1239_v61, %v5556_v18  ;;  %v1288_v2 = vadd.f32 %v1280_v53, %v5559_v25 }
 0x224   :  { %v1241_v26 = vpop.f32.mrf.mxu0  ;;  %v1282_v41 = vpop.f32.mrf.mxu1 }
 0x225   :  { %4553 = vpow2.f32 %v4066_v60  ;;  %v4067_v27 = vmul.f32 -1.442695, %v1286_v58  ;;  %v4068_v1 = vmul.f32 -1.442695, %v1288_v2  ;;  %v5754_v60 = vpop.permute.xlu0 %1317 }
 0x226   :  { %v1242_v6 = vpop.f32.mrf.mxu0  ;;  %v1283_v8 = vpop.f32.mrf.mxu1 }
 0x227   :  { %4555 = vpow2.f32 %v4067_v27 }
 0x228   :  { %4557 = vtanh.f32 %v1287_v4 }
 0x229   :  { %4559 = vpow2.f32 %v4068_v1 }
 0x232   :  { %v4554_v59 = vpop.eup %4553 }
 0x233   :  { %v1292_v0 = vadd.f32 1.0, %v4554_v59  ;;  %v7386_v59 = vld [vmem:[#allocation7_spill] sm:$0xff] }
 0x234   :  { %v4556_v12 = vpop.eup %4555 }
 0x235   :  { %4561 = vrcp.f32 %v1292_v0  ;;  %v1298_v7 = vadd.f32 1.0, %v4556_v12  ;;  %v4558_v18 = vpop.eup %4557 }
 0x236   :  { %v4560_v62 = vpop.eup %4559 }
 0x237   :  { %4563 = vrcp.f32 %v1298_v7  ;;  %v1305_v25 = vadd.f32 1.0, %v4560_v62  ;;  %v7387_v62 = vld [vmem:[#allocation9_spill] sm:$0xff] }
 0x239   :  { %4565 = vrcp.f32 %v1305_v25 }
 0x242   :  { %v4562_v5 = vpop.eup %4561 }
 0x243   :  { %v1309_v10 = vmul.f32 %v4562_v5, %v4558_v18 }
 0x244   :  { %v4564_v61 = vpop.eup %4563 }
 0x245   :  { %v1308_v53 = vmul.f32 %v4564_v61, %v1195_v11 }
 0x246   :  { %v4566_v41 = vpop.eup %4565 }
 0x247   :  { %v1310_v13 = vadd.f32 %v1309_v10, %v1308_v53 }
 0x249   :  { %4567 = vtanh.f32 %v1310_v13  ;;  %v1326_v15 = vsub.f32 %v1310_v13, %v1195_v11  ;;  %v7388_v13 = vld [vmem:[#allocation10_spill] sm:$0xff] }
 0x24b   :  { %v1327_v58 = vmul.f32 %v1326_v15, %v5754_v60  ;;  %v7389_v15 = vld [vmem:[#allocation8_spill] sm:$0xff] }
 0x24d   :  { %v5757_v26 = vadd.f32 %v1327_v58, %v1195_v11 }
 0x256   :  { %v4568_v27 = vpop.eup %4567 }
 0x257   :  { %v5759_v6 = vmul.f32 %v4568_v27, %v4566_v41 }
 0x259   :  { %v1323_v37 = vsub.f32 %v5759_v6, %v5698_v38 }
 0x25b   :  { %v1324_v9 = vmul.f32 %v1323_v37, %v5754_v60 }
 0x25d   :  { %v5765_v8 = vadd.f32 %v1324_v9, %v5698_v38 }
 0x25f   :  { %v1334_v2 = vpack.c.bf16 %v5765_v8, %v5765_v8 }
 0x261   :  { %1368 = vmatmul.mubr.bf16.vlgmr.msra.gmra.mxu0 %v1334_v2  ;;  %1409 = vmatmul.mubr.bf16.vlgmr.msra.gmra.mxu1 %v1334_v2 }
 0x262   :  { %1468 = vmatpush1.bf16.msra.mxu0 %v5271_v19  ;;  %1509 = vmatpush1.bf16.msra.mxu1 %v5276_v20 }
 0x263   :  { %1469 = vmatprep.subr.bf16.mxu0 %v5283_v21  ;;  %1510 = vmatprep.subr.bf16.mxu1 %v5288_v22 }
 0x264   :  { %1499 = vmatprep.mubr.bf16.mxu0 %v7385_v30  ;;  %1540 = vmatprep.mubr.bf16.mxu1 %v7385_v30 }
 0x266   :  { %1470 = vmatpush1.bf16.msra.mxu0 %v5293_v23  ;;  %1511 = vmatpush1.bf16.msra.mxu1 %v5298_v24 }
 0x267   :  { %1471 = vmatprep.subr.bf16.mxu0 %v5316_v28  ;;  %1512 = vmatprep.subr.bf16.mxu1 %v5321_v29 }
 0x26a   :  { %1472 = vmatpush1.bf16.msra.mxu0 %v5330_v31  ;;  %1513 = vmatpush1.bf16.msra.mxu1 %v5335_v32 }
 0x26b   :  { %1473 = vmatprep.subr.bf16.mxu0 %v5342_v33  ;;  %1514 = vmatprep.subr.bf16.mxu1 %v5347_v34 }
 0x26e   :  { %1474 = vmatpush1.bf16.msra.mxu0 %v5352_v35  ;;  %1515 = vmatpush1.bf16.msra.mxu1 %v5359_v36 }
 0x26f   :  { %1475 = vmatprep.subr.bf16.mxu0 %v5372_v39  ;;  %1516 = vmatprep.subr.bf16.mxu1 %v5377_v40 }
 0x272   :  { %1476 = vmatpush1.bf16.msra.mxu0 %v5386_v42  ;;  %1517 = vmatpush1.bf16.msra.mxu1 %v5391_v43 }
 0x273   :  { %1477 = vmatprep.subr.bf16.mxu0 %v5398_v44  ;;  %1518 = vmatprep.subr.bf16.mxu1 %v5403_v45 }
 0x276   :  { %1478 = vmatpush1.bf16.msra.mxu0 %v5410_v46  ;;  %1519 = vmatpush1.bf16.msra.mxu1 %v5415_v47 }
 0x277   :  { %1479 = vmatprep.subr.bf16.mxu0 %v5425_v49  ;;  %1520 = vmatprep.subr.bf16.mxu1 %v5430_v50 }
 0x27a   :  { %1480 = vmatpush1.bf16.msra.mxu0 %v5439_v51  ;;  %1521 = vmatpush1.bf16.msra.mxu1 %v5444_v52 }
 0x27b   :  { %1481 = vmatprep.subr.bf16.mxu0 %v5454_v54  ;;  %1522 = vmatprep.subr.bf16.mxu1 %v5459_v55 }
 0x27e   :  { %1482 = vmatpush1.bf16.msra.mxu0 %v5466_v56  ;;  %1523 = vmatpush1.bf16.msra.mxu1 %v5471_v57 }
 0x27f   :  { %1599 = vmatprep.subr.bf16.mxu0 %v5259_v16  ;;  %1640 = vmatprep.subr.bf16.mxu1 %v5264_v17 }
 0x321   :  { %v1369_v4 = vpop.f32.mrf.mxu0  ;;  %v1410_v1 = vpop.f32.mrf.mxu1 }
 0x322   :  { %v1417_v0 = vadd.f32 %v1369_v4, %v7386_v59  ;;  %v1419_v17 = vadd.f32 %v1410_v1, %v7389_v15  ;;  %v5808_v1 = vpop.permute.xlu1 %1449 }
 0x323   :  { %v1371_v12 = vpop.f32.mrf.mxu0  ;;  %v1412_v7 = vpop.f32.mrf.mxu1 }
 0x324   :  { %v4070_v18 = vmul.f32 -1.442695, %v1417_v0  ;;  %v1418_v5 = vadd.f32 %v1371_v12, %v7387_v62  ;;  %v1420_v16 = vadd.f32 %v1412_v7, %v7388_v13 }
 0x325   :  { %v1373_v11 = vpop.f32.mrf.mxu0  ;;  %v1414_v10 = vpop.f32.mrf.mxu1 }
 0x326   :  { %4569 = vpow2.f32 %v4070_v18  ;;  %v4071_v61 = vmul.f32 -1.442695, %v1418_v5  ;;  %v4072_v58 = vmul.f32 -1.442695, %v1420_v16 }
 0x327   :  { %v1374_v25 = vpop.f32.mrf.mxu0  ;;  %v1415_v53 = vpop.f32.mrf.mxu1 }
 0x328   :  { %4571 = vpow2.f32 %v4071_v61 }
 0x329   :  { %4573 = vtanh.f32 %v1419_v17 }
 0x32a   :  { %4575 = vpow2.f32 %v4072_v58 }
 0x333   :  { %v4570_v41 = vpop.eup %4569 }
 0x334   :  { %v1424_v27 = vadd.f32 1.0, %v4570_v41 }
 0x335   :  { %v4572_v37 = vpop.eup %4571 }
 0x336   :  { %4577 = vrcp.f32 %v1424_v27  ;;  %v1430_v9 = vadd.f32 1.0, %v4572_v37  ;;  %v4574_v2 = vpop.eup %4573 }
 0x337   :  { %v4576_v4 = vpop.eup %4575 }
 0x338   :  { %4579 = vrcp.f32 %v1430_v9  ;;  %v1437_v18 = vadd.f32 1.0, %v4576_v4 }
 0x33a   :  { %4581 = vrcp.f32 %v1437_v18  ;;  %v5875_v18 = vpop.permute.xlu1 %1581 }
 0x343   :  { %v4578_v59 = vpop.eup %4577 }
 0x344   :  { %v1441_v0 = vmul.f32 %v4578_v59, %v4574_v2 }
 0x345   :  { %v4580_v12 = vpop.eup %4579 }
 0x346   :  { %v1440_v62 = vmul.f32 %v4580_v12, %v5757_v26 }
 0x347   :  { %v4582_v61 = vpop.eup %4581 }
 0x348   :  { %v1442_v7 = vadd.f32 %v1441_v0, %v1440_v62 }
 0x34a   :  { %4583 = vtanh.f32 %v1442_v7  ;;  %v1458_v5 = vsub.f32 %v1442_v7, %v5757_v26 }
 0x34c   :  { %v1459_v11 = vmul.f32 %v1458_v5, %v5808_v1 }
 0x34e   :  { %v5813_v10 = vadd.f32 %v1459_v11, %v5757_v26 }
 0x357   :  { %v4584_v25 = vpop.eup %4583 }
 0x358   :  { %v5815_v53 = vmul.f32 %v4584_v25, %v4582_v61 }
 0x35a   :  { %v1455_v13 = vsub.f32 %v5815_v53, %v5765_v8 }
 0x35c   :  { %v1456_v16 = vmul.f32 %v1455_v13, %v5808_v1 }
 0x35e   :  { %v5821_v15 = vadd.f32 %v1456_v16, %v5765_v8 }
 0x360   :  { %v1466_v17 = vpack.c.bf16 %v5821_v15, %v5821_v15 }
 0x362   :  { %1500 = vmatmul.mubr.bf16.vlgmr.msra.gmra.mxu0 %v1466_v17  ;;  %1541 = vmatmul.mubr.bf16.vlgmr.msra.gmra.mxu1 %v1466_v17 }
 0x363   :  { %1600 = vmatpush1.bf16.msra.mxu0 %v5271_v19  ;;  %1641 = vmatpush1.bf16.msra.mxu1 %v5276_v20  ;;  %v5860_v19 = vld [vmem:[%s7264_s4 + $0xe4] ss:$16 sps:$4 sm:$0xff]   ;;  %v5866_v20 = vld [vmem:[%s7264_s4 + $0xec] ss:$16 sps:$4 sm:$0xff]  }
 0x364   :  { %1601 = vmatprep.subr.bf16.mxu0 %v5283_v21  ;;  %1642 = vmatprep.subr.bf16.mxu1 %v5288_v22 }
 0x365   :  { %1631 = vmatprep.mubr.bf16.mxu0 %v7385_v30  ;;  %1672 = vmatprep.mubr.bf16.mxu1 %v7385_v30 }
 0x367   :  { %1602 = vmatpush1.bf16.msra.mxu0 %v5293_v23  ;;  %1643 = vmatpush1.bf16.msra.mxu1 %v5298_v24  ;;  %v7390_v23 = vld [vmem:[#allocation11_spill] sm:$0xff] }
 0x368   :  { %1603 = vmatprep.subr.bf16.mxu0 %v5316_v28  ;;  %1644 = vmatprep.subr.bf16.mxu1 %v5321_v29 }
 0x36b   :  { %1604 = vmatpush1.bf16.msra.mxu0 %v5330_v31  ;;  %1645 = vmatpush1.bf16.msra.mxu1 %v5335_v32  ;;  %v7391_v32 = vld [vmem:[#allocation13_spill] sm:$0xff] }
 0x36c   :  { %1605 = vmatprep.subr.bf16.mxu0 %v5342_v33  ;;  %1646 = vmatprep.subr.bf16.mxu1 %v5347_v34 }
 0x36f   :  { %1606 = vmatpush1.bf16.msra.mxu0 %v5352_v35  ;;  %1647 = vmatpush1.bf16.msra.mxu1 %v5359_v36 }
 0x370   :  { %1607 = vmatprep.subr.bf16.mxu0 %v5372_v39  ;;  %1648 = vmatprep.subr.bf16.mxu1 %v5377_v40 }
 0x373   :  { %1608 = vmatpush1.bf16.msra.mxu0 %v5386_v42  ;;  %1649 = vmatpush1.bf16.msra.mxu1 %v5391_v43  ;;  %v7392_v42 = vld [vmem:[#allocation14_spill] sm:$0xff] }
 0x374   :  { %1609 = vmatprep.subr.bf16.mxu0 %v5398_v44  ;;  %1650 = vmatprep.subr.bf16.mxu1 %v5403_v45  ;;  %v7393_v44 = vld [vmem:[#allocation12_spill] sm:$0xff] }
 0x377   :  { %1610 = vmatpush1.bf16.msra.mxu0 %v5410_v46  ;;  %1651 = vmatpush1.bf16.msra.mxu1 %v5415_v47 }
 0x378   :  { %1611 = vmatprep.subr.bf16.mxu0 %v5425_v49  ;;  %1652 = vmatprep.subr.bf16.mxu1 %v5430_v50 }
 0x37b   :  { %1612 = vmatpush1.bf16.msra.mxu0 %v5439_v51  ;;  %1653 = vmatpush1.bf16.msra.mxu1 %v5444_v52 }
 0x37c   :  { %1613 = vmatprep.subr.bf16.mxu0 %v5454_v54  ;;  %1654 = vmatprep.subr.bf16.mxu1 %v5459_v55 }
 0x37f   :  { %1614 = vmatpush1.bf16.msra.mxu0 %v5466_v56  ;;  %1655 = vmatpush1.bf16.msra.mxu1 %v5471_v57 }
 0x380   :  { %1731 = vmatprep.subr.bf16.mxu0 %v5860_v19  ;;  %1772 = vmatprep.subr.bf16.mxu1 %v5866_v20 }
 0x422   :  { %v1501_v21 = vpop.f32.mrf.mxu0  ;;  %v1542_v22 = vpop.f32.mrf.mxu1 }
 0x423   :  { %v1549_v24 = vadd.f32 %v1501_v21, %v7390_v23  ;;  %v1551_v45 = vadd.f32 %v1542_v22, %v7393_v44  ;;  %v5900_v21 = vld [vmem:[%s7264_s4 + $0xe8] ss:$16 sps:$4 sm:$0xff]   ;;  %v5912_v22 = vld [vmem:[%s7264_s4 + $0xcc] ss:$16 sps:$4 sm:$0xff]   ;;  %v5920_v23 = vld [vmem:[%s7264_s4 + $0xc0] ss:$16 sps:$4 sm:$0xff]  }
 0x424   :  { %v1503_v28 = vpop.f32.mrf.mxu0  ;;  %v1544_v29 = vpop.f32.mrf.mxu1  ;;  %v6004_v44 = vld [vmem:[%s7264_s4 + $0x44] ss:$16 sps:$4 sm:$0xff]  }
 0x425   :  { %v4074_v31 = vmul.f32 -1.442695, %v1549_v24  ;;  %v1550_v33 = vadd.f32 %v1503_v28, %v7391_v32  ;;  %v1552_v43 = vadd.f32 %v1544_v29, %v7392_v42  ;;  %v5926_v24 = vld [vmem:[%s7264_s4 + $0xc8] ss:$16 sps:$4 sm:$0xff]   ;;  %v5932_v28 = vld [vmem:[%s7264_s4 + $0xa4] ss:$16 sps:$4 sm:$0xff]  }
 0x426   :  { %v1505_v34 = vpop.f32.mrf.mxu0  ;;  %v1546_v35 = vpop.f32.mrf.mxu1  ;;  %v5938_v29 = vld [vmem:[%s7264_s4 + $0xac] ss:$16 sps:$4 sm:$0xff]   ;;  %v5950_v32 = vld [vmem:[%s7264_s4 + $0xa8] ss:$16 sps:$4 sm:$0xff]   ;;  %v5992_v42 = vld [vmem:[%s7264_s4 + $0x60] ss:$16 sps:$4 sm:$0xff]  }
 0x427   :  { %4585 = vpow2.f32 %v4074_v31  ;;  %v4075_v36 = vmul.f32 -1.442695, %v1550_v33  ;;  %v4076_v46 = vmul.f32 -1.442695, %v1552_v43  ;;  %v5944_v31 = vld [vmem:[%s7264_s4 + $0xa0] ss:$16 sps:$4 sm:$0xff]  }
 0x428   :  { %v1506_v39 = vpop.f32.mrf.mxu0  ;;  %v1547_v40 = vpop.f32.mrf.mxu1  ;;  %v5956_v33 = vld [vmem:[%s7264_s4 + $0x84] ss:$16 sps:$4 sm:$0xff]   ;;  %v5962_v34 = vld [vmem:[%s7264_s4 + $0x8c] ss:$16 sps:$4 sm:$0xff]   ;;  %v5968_v35 = vld [vmem:[%s7264_s4 + $0x80] ss:$16 sps:$4 sm:$0xff]  }
 0x429   :  { %4587 = vpow2.f32 %v4075_v36  ;;  %v5974_v36 = vld [vmem:[%s7264_s4 + $0x88] ss:$16 sps:$4 sm:$0xff]   ;;  %v5980_v39 = vld [vmem:[%s7264_s4 + $0x64] ss:$16 sps:$4 sm:$0xff]   ;;  %v5986_v40 = vld [vmem:[%s7264_s4 + $0x6c] ss:$16 sps:$4 sm:$0xff]  }
 0x42a   :  { %4589 = vtanh.f32 %v1551_v45  ;;  %v5998_v43 = vld [vmem:[%s7264_s4 + $0x68] ss:$16 sps:$4 sm:$0xff]   ;;  %v6010_v45 = vld [vmem:[%s7264_s4 + $0x4c] ss:$16 sps:$4 sm:$0xff]  }
 0x42b   :  { %4591 = vpow2.f32 %v4076_v46  ;;  %v6016_v46 = vld [vmem:[%s7264_s4 + $0x40] ss:$16 sps:$4 sm:$0xff]  }
 0x434   :  { %v4586_v47 = vpop.eup %4585 }
 0x435   :  { %v1556_v26 = vadd.f32 1.0, %v4586_v47  ;;  %v6022_v47 = vld [vmem:[%s7264_s4 + $0x48] ss:$16 sps:$4 sm:$0xff]  }
 0x436   :  { %v4588_v8 = vpop.eup %4587 }
 0x437   :  { %4593 = vrcp.f32 %v1556_v26  ;;  %v1562_v58 = vadd.f32 1.0, %v4588_v8  ;;  %v4590_v41 = vpop.eup %4589  ;;  %v7394_v8 = vld [vmem:[#allocation15_spill] sm:$0xff] }
 0x438   :  { %v4592_v27 = vpop.eup %4591 }
 0x439   :  { %4595 = vrcp.f32 %v1562_v58  ;;  %v1569_v4 = vadd.f32 1.0, %v4592_v27 }
 0x43b   :  { %4597 = vrcp.f32 %v1569_v4  ;;  %v7397_v4 = vld [vmem:[#allocation16_spill] sm:$0xff] }
 0x444   :  { %v4594_v37 = vpop.eup %4593 }
 0x445   :  { %v1573_v9 = vmul.f32 %v4594_v37, %v4590_v41 }
 0x446   :  { %v4596_v2 = vpop.eup %4595 }
 0x447   :  { %v1572_v59 = vmul.f32 %v4596_v2, %v5813_v10 }
 0x448   :  { %v4598_v5 = vpop.eup %4597 }
 0x449   :  { %v1574_v0 = vadd.f32 %v1573_v9, %v1572_v59 }
 0x44b   :  { %4599 = vtanh.f32 %v1574_v0  ;;  %v1590_v12 = vsub.f32 %v1574_v0, %v5813_v10 }
 0x44d   :  { %v1591_v62 = vmul.f32 %v1590_v12, %v5875_v18 }
 0x44f   :  { %v5879_v7 = vadd.f32 %v1591_v62, %v5813_v10  ;;  %v5894_v10 = vld [vmem:[%s7264_s4 + $0xe0] ss:$16 sps:$4 sm:$0xff]  }
 0x458   :  { %v4600_v11 = vpop.eup %4599 }
 0x459   :  { %v5881_v61 = vmul.f32 %v4600_v11, %v4598_v5 }
 0x45b   :  { %v1587_v25 = vsub.f32 %v5881_v61, %v5821_v15 }
 0x45d   :  { %v1588_v13 = vmul.f32 %v1587_v25, %v5875_v18 }
 0x45f   :  { %v5887_v16 = vadd.f32 %v1588_v13, %v5821_v15  ;;  %v5906_v15 = vld [vmem:[%s7264_s4 + $0xc4] ss:$16 sps:$4 sm:$0xff]  }
 0x461   :  { %v1598_v17 = vpack.c.bf16 %v5887_v16, %v5887_v16 }
 0x463   :  { %1632 = vmatmul.mubr.bf16.vlgmr.msra.gmra.mxu0 %v1598_v17  ;;  %1673 = vmatmul.mubr.bf16.vlgmr.msra.gmra.mxu1 %v1598_v17 }
 0x464   :  { %1732 = vmatpush1.bf16.msra.mxu0 %v5894_v10  ;;  %1773 = vmatpush1.bf16.msra.mxu1 %v5900_v21 }
 0x465   :  { %1733 = vmatprep.subr.bf16.mxu0 %v5906_v15  ;;  %1774 = vmatprep.subr.bf16.mxu1 %v5912_v22 }
 0x466   :  { %1763 = vmatprep.mubr.bf16.mxu0 %v7385_v30  ;;  %1804 = vmatprep.mubr.bf16.mxu1 %v7385_v30 }
 0x468   :  { %1734 = vmatpush1.bf16.msra.mxu0 %v5920_v23  ;;  %1775 = vmatpush1.bf16.msra.mxu1 %v5926_v24 }
 0x469   :  { %1735 = vmatprep.subr.bf16.mxu0 %v5932_v28  ;;  %1776 = vmatprep.subr.bf16.mxu1 %v5938_v29 }
 0x46c   :  { %1736 = vmatpush1.bf16.msra.mxu0 %v5944_v31  ;;  %1777 = vmatpush1.bf16.msra.mxu1 %v5950_v32 }
 0x46d   :  { %1737 = vmatprep.subr.bf16.mxu0 %v5956_v33  ;;  %1778 = vmatprep.subr.bf16.mxu1 %v5962_v34 }
 0x470   :  { %1738 = vmatpush1.bf16.msra.mxu0 %v5968_v35  ;;  %1779 = vmatpush1.bf16.msra.mxu1 %v5974_v36 }
 0x471   :  { %1739 = vmatprep.subr.bf16.mxu0 %v5980_v39  ;;  %1780 = vmatprep.subr.bf16.mxu1 %v5986_v40 }
 0x474   :  { %1740 = vmatpush1.bf16.msra.mxu0 %v5992_v42  ;;  %1781 = vmatpush1.bf16.msra.mxu1 %v5998_v43 }
 0x475   :  { %1741 = vmatprep.subr.bf16.mxu0 %v6004_v44  ;;  %1782 = vmatprep.subr.bf16.mxu1 %v6010_v45 }
 0x478   :  { %1742 = vmatpush1.bf16.msra.mxu0 %v6016_v46  ;;  %1783 = vmatpush1.bf16.msra.mxu1 %v6022_v47 }
 0x479   :  { %1743 = vmatprep.subr.bf16.mxu0 %v5425_v49  ;;  %1784 = vmatprep.subr.bf16.mxu1 %v5430_v50 }
 0x47c   :  { %1744 = vmatpush1.bf16.msra.mxu0 %v5439_v51  ;;  %1785 = vmatpush1.bf16.msra.mxu1 %v5444_v52  ;;  %v7395_v52 = vld [vmem:[#allocation17_spill] sm:$0xff] }
 0x47d   :  { %1745 = vmatprep.subr.bf16.mxu0 %v5454_v54  ;;  %1786 = vmatprep.subr.bf16.mxu1 %v5459_v55 }
 0x480   :  { %1746 = vmatpush1.bf16.msra.mxu0 %v5466_v56  ;;  %1787 = vmatpush1.bf16.msra.mxu1 %v5471_v57  ;;  %v7396_v57 = vld [vmem:[#allocation18_spill] sm:$0xff] }
 0x481   :  { %1863 = vmatprep.subr.bf16.mxu0 %v5860_v19  ;;  %1904 = vmatprep.subr.bf16.mxu1 %v5866_v20 }
 0x523   :  { %v1633_v26 = vpop.f32.mrf.mxu0  ;;  %v1674_v49 = vpop.f32.mrf.mxu1 }
 0x524   :  { %v1681_v50 = vadd.f32 %v1633_v26, %v7394_v8  ;;  %v1683_v59 = vadd.f32 %v1674_v49, %v7397_v4  ;;  %v6096_v4 = vld [vmem:[%s7264_s4 + $0x20] ss:$16 sps:$4 sm:$0xff]  }
 0x525   :  { %v1635_v58 = vpop.f32.mrf.mxu0  ;;  %v1676_v51 = vpop.f32.mrf.mxu1 }
 0x526   :  { %v4078_v41 = vmul.f32 -1.442695, %v1681_v50  ;;  %v1682_v27 = vadd.f32 %v1635_v58, %v7395_v52  ;;  %v1684_v2 = vadd.f32 %v1676_v51, %v7396_v57 }
 0x527   :  { %v1637_v54 = vpop.f32.mrf.mxu0  ;;  %v1678_v37 = vpop.f32.mrf.mxu1 }
 0x528   :  { %4601 = vpow2.f32 %v4078_v41  ;;  %v4079_v55 = vmul.f32 -1.442695, %v1682_v27  ;;  %v4080_v0 = vmul.f32 -1.442695, %v1684_v2  ;;  %v6041_v41 = vpop.permute.xlu0 %1713 }
 0x529   :  { %v1638_v56 = vpop.f32.mrf.mxu0  ;;  %v1679_v9 = vpop.f32.mrf.mxu1 }
 0x52a   :  { %4603 = vpow2.f32 %v4079_v55 }
 0x52b   :  { %4605 = vtanh.f32 %v1683_v59  ;;  %v6102_v59 = vld [vmem:[%s7264_s4 + $0x28] ss:$16 sps:$4 sm:$0xff]  }
 0x52c   :  { %4607 = vpow2.f32 %v4080_v0  ;;  %v6108_v0 = vld [vmem:[%s7264_s4 + $0x4] ss:$16 sps:$4 sm:$0xff]  }
 0x535   :  { %v4602_v12 = vpop.eup %4601 }
 0x536   :  { %v1688_v62 = vadd.f32 1.0, %v4602_v12  ;;  %v6114_v12 = vld [vmem:[%s7264_s4 + $0xc] ss:$16 sps:$4 sm:$0xff]  }
 0x537   :  { %v4604_v5 = vpop.eup %4603 }
 0x538   :  { %4609 = vrcp.f32 %v1688_v62  ;;  %v1694_v11 = vadd.f32 1.0, %v4604_v5  ;;  %v4606_v25 = vpop.eup %4605  ;;  %v6120_v62 = vld [vmem:[%s7264_s4] ss:$16 sps:$4 sm:$0xff]   ;;  %v6126_v5 = vld [vmem:[%s7264_s4 + $0x8] ss:$16 sps:$4 sm:$0xff]  }
 0x539   :  { %v4608_v13 = vpop.eup %4607 }
 0x53a   :  { %4611 = vrcp.f32 %v1694_v11  ;;  %v1701_v50 = vadd.f32 1.0, %v4608_v13  ;;  %v7398_v13 = vld [vmem:[#allocation19_spill] sm:$0xff] }
 0x53c   :  { %4613 = vrcp.f32 %v1701_v50 }
 0x545   :  { %v4610_v17 = vpop.eup %4609 }
 0x546   :  { %v1705_v26 = vmul.f32 %v4610_v17, %v4606_v25 }
 0x547   :  { %v4612_v8 = vpop.eup %4611 }
 0x548   :  { %v1704_v58 = vmul.f32 %v4612_v8, %v5879_v7 }
 0x549   :  { %v4614_v54 = vpop.eup %4613 }
 0x54a   :  { %v1706_v51 = vadd.f32 %v1705_v26, %v1704_v58  ;;  %v7399_v58 = vld [vmem:[#allocation21_spill] sm:$0xff] }
 0x54c   :  { %4615 = vtanh.f32 %v1706_v51  ;;  %v1722_v49 = vsub.f32 %v1706_v51, %v5879_v7 }
 0x54e   :  { %v1723_v52 = vmul.f32 %v1722_v49, %v6041_v41 }
 0x550   :  { %v6045_v27 = vadd.f32 %v1723_v52, %v5879_v7  ;;  %v6084_v7 = vld [vmem:[%s7264_s4 + $0x24] ss:$16 sps:$4 sm:$0xff]  }
 0x559   :  { %v4616_v37 = vpop.eup %4615 }
 0x55a   :  { %v6047_v55 = vmul.f32 %v4616_v37, %v4614_v54 }
 0x55c   :  { %v1719_v56 = vsub.f32 %v6047_v55, %v5887_v16 }
 0x55e   :  { %v1720_v9 = vmul.f32 %v1719_v56, %v6041_v41 }
 0x560   :  { %v6053_v57 = vadd.f32 %v1720_v9, %v5887_v16  ;;  %v6090_v16 = vld [vmem:[%s7264_s4 + $0x2c] ss:$16 sps:$4 sm:$0xff]   ;;  %v7400_v9 = vld [vmem:[#allocation22_spill] sm:$0xff] }
 0x562   :  { %v1730_v2 = vpack.c.bf16 %v6053_v57, %v6053_v57 }
 0x564   :  { %1764 = vmatmul.mubr.bf16.vlgmr.msra.gmra.mxu0 %v1730_v2  ;;  %1805 = vmatmul.mubr.bf16.vlgmr.msra.gmra.mxu1 %v1730_v2  ;;  %v7401_v2 = vld [vmem:[#allocation20_spill] sm:$0xff] }
 0x565   :  { %1864 = vmatpush1.bf16.msra.mxu0 %v5894_v10  ;;  %1905 = vmatpush1.bf16.msra.mxu1 %v5900_v21 }
 0x566   :  { %1865 = vmatprep.subr.bf16.mxu0 %v5906_v15  ;;  %1906 = vmatprep.subr.bf16.mxu1 %v5912_v22 }
 0x567   :  { %1895 = vmatprep.mubr.bf16.mxu0 %v7385_v30  ;;  %1936 = vmatprep.mubr.bf16.mxu1 %v7385_v30 }
 0x569   :  { %1866 = vmatpush1.bf16.msra.mxu0 %v5920_v23  ;;  %1907 = vmatpush1.bf16.msra.mxu1 %v5926_v24 }
 0x56a   :  { %1867 = vmatprep.subr.bf16.mxu0 %v5932_v28  ;;  %1908 = vmatprep.subr.bf16.mxu1 %v5938_v29 }
 0x56d   :  { %1868 = vmatpush1.bf16.msra.mxu0 %v5944_v31  ;;  %1909 = vmatpush1.bf16.msra.mxu1 %v5950_v32 }
 0x56e   :  { %1869 = vmatprep.subr.bf16.mxu0 %v5956_v33  ;;  %1910 = vmatprep.subr.bf16.mxu1 %v5962_v34 }
 0x571   :  { %1870 = vmatpush1.bf16.msra.mxu0 %v5968_v35  ;;  %1911 = vmatpush1.bf16.msra.mxu1 %v5974_v36 }
 0x572   :  { %1871 = vmatprep.subr.bf16.mxu0 %v5980_v39  ;;  %1912 = vmatprep.subr.bf16.mxu1 %v5986_v40 }
 0x575   :  { %1872 = vmatpush1.bf16.msra.mxu0 %v5992_v42  ;;  %1913 = vmatpush1.bf16.msra.mxu1 %v5998_v43 }
 0x576   :  { %1873 = vmatprep.subr.bf16.mxu0 %v6004_v44  ;;  %1914 = vmatprep.subr.bf16.mxu1 %v6010_v45 }
 0x579   :  { %1874 = vmatpush1.bf16.msra.mxu0 %v6016_v46  ;;  %1915 = vmatpush1.bf16.msra.mxu1 %v6022_v47 }
 0x57a   :  { %1875 = vmatprep.subr.bf16.mxu0 %v6084_v7  ;;  %1916 = vmatprep.subr.bf16.mxu1 %v6090_v16 }
 0x57d   :  { %1876 = vmatpush1.bf16.msra.mxu0 %v6096_v4  ;;  %1917 = vmatpush1.bf16.msra.mxu1 %v6102_v59 }
 0x57e   :  { %1877 = vmatprep.subr.bf16.mxu0 %v6108_v0  ;;  %1918 = vmatprep.subr.bf16.mxu1 %v6114_v12 }
 0x581   :  { %1878 = vmatpush1.bf16.msra.mxu0 %v6120_v62  ;;  %1919 = vmatpush1.bf16.msra.mxu1 %v6126_v5 }
 0x582   :  { %1995 = vmatprep.subr.bf16.mxu0 %v5860_v19  ;;  %2036 = vmatprep.subr.bf16.mxu1 %v5866_v20 }
 0x624   :  { %v1765_v11 = vpop.f32.mrf.mxu0  ;;  %v1806_v25 = vpop.f32.mrf.mxu1 }
 0x625   :  { %v1813_v17 = vadd.f32 %v1765_v11, %v7398_v13  ;;  %v1815_v20 = vadd.f32 %v1806_v25, %v7401_v2 }
 0x626   :  { %v1767_v26 = vpop.f32.mrf.mxu0  ;;  %v1808_v8 = vpop.f32.mrf.mxu1 }
 0x627   :  { %v4082_v50 = vmul.f32 -1.442695, %v1813_v17  ;;  %v1814_v51 = vadd.f32 %v1767_v26, %v7399_v58  ;;  %v1816_v19 = vadd.f32 %v1808_v8, %v7400_v9 }
 0x628   :  { %v1769_v49 = vpop.f32.mrf.mxu0  ;;  %v1810_v52 = vpop.f32.mrf.mxu1 }
 0x629   :  { %4617 = vpow2.f32 %v4082_v50  ;;  %v4083_v54 = vmul.f32 -1.442695, %v1814_v51  ;;  %v4084_v14 = vmul.f32 -1.442695, %v1816_v19 }
 0x62a   :  { %v1770_v37 = vpop.f32.mrf.mxu0  ;;  %v1811_v56 = vpop.f32.mrf.mxu1 }
 0x62b   :  { %4619 = vpow2.f32 %v4083_v54 }
 0x62c   :  { %4621 = vtanh.f32 %v1815_v20 }
 0x62d   :  { %4623 = vpow2.f32 %v4084_v14 }
 0x636   :  { %v4618_v48 = vpop.eup %4617 }
 0x637   :  { %v1820_v3 = vadd.f32 1.0, %v4618_v48  ;;  %v6137_v48 = vpop.permute.xlu1 %1845 }
 0x638   :  { %v4620_v11 = vpop.eup %4619 }
 0x639   :  { %4625 = vrcp.f32 %v1820_v3  ;;  %v1826_v13 = vadd.f32 1.0, %v4620_v11  ;;  %v4622_v17 = vpop.eup %4621  ;;  %v6191_v11 = vpop.permute.xlu0 %1977 }
 0x63a   :  { %v4624_v26 = vpop.eup %4623 }
 0x63b   :  { %4627 = vrcp.f32 %v1826_v13  ;;  %v1833_v49 = vadd.f32 1.0, %v4624_v26 }
 0x63d   :  { %4629 = vrcp.f32 %v1833_v49 }
 0x646   :  { %v4626_v50 = vpop.eup %4625 }
 0x647   :  { %v1837_v58 = vmul.f32 %v4626_v50, %v4622_v17 }
 0x648   :  { %v4628_v51 = vpop.eup %4627 }
 0x649   :  { %v1836_v52 = vmul.f32 %v4628_v51, %v6045_v27 }
 0x64a   :  { %v4630_v54 = vpop.eup %4629 }
 0x64b   :  { %v1838_v8 = vadd.f32 %v1837_v58, %v1836_v52 }
 0x64d   :  { %4631 = vtanh.f32 %v1838_v8  ;;  %v1854_v25 = vsub.f32 %v1838_v8, %v6045_v27 }
 0x64f   :  { %v1855_v14 = vmul.f32 %v1854_v25, %v6137_v48  ;;  %v6212_v25 = vld [vmem:[%s7269_s7 + $0xe4] ss:$16 sps:$4 sm:$0xff]  }
 0x650   :  { %7406 = vst [vmem:[#allocation7_spill] sm:$0xff] %v6212_v25 }
 0x651   :  { %v6141_v3 = vadd.f32 %v1855_v14, %v6045_v27  ;;  %v6217_v14 = vld [vmem:[%s7269_s7 + $0xec] ss:$16 sps:$4 sm:$0xff]  }
 0x652   :  { %7407 = vst [vmem:[#allocation9_spill] sm:$0xff] %v6217_v14 }
 0x65a   :  { %v4632_v37 = vpop.eup %4631 }
 0x65b   :  { %v6143_v56 = vmul.f32 %v4632_v37, %v4630_v54  ;;  %v6228_v54 = vld [vmem:[%s7269_s7 + $0xe8] ss:$16 sps:$4 sm:$0xff]   ;;  %v6236_v37 = vld [vmem:[%s7269_s7 + $0xc4] ss:$16 sps:$4 sm:$0xff]  }
 0x65d   :  { %v1851_v9 = vsub.f32 %v6143_v56, %v6053_v57 }
 0x65f   :  { %v1852_v19 = vmul.f32 %v1851_v9, %v6137_v48  ;;  %v6241_v9 = vld [vmem:[%s7269_s7 + $0xcc] ss:$16 sps:$4 sm:$0xff]  }
 0x661   :  { %v6149_v2 = vadd.f32 %v1852_v19, %v6053_v57  ;;  %v6246_v19 = vld [vmem:[%s7269_s7 + $0xc0] ss:$16 sps:$4 sm:$0xff]  }
 0x663   :  { %v1862_v20 = vpack.c.bf16 %v6149_v2, %v6149_v2 }
 0x665   :  { %1896 = vmatmul.mubr.bf16.vlgmr.msra.gmra.mxu0 %v1862_v20  ;;  %1937 = vmatmul.mubr.bf16.vlgmr.msra.gmra.mxu1 %v1862_v20  ;;  %v6260_v20 = vld [vmem:[%s7269_s7 + $0xa4] ss:$16 sps:$4 sm:$0xff]  }
 0x666   :  { %1996 = vmatpush1.bf16.msra.mxu0 %v5894_v10  ;;  %2037 = vmatpush1.bf16.msra.mxu1 %v5900_v21 }
 0x667   :  { %1997 = vmatprep.subr.bf16.mxu0 %v5906_v15  ;;  %2038 = vmatprep.subr.bf16.mxu1 %v5912_v22  ;;  %v7402_v15 = vld [vmem:[#allocation23_spill] sm:$0xff] }
 0x668   :  { %2027 = vmatprep.mubr.bf16.mxu0 %v7385_v30  ;;  %2068 = vmatprep.mubr.bf16.mxu1 %v7385_v30 }
 0x66a   :  { %1998 = vmatpush1.bf16.msra.mxu0 %v5920_v23  ;;  %2039 = vmatpush1.bf16.msra.mxu1 %v5926_v24 }
 0x66b   :  { %1999 = vmatprep.subr.bf16.mxu0 %v5932_v28  ;;  %2040 = vmatprep.subr.bf16.mxu1 %v5938_v29  ;;  %v7403_v29 = vld [vmem:[#allocation25_spill] sm:$0xff] }
 0x66e   :  { %2000 = vmatpush1.bf16.msra.mxu0 %v5944_v31  ;;  %2041 = vmatpush1.bf16.msra.mxu1 %v5950_v32 }
 0x66f   :  { %2001 = vmatprep.subr.bf16.mxu0 %v5956_v33  ;;  %2042 = vmatprep.subr.bf16.mxu1 %v5962_v34 }
 0x672   :  { %2002 = vmatpush1.bf16.msra.mxu0 %v5968_v35  ;;  %2043 = vmatpush1.bf16.msra.mxu1 %v5974_v36 }
 0x673   :  { %2003 = vmatprep.subr.bf16.mxu0 %v5980_v39  ;;  %2044 = vmatprep.subr.bf16.mxu1 %v5986_v40  ;;  %v7404_v39 = vld [vmem:[#allocation26_spill] sm:$0xff] }
 0x676   :  { %2004 = vmatpush1.bf16.msra.mxu0 %v5992_v42  ;;  %2045 = vmatpush1.bf16.msra.mxu1 %v5998_v43  ;;  %v7405_v42 = vld [vmem:[#allocation24_spill] sm:$0xff] }
 0x677   :  { %2005 = vmatprep.subr.bf16.mxu0 %v6004_v44  ;;  %2046 = vmatprep.subr.bf16.mxu1 %v6010_v45 }
 0x67a   :  { %2006 = vmatpush1.bf16.msra.mxu0 %v6016_v46  ;;  %2047 = vmatpush1.bf16.msra.mxu1 %v6022_v47 }
 0x67b   :  { %2007 = vmatprep.subr.bf16.mxu0 %v6084_v7  ;;  %2048 = vmatprep.subr.bf16.mxu1 %v6090_v16 }
 0x67e   :  { %2008 = vmatpush1.bf16.msra.mxu0 %v6096_v4  ;;  %2049 = vmatpush1.bf16.msra.mxu1 %v6102_v59 }
 0x67f   :  { %2009 = vmatprep.subr.bf16.mxu0 %v6108_v0  ;;  %2050 = vmatprep.subr.bf16.mxu1 %v6114_v12 }
 0x682   :  { %2010 = vmatpush1.bf16.msra.mxu0 %v6120_v62  ;;  %2051 = vmatpush1.bf16.msra.mxu1 %v6126_v5 }
 0x683   :  { %2286 = vmatprep.subr.bf16.mxu0 %v6212_v25  ;;  %2327 = vmatprep.subr.bf16.mxu1 %v6217_v14 }
 0x725   :  { %v1897_v10 = vpop.f32.mrf.mxu0  ;;  %v1938_v21 = vpop.f32.mrf.mxu1 }
 0x726   :  { %v1945_v22 = vadd.f32 %v1897_v10, %v7402_v15  ;;  %v1947_v43 = vadd.f32 %v1938_v21, %v7405_v42  ;;  %v6265_v10 = vld [vmem:[%s7269_s7 + $0xac] ss:$16 sps:$4 sm:$0xff]   ;;  %v6270_v21 = vld [vmem:[%s7269_s7 + $0xa0] ss:$16 sps:$4 sm:$0xff]   ;;  %v6275_v15 = vld [vmem:[%s7269_s7 + $0xa8] ss:$16 sps:$4 sm:$0xff]  }
 0x727   :  { %v1899_v23 = vpop.f32.mrf.mxu0  ;;  %v1940_v24 = vpop.f32.mrf.mxu1  ;;  %v6359_v42 = vld [vmem:[%s7269_s7 + $0x2c] ss:$16 sps:$4 sm:$0xff]  }
 0x728   :  { %v4086_v28 = vmul.f32 -1.442695, %v1945_v22  ;;  %v1946_v31 = vadd.f32 %v1899_v23, %v7403_v29  ;;  %v1948_v40 = vadd.f32 %v1940_v24, %v7404_v39  ;;  %v6280_v22 = vld [vmem:[%s7269_s7 + $0x84] ss:$16 sps:$4 sm:$0xff]   ;;  %v6287_v23 = vld [vmem:[%s7269_s7 + $0x8c] ss:$16 sps:$4 sm:$0xff]  }
 0x729   :  { %v1901_v32 = vpop.f32.mrf.mxu0  ;;  %v1942_v33 = vpop.f32.mrf.mxu1  ;;  %v6292_v24 = vld [vmem:[%s7269_s7 + $0x80] ss:$16 sps:$4 sm:$0xff]   ;;  %v6304_v29 = vld [vmem:[%s7269_s7 + $0x64] ss:$16 sps:$4 sm:$0xff]   ;;  %v6347_v39 = vld [vmem:[%s7269_s7 + $0x48] ss:$16 sps:$4 sm:$0xff]  }
 0x72a   :  { %4633 = vpow2.f32 %v4086_v28  ;;  %v4087_v34 = vmul.f32 -1.442695, %v1946_v31  ;;  %v4088_v44 = vmul.f32 -1.442695, %v1948_v40  ;;  %v6299_v28 = vld [vmem:[%s7269_s7 + $0x88] ss:$16 sps:$4 sm:$0xff]  }
 0x72b   :  { %v1902_v35 = vpop.f32.mrf.mxu0  ;;  %v1943_v36 = vpop.f32.mrf.mxu1  ;;  %v6311_v31 = vld [vmem:[%s7269_s7 + $0x6c] ss:$16 sps:$4 sm:$0xff]   ;;  %v6316_v32 = vld [vmem:[%s7269_s7 + $0x60] ss:$16 sps:$4 sm:$0xff]   ;;  %v6321_v33 = vld [vmem:[%s7269_s7 + $0x68] ss:$16 sps:$4 sm:$0xff]  }
 0x72c   :  { %4635 = vpow2.f32 %v4087_v34  ;;  %v6328_v34 = vld [vmem:[%s7269_s7 + $0x44] ss:$16 sps:$4 sm:$0xff]   ;;  %v6335_v35 = vld [vmem:[%s7269_s7 + $0x4c] ss:$16 sps:$4 sm:$0xff]   ;;  %v6342_v36 = vld [vmem:[%s7269_s7 + $0x40] ss:$16 sps:$4 sm:$0xff]  }
 0x72d   :  { %4637 = vtanh.f32 %v1947_v43  ;;  %v6354_v40 = vld [vmem:[%s7269_s7 + $0x24] ss:$16 sps:$4 sm:$0xff]   ;;  %7408 = vst [vmem:[#allocation10_spill] sm:$0xff] %v6359_v42  ;;  %v6366_v43 = vld [vmem:[%s7269_s7 + $0x20] ss:$16 sps:$4 sm:$0xff]  }
 0x72e   :  { %4639 = vpow2.f32 %v4088_v44  ;;  %v6371_v44 = vld [vmem:[%s7269_s7 + $0x28] ss:$16 sps:$4 sm:$0xff]  }
 0x72f   :  { %7409 = vst [vmem:[#allocation8_spill] sm:$0xff] %v6371_v44 }
 0x737   :  { %v4634_v45 = vpop.eup %4633 }
 0x738   :  { %v1952_v46 = vadd.f32 1.0, %v4634_v45  ;;  %v6378_v45 = vld [vmem:[%s7269_s7 + $0x4] ss:$16 sps:$4 sm:$0xff]  }
 0x739   :  { %v4636_v47 = vpop.eup %4635 }
 0x73a   :  { %4641 = vrcp.f32 %v1952_v46  ;;  %v1958_v27 = vadd.f32 1.0, %v4636_v47  ;;  %v4638_v57 = vpop.eup %4637  ;;  %v6383_v46 = vld [vmem:[%s7269_s7 + $0xc] ss:$16 sps:$4 sm:$0xff]   ;;  %v6390_v47 = vld [vmem:[%s7269_s7] ss:$16 sps:$4 sm:$0xff]  }
 0x73b   :  { %v4640_v7 = vpop.eup %4639  ;;  %7410 = vst [vmem:[#allocation11_spill] sm:$0xff] %v6383_v46  ;;  %7411 = vst [vmem:[#allocation13_spill] sm:$0xff] %v6390_v47 }
 0x73c   :  { %4643 = vrcp.f32 %v1958_v27  ;;  %v1965_v0 = vadd.f32 1.0, %v4640_v7  ;;  %v6395_v27 = vld [vmem:[%s7269_s7 + $0x8] ss:$16 sps:$4 sm:$0xff]  }
 0x73d   :  { %7412 = vst [vmem:[#allocation14_spill] sm:$0xff] %v6395_v27 }
 0x73e   :  { %4645 = vrcp.f32 %v1965_v0 }
 0x747   :  { %v4642_v16 = vpop.eup %4641 }
 0x748   :  { %v1969_v4 = vmul.f32 %v4642_v16, %v4638_v57  ;;  %v7413_v16 = vld [vmem:[#allocation27_spill] sm:$0xff] }
 0x749   :  { %v4644_v59 = vpop.eup %4643 }
 0x74a   :  { %v1968_v12 = vmul.f32 %v4644_v59, %v6141_v3 }
 0x74b   :  { %v4646_v26 = vpop.eup %4645 }
 0x74c   :  { %v1970_v62 = vadd.f32 %v1969_v4, %v1968_v12 }
 0x74e   :  { %4647 = vtanh.f32 %v1970_v62  ;;  %v1986_v5 = vsub.f32 %v1970_v62, %v6141_v3  ;;  %v7414_v62 = vld [vmem:[#allocation29_spill] sm:$0xff] }
 0x750   :  { %v1987_v13 = vmul.f32 %v1986_v5, %v6191_v11 }
 0x752   :  { %v6195_v17 = vadd.f32 %v1987_v13, %v6141_v3  ;;  %v6223_v3 = vld [vmem:[%s7269_s7 + $0xe0] ss:$16 sps:$4 sm:$0xff]  }
 0x75b   :  { %v4648_v50 = vpop.eup %4647 }
 0x75c   :  { %v6197_v58 = vmul.f32 %v4648_v50, %v4646_v26 }
 0x75e   :  { %v1983_v51 = vsub.f32 %v6197_v58, %v6149_v2 }
 0x760   :  { %v1984_v49 = vmul.f32 %v1983_v51, %v6191_v11 }
 0x762   :  { %v6203_v52 = vadd.f32 %v1984_v49, %v6149_v2  ;;  %v6251_v2 = vld [vmem:[%s7269_s7 + $0xc8] ss:$16 sps:$4 sm:$0xff]  }
 0x764   :  { %v1994_v8 = vpack.c.bf16 %v6203_v52, %v6203_v52 }
 0x766   :  { %2028 = vmatmul.mubr.bf16.vlgmr.msra.gmra.mxu0 %v1994_v8  ;;  %2069 = vmatmul.mubr.bf16.vlgmr.msra.gmra.mxu1 %v1994_v8  ;;  %v7415_v8 = vld [vmem:[#allocation30_spill] sm:$0xff] }
 0x767   :  { %2318 = vmatprep.mubr.bf16.mxu0 %v7385_v30  ;;  %2359 = vmatprep.mubr.bf16.mxu1 %v7385_v30 }
 0x768   :  { %2287 = vmatpush1.bf16.msra.mxu0 %v6223_v3  ;;  %2328 = vmatpush1.bf16.msra.mxu1 %v6228_v54 }
 0x769   :  { %2288 = vmatprep.subr.bf16.mxu0 %v6236_v37  ;;  %2329 = vmatprep.subr.bf16.mxu1 %v6241_v9 }
 0x76c   :  { %2289 = vmatpush1.bf16.msra.mxu0 %v6246_v19  ;;  %2330 = vmatpush1.bf16.msra.mxu1 %v6251_v2 }
 0x76d   :  { %2290 = vmatprep.subr.bf16.mxu0 %v6260_v20  ;;  %2331 = vmatprep.subr.bf16.mxu1 %v6265_v10 }
 0x770   :  { %2291 = vmatpush1.bf16.msra.mxu0 %v6270_v21  ;;  %2332 = vmatpush1.bf16.msra.mxu1 %v6275_v15 }
 0x771   :  { %2292 = vmatprep.subr.bf16.mxu0 %v6280_v22  ;;  %2333 = vmatprep.subr.bf16.mxu1 %v6287_v23 }
 0x774   :  { %2293 = vmatpush1.bf16.msra.mxu0 %v6292_v24  ;;  %2334 = vmatpush1.bf16.msra.mxu1 %v6299_v28 }
 0x775   :  { %2294 = vmatprep.subr.bf16.mxu0 %v6304_v29  ;;  %2335 = vmatprep.subr.bf16.mxu1 %v6311_v31 }
 0x778   :  { %2295 = vmatpush1.bf16.msra.mxu0 %v6316_v32  ;;  %2336 = vmatpush1.bf16.msra.mxu1 %v6321_v33 }
 0x779   :  { %2296 = vmatprep.subr.bf16.mxu0 %v6328_v34  ;;  %2337 = vmatprep.subr.bf16.mxu1 %v6335_v35 }
 0x77c   :  { %2297 = vmatpush1.bf16.msra.mxu0 %v6342_v36  ;;  %2338 = vmatpush1.bf16.msra.mxu1 %v6347_v39 }
 0x77d   :  { %2298 = vmatprep.subr.bf16.mxu0 %v6354_v40  ;;  %2339 = vmatprep.subr.bf16.mxu1 %v6359_v42 }
 0x780   :  { %2299 = vmatpush1.bf16.msra.mxu0 %v6366_v43  ;;  %2340 = vmatpush1.bf16.msra.mxu1 %v6371_v44 }
 0x781   :  { %2300 = vmatprep.subr.bf16.mxu0 %v6378_v45  ;;  %2341 = vmatprep.subr.bf16.mxu1 %v6383_v46 }
 0x784   :  { %2301 = vmatpush1.bf16.msra.mxu0 %v6390_v47  ;;  %2342 = vmatpush1.bf16.msra.mxu1 %v6395_v27  ;;  %v7416_v27 = vld [vmem:[#allocation28_spill] sm:$0xff] }
 0x785   :  { %2641 = vmatprep.subr.bf16.mxu1 %v6212_v25 }
 0x826   :  { %v2029_v57 = vpop.f32.mrf.mxu0  ;;  %v2070_v7 = vpop.f32.mrf.mxu1 }
 0x827   :  { %v2077_v4 = vadd.f32 %v2029_v57, %v7413_v16  ;;  %v2079_v25 = vadd.f32 %v2070_v7, %v7416_v27 }
 0x828   :  { %v2031_v59 = vpop.f32.mrf.mxu0  ;;  %v2072_v0 = vpop.f32.mrf.mxu1 }
 0x829   :  { %v4090_v12 = vmul.f32 -1.442695, %v2077_v4  ;;  %v2078_v5 = vadd.f32 %v2031_v59, %v7414_v62  ;;  %v2080_v63 = vadd.f32 %v2072_v0, %v7415_v8 }
 0x82a   :  { %v2033_v13 = vpop.f32.mrf.mxu0  ;;  %v2074_v26 = vpop.f32.mrf.mxu1 }
 0x82b   :  { %4649 = vpow2.f32 %v4090_v12  ;;  %v4091_v50 = vmul.f32 -1.442695, %v2078_v5  ;;  %v4092_v46 = vmul.f32 -1.442695, %v2080_v63 }
 0x82c   :  { %v2034_v51 = vpop.f32.mrf.mxu0  ;;  %v2075_v49 = vpop.f32.mrf.mxu1 }
 0x82d   :  { %4651 = vpow2.f32 %v4091_v50 }
 0x82e   :  { %4653 = vtanh.f32 %v2079_v25 }
 0x82f   :  { %4655 = vpow2.f32 %v4092_v46 }
 0x838   :  { %v4650_v44 = vpop.eup %4649 }
 0x839   :  { %v2084_v42 = vadd.f32 1.0, %v4650_v44  ;;  %v6408_v44 = vpop.permute.xlu1 %2109 }
 0x83a   :  { %v4652_v57 = vpop.eup %4651 }
 0x83b   :  { %4657 = vrcp.f32 %v2084_v42  ;;  %v2090_v16 = vadd.f32 1.0, %v4652_v57  ;;  %v4654_v4 = vpop.eup %4653  ;;  %v7417_v57 = vld [vmem:[#allocation31_spill] sm:$0xff] }
 0x83c   :  { %v4656_v59 = vpop.eup %4655 }
 0x83d   :  { %4659 = vrcp.f32 %v2090_v16  ;;  %v2097_v13 = vadd.f32 1.0, %v4656_v59 }
 0x83f   :  { %4661 = vrcp.f32 %v2097_v13 }
 0x848   :  { %v4658_v12 = vpop.eup %4657 }
 0x849   :  { %v2101_v62 = vmul.f32 %v4658_v12, %v4654_v4 }
 0x84a   :  { %v4660_v5 = vpop.eup %4659 }
 0x84b   :  { %v2100_v26 = vmul.f32 %v4660_v5, %v6195_v17 }
 0x84c   :  { %v4662_v46 = vpop.eup %4661 }
 0x84d   :  { %v2102_v0 = vadd.f32 %v2101_v62, %v2100_v26  ;;  %v7418_v62 = vld [vmem:[#allocation33_spill] sm:$0xff] }
 0x84f   :  { %4663 = vtanh.f32 %v2102_v0  ;;  %v2118_v63 = vsub.f32 %v2102_v0, %v6195_v17 }
 0x851   :  { %v2119_v25 = vmul.f32 %v2118_v63, %v6408_v44 }
 0x853   :  { %v2120_v42 = vadd.f32 %v2119_v25, %v6195_v17 }
 0x85c   :  { %v4664_v27 = vpop.eup %4663 }
 0x85d   :  { %v6412_v7 = vmul.f32 %v4664_v27, %v4662_v46  ;;  %v7419_v46 = vld [vmem:[#allocation34_spill] sm:$0xff] }
 0x85f   :  { %v2115_v50 = vsub.f32 %v6412_v7, %v6203_v52 }
 0x861   :  { %v2116_v51 = vmul.f32 %v2115_v50, %v6408_v44  ;;  %v7420_v50 = vld [vmem:[#allocation32_spill] sm:$0xff] }
 0x863   :  { %v2117_v49 = vadd.f32 %v2116_v51, %v6203_v52 }
 0x865   :  { %v2125_v8 = vpack.c.bf16 %v2117_v49, %v2117_v49 }
 0x867   :  { %2319 = vmatmul.mubr.bf16.vlgmr.msra.gmra.mxu0 %v2125_v8  ;;  %2360 = vmatmul.mubr.bf16.vlgmr.msra.gmra.mxu1 %v2125_v8 }
 0x868   :  { %2642 = vmatpush1.bf16.msra.mxu1 %v6223_v3  ;;  %2673 = vmatprep.mubr.bf16.mxu1 %v7385_v30 }
 0x869   :  { %2643 = vmatprep.subr.bf16.mxu1 %v6236_v37 }
 0x86c   :  { %2644 = vmatpush1.bf16.msra.mxu1 %v6246_v19 }
 0x86d   :  { %2645 = vmatprep.subr.bf16.mxu1 %v6260_v20 }
 0x870   :  { %2646 = vmatpush1.bf16.msra.mxu1 %v6270_v21 }
 0x871   :  { %2647 = vmatprep.subr.bf16.mxu1 %v6280_v22 }
 0x874   :  { %2648 = vmatpush1.bf16.msra.mxu1 %v6292_v24 }
 0x875   :  { %2649 = vmatprep.subr.bf16.mxu1 %v6304_v29 }
 0x878   :  { %2650 = vmatpush1.bf16.msra.mxu1 %v6316_v32 }
 0x879   :  { %2651 = vmatprep.subr.bf16.mxu1 %v6328_v34 }
 0x87c   :  { %2652 = vmatpush1.bf16.msra.mxu1 %v6342_v36 }
 0x87d   :  { %2653 = vmatprep.subr.bf16.mxu1 %v6354_v40 }
 0x880   :  { %2654 = vmatpush1.bf16.msra.mxu1 %v6366_v43 }
 0x881   :  { %2655 = vmatprep.subr.bf16.mxu1 %v6378_v45 }
 0x884   :  { %2656 = vmatpush1.bf16.msra.mxu1 %v6390_v47 }
 0x927   :  { %v2320_v17 = vpop.f32.mrf.mxu0  ;;  %v2361_v52 = vpop.f32.mrf.mxu1 }
 0x928   :  { %v2368_v16 = vadd.f32 %v2320_v17, %v7417_v57  ;;  %v2370_v51 = vadd.f32 %v2361_v52, %v7420_v50  ;;  %v6457_v50 = vmul.f32 %v6041_v41, %v6047_v55  ;;  %v6473_v41 = vmul.f32 %v6137_v48, %v6143_v56  ;;  %v6489_v48 = vld [vmem:[%s7270_s9 + $0x38] sm:$0xff]   ;;  %v6498_v56 = vld [vmem:[%s7270_s9 + $0x70] sm:$0xff]  }
 0x929   :  { %v2322_v4 = vpop.f32.mrf.mxu0  ;;  %v2363_v59 = vpop.f32.mrf.mxu1  ;;  %7422 = vst [vmem:[#allocation15_spill] sm:$0xff] %v6489_v48  ;;  %7423 = vst [vmem:[#allocation17_spill] sm:$0xff] %v6498_v56 }
 0x92a   :  { %v4126_v12 = vmul.f32 -1.442695, %v2368_v16  ;;  %v2369_v5 = vadd.f32 %v2322_v4, %v7418_v62  ;;  %v2371_v27 = vadd.f32 %v2363_v59, %v7419_v46 }
 0x92b   :  { %v2324_v13 = vpop.f32.mrf.mxu0  ;;  %v2365_v26 = vpop.f32.mrf.mxu1 }
 0x92c   :  { %4665 = vpow2.f32 %v4126_v12  ;;  %v4127_v0 = vmul.f32 -1.442695, %v2369_v5  ;;  %v4128_v49 = vmul.f32 -1.442695, %v2371_v27 }
 0x92d   :  { %v2325_v63 = vpop.f32.mrf.mxu0  ;;  %v2366_v25 = vpop.f32.mrf.mxu1 }
 0x92e   :  { %4667 = vpow2.f32 %v4127_v0  ;;  %v6443_v63 = vmul.f32 %v5754_v60, %v5759_v6 }
 0x92f   :  { %4669 = vtanh.f32 %v2370_v51  ;;  %v6463_v51 = vmul.f32 %v5875_v18, %v5881_v61  ;;  %v6478_v18 = vmul.f32 %v6408_v44, %v6412_v7  ;;  %v6512_v44 = vld [vmem:[%s7270_s9 + $0x68] sm:$0xff]  }
 0x930   :  { %4671 = vpow2.f32 %v4128_v49  ;;  %v6467_v49 = vmul.f32 %v6191_v11, %v6197_v58  ;;  %v6484_v11 = vld [vmem:[%s7270_s9 + $0x78] sm:$0xff]   ;;  %v6503_v58 = vld [vmem:[%s7270_s9 + $0x30] sm:$0xff]   ;;  %7425 = vst [vmem:[#allocation16_spill] sm:$0xff] %v6512_v44  ;;  %v6517_v7 = vld [vmem:[%s7270_s9 + $0x28] sm:$0xff]  }
 0x931   :  { %4167 = vmatprep.subr.bf16.mxu0 %v6484_v11  ;;  %4189 = vmatprep.subr.bf16.mxu1 %v6484_v11  ;;  %7424 = vst [vmem:[#allocation18_spill] sm:$0xff] %v6503_v58  ;;  %7426 = vst [vmem:[#allocation19_spill] sm:$0xff] %v6517_v7 }
 0x932   :  { %4168 = vmatpush3.bf16.msra.mxu0 %v6489_v48 }
 0x933   :  { %4169 = vmatprep.subr.bf16.mxu0 %v6498_v56 }
 0x936   :  { %4170 = vmatpush3.bf16.msra.mxu0 %v6503_v58 }
 0x937   :  { %4171 = vmatprep.subr.bf16.mxu0 %v6512_v44 }
 0x939   :  { %v4666_v8 = vpop.eup %4665 }
 0x93a   :  { %v2375_v47 = vadd.f32 1.0, %v4666_v8  ;;  %4172 = vmatpush3.bf16.msra.mxu0 %v6517_v7  ;;  %v6526_v8 = vld [vmem:[%s7270_s9 + $0x60] sm:$0xff]  }
 0x93b   :  { %v4668_v17 = vpop.eup %4667  ;;  %7427 = vst [vmem:[#allocation21_spill] sm:$0xff] %v6526_v8  ;;  %4173 = vmatprep.subr.bf16.mxu0 %v6526_v8 }
 0x93c   :  { %4673 = vrcp.f32 %v2375_v47  ;;  %v2381_v57 = vadd.f32 1.0, %v4668_v17  ;;  %v4670_v16 = vpop.eup %4669  ;;  %v6531_v17 = vld [vmem:[%s7270_s9 + $0x20] sm:$0xff]  }
 0x93d   :  { %v4672_v4 = vpop.eup %4671  ;;  %7428 = vst [vmem:[#allocation22_spill] sm:$0xff] %v6531_v17 }
 0x93e   :  { %4675 = vrcp.f32 %v2381_v57  ;;  %v2388_v13 = vadd.f32 1.0, %v4672_v4  ;;  %4174 = vmatpush3.bf16.msra.mxu0 %v6531_v17  ;;  %v6540_v57 = vld [vmem:[%s7270_s9 + $0x58] sm:$0xff]   ;;  %v6550_v4 = vld [vmem:[%s7270_s9 + $0x50] sm:$0xff]  }
 0x93f   :  { %7429 = vst [vmem:[#allocation20_spill] sm:$0xff] %v6540_v57  ;;  %7431 = vst [vmem:[#allocation25_spill] sm:$0xff] %v6550_v4  ;;  %4175 = vmatprep.subr.bf16.mxu0 %v6540_v57 }
 0x940   :  { %4677 = vrcp.f32 %v2388_v13  ;;  %v6579_v13 = vld [vmem:[%s7270_s9 + $0x40] sm:$0xff]  }
 0x941   :  { %7435 = vst [vmem:[#allocation29_spill] sm:$0xff] %v6579_v13 }
 0x949   :  { %v4674_v12 = vpop.eup %4673 }
 0x94a   :  { %v2392_v62 = vmul.f32 %v4674_v12, %v4670_v16  ;;  %v6545_v16 = vld [vmem:[%s7270_s9 + $0x18] sm:$0xff]   ;;  %v6558_v12 = vld [vmem:[%s7270_s9 + $0x10] sm:$0xff]  }
 0x94b   :  { %v4676_v5 = vpop.eup %4675  ;;  %7430 = vst [vmem:[#allocation23_spill] sm:$0xff] %v6545_v16  ;;  %4176 = vmatpush3.bf16.msra.mxu0 %v6545_v16  ;;  %7432 = vst [vmem:[#allocation26_spill] sm:$0xff] %v6558_v12 }
 0x94c   :  { %v2391_v26 = vmul.f32 %v4676_v5, %v2120_v42  ;;  %v6453_v42 = vmul.f32 %v5808_v1, %v5815_v53  ;;  %4177 = vmatprep.subr.bf16.mxu0 %v6550_v4  ;;  %v6572_v5 = vld [vmem:[%s7270_s9 + $0x8] sm:$0xff]  }
 0x94d   :  { %v4678_v52 = vpop.eup %4677  ;;  %7434 = vst [vmem:[#allocation27_spill] sm:$0xff] %v6572_v5 }
 0x94e   :  { %v6438_v0 = vadd.f32 %v2392_v62, %v2391_v26  ;;  %v6565_v62 = vld [vmem:[%s7270_s9 + $0x48] sm:$0xff]   ;;  %v6586_v26 = vld [vmem:[%s7270_s9] sm:$0xff]  }
 0x94f   :  { %7433 = vst [vmem:[#allocation24_spill] sm:$0xff] %v6565_v62  ;;  %4178 = vmatpush3.bf16.msra.mxu0 %v6558_v12  ;;  %7436 = vst [vmem:[#allocation30_spill] sm:$0xff] %v6586_v26 }
 0x950   :  { %7421 = vst [vmem:[#allocation12_spill] sm:$0xff] %v6438_v0  ;;  %4679 = vtanh.f32 %v6438_v0  ;;  %4179 = vmatprep.subr.bf16.mxu0 %v6565_v62 }
 0x953   :  { %4180 = vmatpush3.bf16.msra.mxu0 %v6572_v5 }
 0x954   :  { %4181 = vmatprep.subr.bf16.mxu0 %v6579_v13 }
 0x957   :  { %4182 = vmatpush3.bf16.msra.mxu0 %v6586_v26 }
 0x958   :  { %2682 = vmatprep.subr.bf16.mxu0 %v6217_v14 }
 0x95d   :  { %v4680_v59 = vpop.eup %4679 }
 0x95e   :  { %v2395_v47 = vmul.f32 %v4680_v59, %v4678_v52 }
 0x960   :  { %v6445_v25 = vpack.c.bf16 %v2395_v47, %v2395_v47  ;;  %v2405_v46 = vmul.f32 %v2395_v47, %v6443_v63  ;;  %v2404_v27 = vmul.f32 %v2395_v47, %v5698_v38  ;;  %v2408_v60 = vmul.f32 %v2395_v47, %v6457_v50 }
 0x961   :  { %v2406_v6 = vmul.f32 %v2395_v47, %v6453_v42  ;;  %v2410_v1 = vmul.f32 %v2395_v47, %v6467_v49  ;;  %v2407_v53 = vmul.f32 %v2395_v47, %v6463_v51  ;;  %v2409_v55 = vmul.f32 %v2395_v47, %v6473_v41 }
 0x962   :  { %2626 = vmatprep.mubr.bf16.mxu0 %v6445_v25  ;;  %2674 = vmatmul.mubr.bf16.vlgmr.msra.gmra.mxu1 %v6445_v25  ;;  %v2411_v61 = vmul.f32 %v2395_v47, %v6478_v18 }
 0x963   :  { %2414 = vadd.xlane.f32.xlu1 %v2405_v46  ;;  %2412 = vadd.xlane.f32.xlu0 %v2404_v27 }
 0x964   :  { %4190 = vmatpush3.bf16.msra.mxu1 %v6489_v48 }
 0x965   :  { %4191 = vmatprep.subr.bf16.mxu1 %v6498_v56 }
 0x967   :  { %2420 = vadd.xlane.f32.xlu1 %v2408_v60  ;;  %2416 = vadd.xlane.f32.xlu0 %v2406_v6 }
 0x968   :  { %4192 = vmatpush3.bf16.msra.mxu1 %v6503_v58 }
 0x969   :  { %4193 = vmatprep.subr.bf16.mxu1 %v6512_v44 }
 0x96b   :  { %2424 = vadd.xlane.f32.xlu1 %v2410_v1  ;;  %2418 = vadd.xlane.f32.xlu0 %v2407_v53 }
 0x96c   :  { %4194 = vmatpush3.bf16.msra.mxu1 %v6517_v7 }
 0x96d   :  { %4195 = vmatprep.subr.bf16.mxu1 %v6526_v8 }
 0x96f   :  { %2422 = vadd.xlane.f32.xlu0 %v2409_v55 }
 0x970   :  { %4196 = vmatpush3.bf16.msra.mxu1 %v6531_v17 }
 0x971   :  { %4197 = vmatprep.subr.bf16.mxu1 %v6540_v57 }
 0x973   :  { %2426 = vadd.xlane.f32.xlu0 %v2411_v61 }
 0x974   :  { %4198 = vmatpush3.bf16.msra.mxu1 %v6545_v16 }
 0x975   :  { %4199 = vmatprep.subr.bf16.mxu1 %v6550_v4 }
 0x978   :  { %4200 = vmatpush3.bf16.msra.mxu1 %v6558_v12 }
 0x979   :  { %4201 = vmatprep.subr.bf16.mxu1 %v6565_v62 }
 0x97c   :  { %4202 = vmatpush3.bf16.msra.mxu1 %v6572_v5 }
 0x97d   :  { %4203 = vmatprep.subr.bf16.mxu1 %v6579_v13 }
 0x980   :  { %4204 = vmatpush3.bf16.msra.mxu1 %v6586_v26 }
 0x981   :  { %2936 = vmatprep.subr.bf16.mxu1 %v6217_v14 }
 0x9ec   :  { %v2413_v52 = vpop.xlane.xlu0 %2412  ;;  %v2415_v59 = vpop.xlane.xlu1 %2414 }
 0x9f0   :  { %v2417_v47 = vpop.xlane.xlu0 %2416  ;;  %v2421_v46 = vpop.xlane.xlu1 %2420 }
 0x9f1   :  { %v2428_v55 = vmax.f32 %v2413_v52, %v2421_v46 }
 0x9f4   :  { %v2419_v27 = vpop.xlane.xlu0 %2418  ;;  %v2425_v6 = vpop.xlane.xlu1 %2424 }
 0x9f5   :  { %v2430_v61 = vmax.f32 %v2417_v47, %v2425_v6 }
 0x9f8   :  { %v2423_v60 = vpop.xlane.xlu0 %2422 }
 0x9f9   :  { %v2429_v1 = vmax.f32 %v2415_v59, %v2423_v60 }
 0x9fb   :  { %v2432_v5 = vmax.f32 %v2428_v55, %v2429_v1 }
 0x9fc   :  { %v2427_v53 = vpop.xlane.xlu0 %2426 }
 0x9fd   :  { %v2431_v13 = vmax.f32 %v2419_v27, %v2427_v53 }
 0x9ff   :  { %v2433_v62 = vmax.f32 %v2430_v61, %v2431_v13 }
 0xa01   :  { %v2434_v12 = vmax.f32 %v2432_v5, %v2433_v62 }
 0xa03   :  { %v2435_v26 = vsub.f32 %v2413_v52, %v2434_v12  ;;  %v2436_v4 = vsub.f32 %v2415_v59, %v2434_v12  ;;  %v2437_v16 = vsub.f32 %v2417_v47, %v2434_v12  ;;  %v2438_v57 = vsub.f32 %v2419_v27, %v2434_v12  ;;  %v7437_v47 = vld [vmem:[#allocation35_spill] sm:$0xff]  ;;  %v7438_v27 = vld [vmem:[#allocation37_spill] sm:$0xff] }
 0xa04   :  { %v2439_v8 = vsub.f32 %v2421_v46, %v2434_v12  ;;  %v2440_v44 = vsub.f32 %v2423_v60, %v2434_v12  ;;  %v2441_v56 = vsub.f32 %v2425_v6, %v2434_v12  ;;  %v2442_v0 = vsub.f32 %v2427_v53, %v2434_v12 }
 0xa05   :  { %v2443_v14 = vmul.f32 1.442695, %v2435_v26  ;;  %v2445_v17 = vmul.f32 1.442695, %v2436_v4  ;;  %v2447_v7 = vmul.f32 1.442695, %v2437_v16 }
 0xa06   :  { %v2449_v58 = vmul.f32 1.442695, %v2438_v57  ;;  %v2451_v48 = vmul.f32 1.442695, %v2439_v8  ;;  %v2453_v1 = vmul.f32 1.442695, %v2440_v44 }
 0xa07   :  { %4681 = vpow2.f32 %v2443_v14  ;;  %v2455_v62 = vmul.f32 1.442695, %v2441_v56  ;;  %v2457_v5 = vmul.f32 1.442695, %v2442_v0 }
 0xa08   :  { %4683 = vpow2.f32 %v2445_v17 }
 0xa09   :  { %4685 = vpow2.f32 %v2447_v7 }
 0xa0a   :  { %4687 = vpow2.f32 %v2449_v58 }
 0xa0b   :  { %4689 = vpow2.f32 %v2451_v48 }
 0xa0c   :  { %4691 = vpow2.f32 %v2453_v1 }
 0xa0d   :  { %4693 = vpow2.f32 %v2455_v62 }
 0xa0e   :  { %4695 = vpow2.f32 %v2457_v5 }
 0xa14   :  { %v4682_v13 = vpop.eup %4681 }
 0xa15   :  { %v4684_v4 = vpop.eup %4683 }
 0xa16   :  { %v2459_v26 = vadd.f32 %v4684_v4, %v4682_v13  ;;  %v4686_v16 = vpop.eup %4685 }
 0xa17   :  { %v4688_v52 = vpop.eup %4687 }
 0xa18   :  { %v2460_v14 = vadd.f32 %v4686_v16, %v2459_v26  ;;  %v4690_v57 = vpop.eup %4689 }
 0xa19   :  { %v4692_v7 = vpop.eup %4691 }
 0xa1a   :  { %v2461_v17 = vadd.f32 %v4688_v52, %v2460_v14  ;;  %v4694_v12 = vpop.eup %4693 }
 0xa1b   :  { %v4696_v44 = vpop.eup %4695 }
 0xa1c   :  { %v2462_v59 = vadd.f32 %v4690_v57, %v2461_v17 }
 0xa1e   :  { %v2463_v8 = vadd.f32 %v4692_v7, %v2462_v59 }
 0xa20   :  { %v2464_v58 = vadd.f32 %v4694_v12, %v2463_v8 }
 0xa22   :  { %v2465_v48 = vadd.f32 %v4696_v44, %v2464_v58  ;;  %v2675_v56 = vpop.f32.mrf.mxu1 }
 0xa23   :  { %v6596_v0 = vadd.f32 %v2675_v56, %v7437_v47 }
 0xa24   :  { %4697 = vrcp.f32 %v2465_v48  ;;  %v2677_v46 = vpop.f32.mrf.mxu1 }
 0xa25   :  { %v6599_v60 = vadd.f32 %v2677_v46, %v7438_v27 }
 0xa26   :  { %v2679_v6 = vpop.f32.mrf.mxu1 }
 0xa28   :  { %v2680_v53 = vpop.f32.mrf.mxu1 }
 0xa31   :  { %v4698_v55 = vpop.eup %4697 }
 0xa32   :  { %v2467_v61 = vmul.f32 %v4698_v55, %v4682_v13  ;;  %v2468_v1 = vmul.f32 %v4698_v55, %v4684_v4  ;;  %v2469_v62 = vmul.f32 %v4698_v55, %v4686_v16  ;;  %v2470_v5 = vmul.f32 %v4698_v55, %v4688_v52 }
 0xa33   :  { %v2471_v17 = vmul.f32 %v4698_v55, %v4690_v57  ;;  %v2472_v58 = vmul.f32 %v4698_v55, %v4692_v7  ;;  %v2473_v47 = vmul.f32 %v4698_v55, %v4694_v12  ;;  %v2474_v13 = vmul.f32 %v4698_v55, %v4696_v44 }
 0xa34   :  { %v2475_v26 = vmul.f32 %v2467_v61, %v5698_v38  ;;  %v2476_v14 = vmul.f32 %v2468_v1, %v6443_v63  ;;  %v2477_v59 = vmul.f32 %v2469_v62, %v6453_v42  ;;  %v2478_v48 = vmul.f32 %v2470_v5, %v6463_v51 }
 0xa35   :  { %v2479_v46 = vmul.f32 %v2471_v17, %v6457_v50  ;;  %v2480_v4 = vmul.f32 %v2472_v58, %v6473_v41  ;;  %v2481_v52 = vmul.f32 %v2473_v47, %v6467_v49  ;;  %v2482_v57 = vmul.f32 %v2474_v13, %v6478_v18  ;;  %v7450_v13 = vld [vmem:[#allocation18_spill] sm:$0xff] }
 0xa36   :  { %v2483_v8 = vadd.f32 %v2476_v14, %v2475_v26 }
 0xa38   :  { %v2484_v56 = vadd.f32 %v2483_v8, %v2477_v59 }
 0xa3a   :  { %v2485_v27 = vadd.f32 %v2484_v56, %v2478_v48  ;;  %v7448_v56 = vld [vmem:[#allocation15_spill] sm:$0xff] }
 0xa3c   :  { %v2486_v16 = vadd.f32 %v2485_v27, %v2479_v46  ;;  %v7449_v27 = vld [vmem:[#allocation17_spill] sm:$0xff] }
 0xa3e   :  { %v2487_v6 = vadd.f32 %v2486_v16, %v2480_v4 }
 0xa40   :  { %v2488_v53 = vadd.f32 %v2487_v6, %v2481_v52  ;;  %v7451_v52 = vld [vmem:[#allocation16_spill] sm:$0xff]  ;;  %v7452_v6 = vld [vmem:[#allocation19_spill] sm:$0xff] }
 0xa42   :  { %v2489_v61 = vadd.f32 %v2488_v53, %v2482_v57 }
 0xa44   :  { %v2490_v1 = vpack.c.bf16 %v2489_v61, %v2489_v61  ;;  %v7453_v61 = vld [vmem:[#allocation21_spill] sm:$0xff] }
 0xa46   :  { %2627 = vmatmul.mubr.bf16.vlgmr.msra.gmra.mxu0 %v2490_v1  ;;  %v7454_v1 = vld [vmem:[#allocation22_spill] sm:$0xff] }
 0xa47   :  { %2683 = vmatpush1.bf16.msra.mxu0 %v6228_v54  ;;  %2714 = vmatprep.mubr.bf16.mxu0 %v7385_v30  ;;  %v7439_v54 = vld [vmem:[#allocation10_spill] sm:$0xff] }
 0xa48   :  { %2684 = vmatprep.subr.bf16.mxu0 %v6241_v9  ;;  %v7440_v9 = vld [vmem:[#allocation8_spill] sm:$0xff] }
 0xa4b   :  { %2685 = vmatpush1.bf16.msra.mxu0 %v6251_v2  ;;  %v7441_v2 = vld [vmem:[#allocation11_spill] sm:$0xff] }
 0xa4c   :  { %2686 = vmatprep.subr.bf16.mxu0 %v6265_v10  ;;  %v7442_v10 = vld [vmem:[#allocation14_spill] sm:$0xff] }
 0xa4f   :  { %2687 = vmatpush1.bf16.msra.mxu0 %v6275_v15  ;;  %v7443_v15 = vld [vmem:[#allocation7_spill] sm:$0xff] }
 0xa50   :  { %2688 = vmatprep.subr.bf16.mxu0 %v6287_v23  ;;  %v4147_v23 = vmul.f32 -1.442695, %v6599_v60 }
 0xa52   :  { %4699 = vpow2.f32 %v4147_v23 }
 0xa53   :  { %2689 = vmatpush1.bf16.msra.mxu0 %v6299_v28 }
 0xa54   :  { %2690 = vmatprep.subr.bf16.mxu0 %v6311_v31 }
 0xa57   :  { %2691 = vmatpush1.bf16.msra.mxu0 %v6321_v33 }
 0xa58   :  { %2692 = vmatprep.subr.bf16.mxu0 %v6335_v35 }
 0xa5b   :  { %2693 = vmatpush1.bf16.msra.mxu0 %v6347_v39  ;;  %v7446_v39 = vld [vmem:[#allocation38_spill] sm:$0xff] }
 0xa5c   :  { %2694 = vmatprep.subr.bf16.mxu0 %v7439_v54  ;;  %v7455_v54 = vld [vmem:[#allocation20_spill] sm:$0xff] }
 0xa5f   :  { %2695 = vmatpush1.bf16.msra.mxu0 %v7440_v9  ;;  %v4700_v28 = vpop.eup %4699  ;;  %v7456_v9 = vld [vmem:[#allocation23_spill] sm:$0xff] }
 0xa60   :  { %2696 = vmatprep.subr.bf16.mxu0 %v7441_v2  ;;  %v2736_v31 = vadd.f32 1.0, %v4700_v28  ;;  %v7457_v2 = vld [vmem:[#allocation25_spill] sm:$0xff] }
 0xa63   :  { %2697 = vmatpush1.bf16.msra.mxu0 %v7442_v10  ;;  %v7458_v10 = vld [vmem:[#allocation26_spill] sm:$0xff] }
 0xa64   :  { %2895 = vmatprep.subr.bf16.mxu0 %v7443_v15  ;;  %v7459_v15 = vld [vmem:[#allocation24_spill] sm:$0xff] }
 0xa66   :  { %2715 = vmatmul.mubr.bf16.vlgmr.msra.gmra.mxu0 %v6445_v25 }
 0xa67   :  { %2896 = vmatpush1.bf16.msra.mxu0 %v6223_v3  ;;  %2927 = vmatprep.mubr.bf16.mxu0 %v7385_v30  ;;  %v7444_v3 = vld [vmem:[#allocation13_spill] sm:$0xff] }
 0xa68   :  { %2897 = vmatprep.subr.bf16.mxu0 %v6236_v37 }
 0xa6b   :  { %2898 = vmatpush1.bf16.msra.mxu0 %v6246_v19 }
 0xa6c   :  { %2899 = vmatprep.subr.bf16.mxu0 %v6260_v20 }
 0xa6f   :  { %2900 = vmatpush1.bf16.msra.mxu0 %v6270_v21 }
 0xa70   :  { %2901 = vmatprep.subr.bf16.mxu0 %v6280_v22 }
 0xa73   :  { %2902 = vmatpush1.bf16.msra.mxu0 %v6292_v24  ;;  %v4146_v24 = vmul.f32 -1.442695, %v6596_v0  ;;  %v7447_v0 = vld [vmem:[#allocation12_spill] sm:$0xff] }
 0xa74   :  { %2903 = vmatprep.subr.bf16.mxu0 %v6304_v29 }
 0xa75   :  { %4701 = vpow2.f32 %v4146_v24 }
 0xa76   :  { %4703 = vrcp.f32 %v2736_v31 }
 0xa77   :  { %2904 = vmatpush1.bf16.msra.mxu0 %v6316_v32 }
 0xa78   :  { %2905 = vmatprep.subr.bf16.mxu0 %v6328_v34  ;;  %v7445_v34 = vld [vmem:[#allocation36_spill] sm:$0xff] }
 0xa7b   :  { %2906 = vmatpush1.bf16.msra.mxu0 %v6342_v36 }
 0xa7c   :  { %2907 = vmatprep.subr.bf16.mxu0 %v6354_v40 }
 0xa7f   :  { %2908 = vmatpush1.bf16.msra.mxu0 %v6366_v43 }
 0xa80   :  { %2909 = vmatprep.subr.bf16.mxu0 %v6378_v45 }
 0xa82   :  { %v4702_v29 = vpop.eup %4701 }
 0xa83   :  { %2910 = vmatpush1.bf16.msra.mxu0 %v7444_v3  ;;  %v2730_v32 = vadd.f32 1.0, %v4702_v29  ;;  %v4704_v7 = vpop.eup %4703  ;;  %v7460_v3 = vld [vmem:[#allocation27_spill] sm:$0xff] }
 0xa84   :  { %4211 = vmatprep.subr.bf16.mxu0 %v6484_v11  ;;  %v2746_v60 = vmul.f32 %v4704_v7, %v7447_v0 }
 0xa85   :  { %4705 = vrcp.f32 %v2730_v32 }
 0xa92   :  { %v4706_v12 = vpop.eup %4705 }
 0xb06   :  { %v4183_v37 = vpop.f32.mrf.mxu0 }
 0xb08   :  { %v4184_v19 = vpop.f32.mrf.mxu0 }
 0xb09   :  { %v6644_v20 = vadd.f32 %v4184_v19, %v4183_v37  ;;  %v7461_v37 = vld [vmem:[#allocation29_spill] sm:$0xff]  ;;  %v7462_v19 = vld [vmem:[#allocation30_spill] sm:$0xff] }
 0xb0a   :  { %v4186_v21 = vpop.f32.mrf.mxu0 }
 0xb0b   :  { %v7463_v21 = vld [vmem:[#allocation9_spill] sm:$0xff] }
 0xb0c   :  { %v4187_v22 = vpop.f32.mrf.mxu0 }
 0xb26   :  { %v2716_v33 = vpop.f32.mrf.mxu0 }
 0xb27   :  { %v2725_v35 = vadd.f32 %v2716_v33, %v7445_v34 }
 0xb28   :  { %v2718_v36 = vpop.f32.mrf.mxu0 }
 0xb29   :  { %4707 = vtanh.f32 %v2725_v35  ;;  %v2726_v40 = vadd.f32 %v2718_v36, %v7446_v39 }
 0xb2a   :  { %v2720_v43 = vpop.f32.mrf.mxu0 }
 0xb2b   :  { %v4148_v45 = vmul.f32 -1.442695, %v2726_v40 }
 0xb2c   :  { %v2721_v25 = vpop.f32.mrf.mxu0 }
 0xb2d   :  { %4709 = vpow2.f32 %v4148_v45 }
 0xb36   :  { %v4708_v44 = vpop.eup %4707 }
 0xb37   :  { %v2747_v55 = vmul.f32 %v4708_v44, %v4706_v12 }
 0xb39   :  { %v6651_v62 = vadd.f32 %v2747_v55, %v2746_v60 }
 0xb3a   :  { %v4710_v5 = vpop.eup %4709 }
 0xb3b   :  { %v2743_v26 = vadd.f32 1.0, %v4710_v5  ;;  %4711 = vtanh.f32 %v6651_v62 }
 0xb3d   :  { %4713 = vrcp.f32 %v2743_v26 }
 0xb48   :  { %v4712_v14 = vpop.eup %4711 }
 0xb4a   :  { %v4714_v17 = vpop.eup %4713 }
 0xb4b   :  { %v2750_v59 = vmul.f32 %v4714_v17, %v4712_v14 }
 0xb4d   :  { %v6654_v8 = vpack.c.bf16 %v2750_v59, %v2750_v59  ;;  %v2760_v58 = vmul.f32 %v2750_v59, %v6443_v63  ;;  %v2759_v48 = vmul.f32 %v2750_v59, %v5698_v38  ;;  %v2762_v47 = vmul.f32 %v2750_v59, %v6463_v51 }
 0xb4e   :  { %v2761_v46 = vmul.f32 %v2750_v59, %v6453_v42  ;;  %v2764_v4 = vmul.f32 %v2750_v59, %v6473_v41  ;;  %v2763_v16 = vmul.f32 %v2750_v59, %v6457_v50  ;;  %v2766_v57 = vmul.f32 %v2750_v59, %v6478_v18 }
 0xb4f   :  { %2879 = vmatprep.mubr.bf16.mxu1 %v6654_v8  ;;  %2928 = vmatmul.mubr.bf16.vlgmr.msra.gmra.mxu0 %v6654_v8  ;;  %v2765_v53 = vmul.f32 %v2750_v59, %v6467_v49 }
 0xb50   :  { %2769 = vadd.xlane.f32.xlu0 %v2760_v58  ;;  %2767 = vadd.xlane.f32.xlu1 %v2759_v48 }
 0xb51   :  { %4212 = vmatpush3.bf16.msra.mxu0 %v7448_v56 }
 0xb52   :  { %4213 = vmatprep.subr.bf16.mxu0 %v7449_v27 }
 0xb54   :  { %2773 = vadd.xlane.f32.xlu0 %v2762_v47  ;;  %2771 = vadd.xlane.f32.xlu1 %v2761_v46 }
 0xb55   :  { %4214 = vmatpush3.bf16.msra.mxu0 %v7450_v13 }
 0xb56   :  { %4215 = vmatprep.subr.bf16.mxu0 %v7451_v52 }
 0xb58   :  { %2777 = vadd.xlane.f32.xlu0 %v2764_v4  ;;  %2775 = vadd.xlane.f32.xlu1 %v2763_v16 }
 0xb59   :  { %4216 = vmatpush3.bf16.msra.mxu0 %v7452_v6 }
 0xb5a   :  { %4217 = vmatprep.subr.bf16.mxu0 %v7453_v61 }
 0xb5c   :  { %2781 = vadd.xlane.f32.xlu0 %v2766_v57  ;;  %2779 = vadd.xlane.f32.xlu1 %v2765_v53 }
 0xb5d   :  { %4218 = vmatpush3.bf16.msra.mxu0 %v7454_v1 }
 0xb5e   :  { %4219 = vmatprep.subr.bf16.mxu0 %v7455_v54 }
 0xb61   :  { %4220 = vmatpush3.bf16.msra.mxu0 %v7456_v9 }
 0xb62   :  { %4221 = vmatprep.subr.bf16.mxu0 %v7457_v2 }
 0xb65   :  { %4222 = vmatpush3.bf16.msra.mxu0 %v7458_v10 }
 0xb66   :  { %4223 = vmatprep.subr.bf16.mxu0 %v7459_v15 }
 0xb69   :  { %4224 = vmatpush3.bf16.msra.mxu0 %v7460_v3 }
 0xb6a   :  { %4225 = vmatprep.subr.bf16.mxu0 %v7461_v37 }
 0xb6d   :  { %4226 = vmatpush3.bf16.msra.mxu0 %v7462_v19 }
 0xb6e   :  { %3190 = vmatprep.subr.bf16.mxu0 %v7463_v21 }
 0xbd9   :  { %v2770_v22 = vpop.xlane.xlu0 %2769  ;;  %v2768_v23 = vpop.xlane.xlu1 %2767 }
 0xbdd   :  { %v2774_v24 = vpop.xlane.xlu0 %2773  ;;  %v2772_v28 = vpop.xlane.xlu1 %2771 }
 0xbe1   :  { %v2778_v29 = vpop.xlane.xlu0 %2777  ;;  %v2776_v31 = vpop.xlane.xlu1 %2775 }
 0xbe2   :  { %v2784_v32 = vmax.f32 %v2770_v22, %v2778_v29  ;;  %v2783_v33 = vmax.f32 %v2768_v23, %v2776_v31 }
 0xbe4   :  { %v2787_v40 = vmax.f32 %v2783_v33, %v2784_v32 }
 0xbe5   :  { %v2782_v34 = vpop.xlane.xlu0 %2781  ;;  %v2780_v35 = vpop.xlane.xlu1 %2779 }
 0xbe6   :  { %v2786_v36 = vmax.f32 %v2774_v24, %v2782_v34  ;;  %v2785_v39 = vmax.f32 %v2772_v28, %v2780_v35 }
 0xbe8   :  { %v2788_v43 = vmax.f32 %v2785_v39, %v2786_v36  ;;  %v7464_v39 = vld [vmem:[#allocation39_spill] sm:$0xff] }
 0xbea   :  { %v2789_v45 = vmax.f32 %v2787_v40, %v2788_v43 }
 0xbec   :  { %v2790_v25 = vsub.f32 %v2768_v23, %v2789_v45  ;;  %v2791_v7 = vsub.f32 %v2770_v22, %v2789_v45  ;;  %v2792_v12 = vsub.f32 %v2772_v28, %v2789_v45  ;;  %v2793_v44 = vsub.f32 %v2774_v24, %v2789_v45 }
 0xbed   :  { %v2794_v55 = vsub.f32 %v2776_v31, %v2789_v45  ;;  %v2795_v26 = vsub.f32 %v2778_v29, %v2789_v45  ;;  %v2796_v17 = vsub.f32 %v2780_v35, %v2789_v45  ;;  %v2797_v58 = vsub.f32 %v2782_v34, %v2789_v45  ;;  %v7465_v45 = vld [vmem:[#allocation41_spill] sm:$0xff] }
 0xbee   :  { %v2798_v0 = vmul.f32 1.442695, %v2790_v25  ;;  %v2800_v60 = vmul.f32 1.442695, %v2791_v7  ;;  %v2802_v5 = vmul.f32 1.442695, %v2792_v12 }
 0xbef   :  { %v2804_v14 = vmul.f32 1.442695, %v2793_v44  ;;  %v2806_v59 = vmul.f32 1.442695, %v2794_v55  ;;  %v2808_v48 = vmul.f32 1.442695, %v2795_v26 }
 0xbf0   :  { %4715 = vpow2.f32 %v2798_v0  ;;  %v2810_v47 = vmul.f32 1.442695, %v2796_v17  ;;  %v2812_v46 = vmul.f32 1.442695, %v2797_v58 }
 0xbf1   :  { %4717 = vpow2.f32 %v2800_v60 }
 0xbf2   :  { %4719 = vpow2.f32 %v2802_v5 }
 0xbf3   :  { %4721 = vpow2.f32 %v2804_v14 }
 0xbf4   :  { %4723 = vpow2.f32 %v2806_v59 }
 0xbf5   :  { %4725 = vpow2.f32 %v2808_v48 }
 0xbf6   :  { %4727 = vpow2.f32 %v2810_v47 }
 0xbf7   :  { %4729 = vpow2.f32 %v2812_v46 }
 0xbfd   :  { %v4716_v4 = vpop.eup %4715 }
 0xbfe   :  { %v4718_v16 = vpop.eup %4717 }
 0xbff   :  { %v2814_v57 = vadd.f32 %v4718_v16, %v4716_v4  ;;  %v4720_v53 = vpop.eup %4719 }
 0xc00   :  { %v4722_v22 = vpop.eup %4721 }
 0xc01   :  { %v2815_v21 = vadd.f32 %v4720_v53, %v2814_v57  ;;  %v4724_v24 = vpop.eup %4723 }
 0xc02   :  { %v4726_v29 = vpop.eup %4725 }
 0xc03   :  { %v2816_v23 = vadd.f32 %v4722_v22, %v2815_v21  ;;  %v4728_v32 = vpop.eup %4727 }
 0xc04   :  { %v4730_v34 = vpop.eup %4729 }
 0xc05   :  { %v2817_v28 = vadd.f32 %v4724_v24, %v2816_v23 }
 0xc07   :  { %v2818_v31 = vadd.f32 %v4726_v29, %v2817_v28 }
 0xc09   :  { %v2819_v33 = vadd.f32 %v4728_v32, %v2818_v31 }
 0xc0b   :  { %v2820_v35 = vadd.f32 %v4730_v34, %v2819_v33 }
 0xc0d   :  { %4731 = vrcp.f32 %v2820_v35 }
 0xc0f   :  { %v2929_v36 = vpop.f32.mrf.mxu0 }
 0xc10   :  { %v6683_v40 = vadd.f32 %v2929_v36, %v7464_v39  ;;  %v6718_v36 = vld [vmem:[%s7269_s7 + $0xac] ss:$16 sps:$4 sm:$0xff]   ;;  %v6724_v39 = vld [vmem:[%s7269_s7 + $0xa8] ss:$16 sps:$4 sm:$0xff]  }
 0xc11   :  { %v2931_v43 = vpop.f32.mrf.mxu0 }
 0xc12   :  { %v6686_v25 = vadd.f32 %v2931_v43, %v7465_v45  ;;  %v6730_v43 = vld [vmem:[%s7269_s7 + $0x8c] ss:$16 sps:$4 sm:$0xff]   ;;  %v6736_v45 = vld [vmem:[%s7269_s7 + $0x88] ss:$16 sps:$4 sm:$0xff]  }
 0xc13   :  { %v2933_v7 = vpop.f32.mrf.mxu0 }
 0xc14   :  { %v6742_v7 = vld [vmem:[%s7269_s7 + $0x6c] ss:$16 sps:$4 sm:$0xff]  }
 0xc15   :  { %v2934_v12 = vpop.f32.mrf.mxu0 }
 0xc16   :  { %v6748_v12 = vld [vmem:[%s7269_s7 + $0x68] ss:$16 sps:$4 sm:$0xff]  }
 0xc1a   :  { %v4732_v44 = vpop.eup %4731 }
 0xc1b   :  { %v2822_v0 = vmul.f32 %v4732_v44, %v4716_v4  ;;  %v2823_v60 = vmul.f32 %v4732_v44, %v4718_v16  ;;  %v2824_v55 = vmul.f32 %v4732_v44, %v4720_v53  ;;  %v2825_v5 = vmul.f32 %v4732_v44, %v4722_v22 }
 0xc1c   :  { %v2826_v17 = vmul.f32 %v4732_v44, %v4724_v24  ;;  %v2827_v48 = vmul.f32 %v4732_v44, %v4726_v29  ;;  %v2828_v57 = vmul.f32 %v4732_v44, %v4728_v32  ;;  %v2829_v4 = vmul.f32 %v4732_v44, %v4730_v34  ;;  %v6699_v29 = vld [vmem:[%s7269_s7 + $0xe8] ss:$16 sps:$4 sm:$0xff]   ;;  %v6706_v32 = vld [vmem:[%s7269_s7 + $0xcc] ss:$16 sps:$4 sm:$0xff]  }
 0xc1d   :  { %v2830_v26 = vmul.f32 %v2822_v0, %v5698_v38  ;;  %v2831_v14 = vmul.f32 %v2823_v60, %v6443_v63  ;;  %v2832_v59 = vmul.f32 %v2824_v55, %v6453_v42  ;;  %v2833_v47 = vmul.f32 %v2825_v5, %v6463_v51  ;;  %v6712_v34 = vld [vmem:[%s7269_s7 + $0xc8] ss:$16 sps:$4 sm:$0xff]   ;;  %v6754_v44 = vld [vmem:[%s7269_s7 + $0x4c] ss:$16 sps:$4 sm:$0xff]  }
 0xc1e   :  { %v2834_v21 = vmul.f32 %v2826_v17, %v6457_v50  ;;  %v2835_v16 = vmul.f32 %v2827_v48, %v6473_v41  ;;  %v2836_v22 = vmul.f32 %v2828_v57, %v6467_v49  ;;  %v2837_v24 = vmul.f32 %v2829_v4, %v6478_v18  ;;  %v6760_v0 = vld [vmem:[%s7269_s7 + $0x48] ss:$16 sps:$4 sm:$0xff]   ;;  %v6766_v60 = vld [vmem:[%s7269_s7 + $0x2c] ss:$16 sps:$4 sm:$0xff]   ;;  %v6797_v17 = vld [vmem:[%s7269_s7 + $0xe0] ss:$16 sps:$4 sm:$0xff]  }
 0xc1f   :  { %v2838_v58 = vadd.f32 %v2831_v14, %v2830_v26  ;;  %v6772_v55 = vld [vmem:[%s7269_s7 + $0x28] ss:$16 sps:$4 sm:$0xff]   ;;  %v6778_v5 = vld [vmem:[%s7269_s7 + $0xc] ss:$16 sps:$4 sm:$0xff]   ;;  %v6790_v14 = vld [vmem:[%s7269_s7 + $0xe4] ss:$16 sps:$4 sm:$0xff]  }
 0xc20   :  { %v6784_v26 = vld [vmem:[%s7269_s7 + $0x8] ss:$16 sps:$4 sm:$0xff]   ;;  %v6822_v48 = vld [vmem:[%s7269_s7 + $0xa0] ss:$16 sps:$4 sm:$0xff]   ;;  %v6840_v57 = vld [vmem:[%s7269_s7 + $0x64] ss:$16 sps:$4 sm:$0xff]  }
 0xc21   :  { %v2839_v46 = vadd.f32 %v2838_v58, %v2832_v59  ;;  %v6804_v59 = vld [vmem:[%s7269_s7 + $0xc4] ss:$16 sps:$4 sm:$0xff]   ;;  %7468 = vst [vmem:[#allocation33_spill] sm:$0xff] %v6840_v57  ;;  %v6858_v4 = vld [vmem:[%s7269_s7 + $0x40] ss:$16 sps:$4 sm:$0xff]  }
 0xc22   :  { %v6816_v58 = vld [vmem:[%s7269_s7 + $0xa4] ss:$16 sps:$4 sm:$0xff]   ;;  %7471 = vst [vmem:[#allocation35_spill] sm:$0xff] %v6858_v4 }
 0xc23   :  { %v2840_v23 = vadd.f32 %v2839_v46, %v2833_v47  ;;  %v6828_v47 = vld [vmem:[%s7269_s7 + $0x84] ss:$16 sps:$4 sm:$0xff]   ;;  %v6834_v46 = vld [vmem:[%s7269_s7 + $0x80] ss:$16 sps:$4 sm:$0xff]  }
 0xc24   :  { %7466 = vst [vmem:[#allocation28_spill] sm:$0xff] %v6828_v47  ;;  %7467 = vst [vmem:[#allocation31_spill] sm:$0xff] %v6834_v46 }
 0xc25   :  { %v2841_v53 = vadd.f32 %v2840_v23, %v2834_v21  ;;  %v6846_v21 = vld [vmem:[%s7269_s7 + $0x60] ss:$16 sps:$4 sm:$0xff]   ;;  %v6852_v23 = vld [vmem:[%s7269_s7 + $0x44] ss:$16 sps:$4 sm:$0xff]  }
 0xc26   :  { %7469 = vst [vmem:[#allocation34_spill] sm:$0xff] %v6846_v21  ;;  %7470 = vst [vmem:[#allocation32_spill] sm:$0xff] %v6852_v23 }
 0xc27   :  { %v2842_v28 = vadd.f32 %v2841_v53, %v2835_v16  ;;  %v6864_v16 = vld [vmem:[%s7269_s7 + $0x24] ss:$16 sps:$4 sm:$0xff]   ;;  %v6870_v53 = vld [vmem:[%s7269_s7 + $0x20] ss:$16 sps:$4 sm:$0xff]  }
 0xc28   :  { %7472 = vst [vmem:[#allocation37_spill] sm:$0xff] %v6864_v16  ;;  %7473 = vst [vmem:[#allocation10_spill] sm:$0xff] %v6870_v53 }
 0xc29   :  { %v2843_v31 = vadd.f32 %v2842_v28, %v2836_v22  ;;  %v6876_v22 = vld [vmem:[%s7269_s7 + $0x4] ss:$16 sps:$4 sm:$0xff]   ;;  %v6882_v28 = vld [vmem:[%s7269_s7] ss:$16 sps:$4 sm:$0xff]  }
 0xc2a   :  { %7474 = vst [vmem:[#allocation8_spill] sm:$0xff] %v6876_v22  ;;  %7475 = vst [vmem:[#allocation11_spill] sm:$0xff] %v6882_v28 }
 0xc2b   :  { %v2844_v33 = vadd.f32 %v2843_v31, %v2837_v24  ;;  %v6889_v24 = vld [vmem:[%s7271_s10] ss:$0 sm:$0xff] }
 0xc2c   :  { %7476 = vst [vmem:[#allocation14_spill] sm:$0xff] %v6889_v24 }
 0xc2d   :  { %v2845_v35 = vpack.c.bf16 %v2844_v33, %v2844_v33  ;;  %v2629_v33 = vadd.f32 %v6644_v20, %v6889_v24 }
 0xc2f   :  { %2880 = vmatmul.mubr.bf16.vlgmr.msra.gmra.mxu1 %v2845_v35  ;;  %4733 = vtanh.f32 %v2629_v33 }
 0xc30   :  { %2937 = vmatpush1.bf16.msra.mxu1 %v6699_v29  ;;  %2968 = vmatprep.mubr.bf16.mxu1 %v7385_v30 }
 0xc31   :  { %2938 = vmatprep.subr.bf16.mxu1 %v6706_v32 }
 0xc34   :  { %2939 = vmatpush1.bf16.msra.mxu1 %v6712_v34 }
 0xc35   :  { %2940 = vmatprep.subr.bf16.mxu1 %v6718_v36 }
 0xc38   :  { %2941 = vmatpush1.bf16.msra.mxu1 %v6724_v39 }
 0xc39   :  { %2942 = vmatprep.subr.bf16.mxu1 %v6730_v43 }
 0xc3c   :  { %2943 = vmatpush1.bf16.msra.mxu1 %v6736_v45 }
 0xc3d   :  { %2944 = vmatprep.subr.bf16.mxu1 %v6742_v7 }
 0xc40   :  { %2945 = vmatpush1.bf16.msra.mxu1 %v6748_v12 }
 0xc41   :  { %2946 = vmatprep.subr.bf16.mxu1 %v6754_v44 }
 0xc44   :  { %2947 = vmatpush1.bf16.msra.mxu1 %v6760_v0 }
 0xc45   :  { %2948 = vmatprep.subr.bf16.mxu1 %v6766_v60 }
 0xc48   :  { %2949 = vmatpush1.bf16.msra.mxu1 %v6772_v55 }
 0xc49   :  { %2950 = vmatprep.subr.bf16.mxu1 %v6778_v5 }
 0xc4c   :  { %2951 = vmatpush1.bf16.msra.mxu1 %v6784_v26 }
 0xc4d   :  { %3149 = vmatprep.subr.bf16.mxu1 %v6790_v14 }
 0xc4f   :  { %2969 = vmatmul.mubr.bf16.vlgmr.msra.gmra.mxu1 %v6654_v8  ;;  %v6810_v8 = vld [vmem:[%s7269_s7 + $0xc0] ss:$16 sps:$4 sm:$0xff]  }
 0xc50   :  { %3150 = vmatpush1.bf16.msra.mxu1 %v6797_v17  ;;  %3181 = vmatprep.mubr.bf16.mxu1 %v7385_v30 }
 0xc51   :  { %3151 = vmatprep.subr.bf16.mxu1 %v6804_v59 }
 0xc54   :  { %3152 = vmatpush1.bf16.msra.mxu1 %v6810_v8 }
 0xc55   :  { %3153 = vmatprep.subr.bf16.mxu1 %v6816_v58 }
 0xc58   :  { %3154 = vmatpush1.bf16.msra.mxu1 %v6822_v48 }
 0xc59   :  { %3155 = vmatprep.subr.bf16.mxu1 %v6828_v47 }
 0xc5c   :  { %3156 = vmatpush1.bf16.msra.mxu1 %v6834_v46 }
 0xc5d   :  { %3157 = vmatprep.subr.bf16.mxu1 %v6840_v57 }
 0xc60   :  { %3158 = vmatpush1.bf16.msra.mxu1 %v6846_v21 }
 0xc61   :  { %3159 = vmatprep.subr.bf16.mxu1 %v6852_v23  ;;  %v6896_v23 = vpop.eup %4733 }
 0xc62   :  { %7477 = vst [vmem:[#allocation7_spill] sm:$0xff] %v6896_v23 }
 0xc64   :  { %3160 = vmatpush1.bf16.msra.mxu1 %v6858_v4 }
 0xc65   :  { %3161 = vmatprep.subr.bf16.mxu1 %v6864_v16 }
 0xc68   :  { %3162 = vmatpush1.bf16.msra.mxu1 %v6870_v53 }
 0xc69   :  { %3163 = vmatprep.subr.bf16.mxu1 %v6876_v22 }
 0xc6c   :  { %3164 = vmatpush1.bf16.msra.mxu1 %v6882_v28  ;;  %v4150_v28 = vmul.f32 -1.442695, %v6686_v25 }
 0xc6d   :  { %4233 = vmatprep.subr.bf16.mxu1 %v6484_v11  ;;  %v4149_v11 = vmul.f32 -1.442695, %v6683_v40  ;;  %v7480_v40 = vld [vmem:[#allocation42_spill] sm:$0xff] }
 0xcef   :  { %v4205_v31 = vpop.f32.mrf.mxu1 }
 0xcf1   :  { %v4206_v35 = vpop.f32.mrf.mxu1 }
 0xcf2   :  { %v4207_v22 = vadd.f32 %v4206_v35, %v4205_v31 }
 0xcf3   :  { %v4208_v53 = vpop.f32.mrf.mxu1 }
 0xcf4   :  { %v2882_v16 = vadd.f32 %v4207_v22, %v6889_v24 }
 0xcf5   :  { %v4209_v4 = vpop.f32.mrf.mxu1 }
 0xcf6   :  { %4735 = vtanh.f32 %v2882_v16  ;;  %v7479_v4 = vld [vmem:[#allocation40_spill] sm:$0xff] }
 0xcf7   :  { %4737 = vpow2.f32 %v4150_v28 }
 0xcf8   :  { %4739 = vpow2.f32 %v4149_v11 }
 0xd03   :  { %v6898_v21 = vpop.eup %4735 }
 0xd04   :  { %7478 = vst [vmem:[#allocation13_spill] sm:$0xff] %v6898_v21  ;;  %v4738_v31 = vpop.eup %4737 }
 0xd05   :  { %v4740_v53 = vpop.eup %4739  ;;  %v2990_v35 = vadd.f32 1.0, %v4738_v31 }
 0xd06   :  { %v2984_v22 = vadd.f32 1.0, %v4740_v53 }
 0xd07   :  { %4741 = vrcp.f32 %v2990_v35 }
 0xd08   :  { %4743 = vrcp.f32 %v2984_v22 }
 0xd0f   :  { %v2970_v33 = vpop.f32.mrf.mxu1 }
 0xd10   :  { %v2979_v16 = vadd.f32 %v2970_v33, %v7479_v4 }
 0xd11   :  { %v2972_v25 = vpop.f32.mrf.mxu1 }
 0xd12   :  { %4745 = vtanh.f32 %v2979_v16  ;;  %v2980_v28 = vadd.f32 %v2972_v25, %v7480_v40 }
 0xd13   :  { %v2974_v11 = vpop.f32.mrf.mxu1 }
 0xd14   :  { %v4151_v24 = vmul.f32 -1.442695, %v2980_v28  ;;  %v4742_v46 = vpop.eup %4741 }
 0xd15   :  { %v2975_v57 = vpop.f32.mrf.mxu1  ;;  %v4744_v47 = vpop.eup %4743  ;;  %v3000_v23 = vmul.f32 %v4742_v46, %v6651_v62 }
 0xd16   :  { %4747 = vpow2.f32 %v4151_v24 }
 0xd1f   :  { %v4746_v20 = vpop.eup %4745 }
 0xd20   :  { %v3001_v31 = vmul.f32 %v4746_v20, %v4744_v47 }
 0xd22   :  { %v6905_v53 = vadd.f32 %v3001_v31, %v3000_v23 }
 0xd23   :  { %v4748_v35 = vpop.eup %4747 }
 0xd24   :  { %v2997_v21 = vadd.f32 1.0, %v4748_v35  ;;  %4749 = vtanh.f32 %v6905_v53 }
 0xd26   :  { %4751 = vrcp.f32 %v2997_v21 }
 0xd31   :  { %v4750_v22 = vpop.eup %4749 }
 0xd33   :  { %v4752_v33 = vpop.eup %4751 }
 0xd34   :  { %v3004_v4 = vmul.f32 %v4752_v33, %v4750_v22 }
 0xd36   :  { %v6908_v16 = vpack.c.bf16 %v3004_v4, %v3004_v4  ;;  %v3014_v57 = vmul.f32 %v3004_v4, %v6443_v63  ;;  %v3013_v24 = vmul.f32 %v3004_v4, %v5698_v38  ;;  %v3016_v62 = vmul.f32 %v3004_v4, %v6463_v51 }
 0xd37   :  { %v3015_v47 = vmul.f32 %v3004_v4, %v6453_v42  ;;  %v3018_v46 = vmul.f32 %v3004_v4, %v6473_v41  ;;  %v3017_v21 = vmul.f32 %v3004_v4, %v6457_v50  ;;  %v3019_v23 = vmul.f32 %v3004_v4, %v6467_v49 }
 0xd38   :  { %3133 = vmatprep.mubr.bf16.mxu0 %v6908_v16  ;;  %3182 = vmatmul.mubr.bf16.vlgmr.msra.gmra.mxu1 %v6908_v16 }
 0xd39   :  { %3023 = vadd.xlane.f32.xlu0 %v3014_v57  ;;  %3021 = vadd.xlane.f32.xlu1 %v3013_v24 }
 0xd3a   :  { %4234 = vmatpush3.bf16.msra.mxu1 %v7448_v56  ;;  %v3020_v56 = vmul.f32 %v3004_v4, %v6478_v18 }
 0xd3b   :  { %4235 = vmatprep.subr.bf16.mxu1 %v7449_v27  ;;  %v4928_v27 = vld [vmem:[%s7269_s7 + $0xec] ss:$16 sps:$4 sm:$0xff]  }
 0xd3d   :  { %3027 = vadd.xlane.f32.xlu0 %v3016_v62  ;;  %3025 = vadd.xlane.f32.xlu1 %v3015_v47 }
 0xd3e   :  { %4236 = vmatpush3.bf16.msra.mxu1 %v7450_v13 }
 0xd3f   :  { %4237 = vmatprep.subr.bf16.mxu1 %v7451_v52 }
 0xd41   :  { %3031 = vadd.xlane.f32.xlu0 %v3018_v46  ;;  %3029 = vadd.xlane.f32.xlu1 %v3017_v21 }
 0xd42   :  { %4238 = vmatpush3.bf16.msra.mxu1 %v7452_v6 }
 0xd43   :  { %4239 = vmatprep.subr.bf16.mxu1 %v7453_v61 }
 0xd45   :  { %3035 = vadd.xlane.f32.xlu0 %v3020_v56  ;;  %3033 = vadd.xlane.f32.xlu1 %v3019_v23 }
 0xd46   :  { %4240 = vmatpush3.bf16.msra.mxu1 %v7454_v1 }
 0xd47   :  { %4241 = vmatprep.subr.bf16.mxu1 %v7455_v54 }
 0xd4a   :  { %4242 = vmatpush3.bf16.msra.mxu1 %v7456_v9 }
 0xd4b   :  { %4243 = vmatprep.subr.bf16.mxu1 %v7457_v2 }
 0xd4e   :  { %4244 = vmatpush3.bf16.msra.mxu1 %v7458_v10 }
 0xd4f   :  { %4245 = vmatprep.subr.bf16.mxu1 %v7459_v15 }
 0xd52   :  { %4246 = vmatpush3.bf16.msra.mxu1 %v7460_v3 }
 0xd53   :  { %4247 = vmatprep.subr.bf16.mxu1 %v7461_v37 }
 0xd56   :  { %4248 = vmatpush3.bf16.msra.mxu1 %v7462_v19 }
 0xd57   :  { %3444 = vmatprep.subr.bf16.mxu1 %v4928_v27 }
 0xdc2   :  { %v3024_v13 = vpop.xlane.xlu0 %3023  ;;  %v3022_v52 = vpop.xlane.xlu1 %3021 }
 0xdc6   :  { %v3028_v6 = vpop.xlane.xlu0 %3027  ;;  %v3026_v61 = vpop.xlane.xlu1 %3025 }
 0xdca   :  { %v3032_v1 = vpop.xlane.xlu0 %3031  ;;  %v3030_v54 = vpop.xlane.xlu1 %3029 }
 0xdcb   :  { %v3038_v9 = vmax.f32 %v3024_v13, %v3032_v1  ;;  %v3037_v2 = vmax.f32 %v3022_v52, %v3030_v54 }
 0xdcd   :  { %v3041_v37 = vmax.f32 %v3037_v2, %v3038_v9 }
 0xdce   :  { %v3036_v10 = vpop.xlane.xlu0 %3035  ;;  %v3034_v15 = vpop.xlane.xlu1 %3033 }
 0xdcf   :  { %v3040_v3 = vmax.f32 %v3028_v6, %v3036_v10  ;;  %v3039_v20 = vmax.f32 %v3026_v61, %v3034_v15 }
 0xdd1   :  { %v3042_v25 = vmax.f32 %v3039_v20, %v3040_v3 }
 0xdd3   :  { %v3043_v19 = vmax.f32 %v3041_v37, %v3042_v25 }
 0xdd5   :  { %v3044_v40 = vsub.f32 %v3022_v52, %v3043_v19  ;;  %v3045_v28 = vsub.f32 %v3024_v13, %v3043_v19  ;;  %v3046_v11 = vsub.f32 %v3026_v61, %v3043_v19  ;;  %v3047_v31 = vsub.f32 %v3028_v6, %v3043_v19 }
 0xdd6   :  { %v3048_v33 = vsub.f32 %v3030_v54, %v3043_v19  ;;  %v3049_v57 = vsub.f32 %v3032_v1, %v3043_v19  ;;  %v3050_v62 = vsub.f32 %v3034_v15, %v3043_v19  ;;  %v3051_v46 = vsub.f32 %v3036_v10, %v3043_v19 }
 0xdd7   :  { %v3052_v35 = vmul.f32 1.442695, %v3044_v40  ;;  %v3054_v22 = vmul.f32 1.442695, %v3045_v28  ;;  %v3056_v4 = vmul.f32 1.442695, %v3046_v11 }
 0xdd8   :  { %v3058_v24 = vmul.f32 1.442695, %v3047_v31  ;;  %v3060_v47 = vmul.f32 1.442695, %v3048_v33  ;;  %v3062_v21 = vmul.f32 1.442695, %v3049_v57 }
 0xdd9   :  { %4753 = vpow2.f32 %v3052_v35  ;;  %v3064_v56 = vmul.f32 1.442695, %v3050_v62  ;;  %v3066_v23 = vmul.f32 1.442695, %v3051_v46  ;;  %v7481_v40 = vld [vmem:[#allocation43_spill] sm:$0xff]  ;;  %v7482_v31 = vld [vmem:[#allocation45_spill] sm:$0xff] }
 0xdda   :  { %4755 = vpow2.f32 %v3054_v22 }
 0xddb   :  { %4757 = vpow2.f32 %v3056_v4 }
 0xddc   :  { %4759 = vpow2.f32 %v3058_v24 }
 0xddd   :  { %4761 = vpow2.f32 %v3060_v47 }
 0xdde   :  { %4763 = vpow2.f32 %v3062_v21 }
 0xddf   :  { %4765 = vpow2.f32 %v3064_v56 }
 0xde0   :  { %4767 = vpow2.f32 %v3066_v23 }
 0xde6   :  { %v4754_v27 = vpop.eup %4753 }
 0xde7   :  { %v4756_v13 = vpop.eup %4755 }
 0xde8   :  { %v3068_v52 = vadd.f32 %v4756_v13, %v4754_v27  ;;  %v4758_v6 = vpop.eup %4757 }
 0xde9   :  { %v4760_v1 = vpop.eup %4759 }
 0xdea   :  { %v3069_v61 = vadd.f32 %v4758_v6, %v3068_v52  ;;  %v4762_v9 = vpop.eup %4761 }
 0xdeb   :  { %v4764_v15 = vpop.eup %4763 }
 0xdec   :  { %v3070_v54 = vadd.f32 %v4760_v1, %v3069_v61  ;;  %v4766_v10 = vpop.eup %4765 }
 0xded   :  { %v4768_v37 = vpop.eup %4767 }
 0xdee   :  { %v3071_v2 = vadd.f32 %v4762_v9, %v3070_v54 }
 0xdf0   :  { %v3072_v3 = vadd.f32 %v4764_v15, %v3071_v2 }
 0xdf2   :  { %v3073_v20 = vadd.f32 %v4766_v10, %v3072_v3 }
 0xdf4   :  { %v3074_v25 = vadd.f32 %v4768_v37, %v3073_v20 }
 0xdf6   :  { %4769 = vrcp.f32 %v3074_v25 }
 0xdf8   :  { %v3183_v19 = vpop.f32.mrf.mxu1 }
 0xdf9   :  { %v6939_v28 = vadd.f32 %v3183_v19, %v7481_v40 }
 0xdfa   :  { %v3185_v11 = vpop.f32.mrf.mxu1 }
 0xdfb   :  { %v6942_v35 = vadd.f32 %v3185_v11, %v7482_v31 }
 0xdfc   :  { %v3187_v22 = vpop.f32.mrf.mxu1 }
 0xdfd   :  { %v7489_v22 = vld [vmem:[#allocation37_spill] sm:$0xff] }
 0xdfe   :  { %v3188_v33 = vpop.f32.mrf.mxu1 }
 0xe03   :  { %v4770_v4 = vpop.eup %4769 }
 0xe04   :  { %v3076_v57 = vmul.f32 %v4770_v4, %v4754_v27  ;;  %v3077_v24 = vmul.f32 %v4770_v4, %v4756_v13  ;;  %v3078_v62 = vmul.f32 %v4770_v4, %v4758_v6  ;;  %v3079_v47 = vmul.f32 %v4770_v4, %v4760_v1 }
 0xe05   :  { %v3080_v56 = vmul.f32 %v4770_v4, %v4762_v9  ;;  %v3081_v61 = vmul.f32 %v4770_v4, %v4764_v15  ;;  %v3082_v3 = vmul.f32 %v4770_v4, %v4766_v10  ;;  %v3083_v27 = vmul.f32 %v4770_v4, %v4768_v37  ;;  %v7483_v15 = vld [vmem:[#allocation28_spill] sm:$0xff]  ;;  %v7484_v10 = vld [vmem:[#allocation31_spill] sm:$0xff]  ;;  %v7485_v37 = vld [vmem:[#allocation33_spill] sm:$0xff] }
 0xe06   :  { %v3084_v46 = vmul.f32 %v3076_v57, %v5698_v38  ;;  %v3085_v21 = vmul.f32 %v3077_v24, %v6443_v63  ;;  %v3086_v23 = vmul.f32 %v3078_v62, %v6453_v42  ;;  %v3087_v54 = vmul.f32 %v3079_v47, %v6463_v51 }
 0xe07   :  { %v3088_v20 = vmul.f32 %v3080_v56, %v6457_v50  ;;  %v3089_v13 = vmul.f32 %v3081_v61, %v6473_v41  ;;  %v3090_v1 = vmul.f32 %v3082_v3, %v6467_v49  ;;  %v3091_v9 = vmul.f32 %v3083_v27, %v6478_v18 }
 0xe08   :  { %v3092_v52 = vadd.f32 %v3085_v21, %v3084_v46  ;;  %v4153_v47 = vmul.f32 -1.442695, %v6942_v35  ;;  %v4152_v46 = vmul.f32 -1.442695, %v6939_v28 }
 0xe0a   :  { %v3093_v2 = vadd.f32 %v3092_v52, %v3086_v23  ;;  %4771 = vpow2.f32 %v4153_v47 }
 0xe0b   :  { %4773 = vpow2.f32 %v4152_v46  ;;  %v4935_v46 = vld [vmem:[%s7270_s9 + $0x60] sm:$0xff]  }
 0xe0c   :  { %v3094_v25 = vadd.f32 %v3093_v2, %v3087_v54  ;;  %v7493_v54 = vld [vmem:[#allocation44_spill] sm:$0xff] }
 0xe0e   :  { %v3095_v6 = vadd.f32 %v3094_v25, %v3088_v20  ;;  %v7494_v20 = vld [vmem:[#allocation46_spill] sm:$0xff] }
 0xe10   :  { %v3096_v19 = vadd.f32 %v3095_v6, %v3089_v13 }
 0xe12   :  { %v3097_v40 = vadd.f32 %v3096_v19, %v3090_v1 }
 0xe14   :  { %v3098_v11 = vadd.f32 %v3097_v40, %v3091_v9 }
 0xe16   :  { %v3099_v31 = vpack.c.bf16 %v3098_v11, %v3098_v11 }
 0xe17   :  { %v4772_v21 = vpop.eup %4771 }
 0xe18   :  { %3134 = vmatmul.mubr.bf16.vlgmr.msra.gmra.mxu0 %v3099_v31  ;;  %v4774_v56 = vpop.eup %4773  ;;  %v3244_v23 = vadd.f32 1.0, %v4772_v21  ;;  %v4936_v21 = vld [vmem:[%s7270_s9 + $0x20] sm:$0xff]  }
 0xe19   :  { %3191 = vmatpush1.bf16.msra.mxu0 %v6699_v29  ;;  %3222 = vmatprep.mubr.bf16.mxu0 %v7385_v30  ;;  %v3238_v52 = vadd.f32 1.0, %v4774_v56  ;;  %v4937_v56 = vld [vmem:[%s7270_s9 + $0x58] sm:$0xff]  }
 0xe1a   :  { %3192 = vmatprep.subr.bf16.mxu0 %v6706_v32  ;;  %4775 = vrcp.f32 %v3244_v23  ;;  %v4938_v23 = vld [vmem:[%s7270_s9 + $0x18] sm:$0xff]  }
 0xe1b   :  { %4777 = vrcp.f32 %v3238_v52  ;;  %v4939_v52 = vld [vmem:[%s7270_s9 + $0x50] sm:$0xff]  }
 0xe1d   :  { %3193 = vmatpush1.bf16.msra.mxu0 %v6712_v34 }
 0xe1e   :  { %3194 = vmatprep.subr.bf16.mxu0 %v6718_v36 }
 0xe21   :  { %3195 = vmatpush1.bf16.msra.mxu0 %v6724_v39 }
 0xe22   :  { %3196 = vmatprep.subr.bf16.mxu0 %v6730_v43 }
 0xe25   :  { %3197 = vmatpush1.bf16.msra.mxu0 %v6736_v45 }
 0xe26   :  { %3198 = vmatprep.subr.bf16.mxu0 %v6742_v7 }
 0xe27   :  { %v4776_v28 = vpop.eup %4775 }
 0xe28   :  { %v4778_v6 = vpop.eup %4777  ;;  %v3254_v19 = vmul.f32 %v4776_v28, %v6905_v53  ;;  %v4930_v53 = vld [vmem:[%s7270_s9 + $0x38] sm:$0xff]  }
 0xe29   :  { %3199 = vmatpush1.bf16.msra.mxu0 %v6748_v12 }
 0xe2a   :  { %3200 = vmatprep.subr.bf16.mxu0 %v6754_v44 }
 0xe2d   :  { %3201 = vmatpush1.bf16.msra.mxu0 %v6760_v0 }
 0xe2e   :  { %3202 = vmatprep.subr.bf16.mxu0 %v6766_v60 }
 0xe31   :  { %3203 = vmatpush1.bf16.msra.mxu0 %v6772_v55 }
 0xe32   :  { %3204 = vmatprep.subr.bf16.mxu0 %v6778_v5 }
 0xe35   :  { %3205 = vmatpush1.bf16.msra.mxu0 %v6784_v26 }
 0xe36   :  { %3403 = vmatprep.subr.bf16.mxu0 %v6790_v14  ;;  %v7486_v14 = vld [vmem:[#allocation34_spill] sm:$0xff] }
 0xe38   :  { %3223 = vmatmul.mubr.bf16.vlgmr.msra.gmra.mxu0 %v6908_v16  ;;  %v7487_v16 = vld [vmem:[#allocation32_spill] sm:$0xff] }
 0xe39   :  { %3404 = vmatpush1.bf16.msra.mxu0 %v6797_v17  ;;  %3435 = vmatprep.mubr.bf16.mxu0 %v7385_v30  ;;  %v7488_v17 = vld [vmem:[#allocation35_spill] sm:$0xff] }
 0xe3a   :  { %3405 = vmatprep.subr.bf16.mxu0 %v6804_v59  ;;  %v7490_v59 = vld [vmem:[#allocation10_spill] sm:$0xff] }
 0xe3d   :  { %3406 = vmatpush1.bf16.msra.mxu0 %v6810_v8  ;;  %v7491_v8 = vld [vmem:[#allocation8_spill] sm:$0xff] }
 0xe3e   :  { %3407 = vmatprep.subr.bf16.mxu0 %v6816_v58  ;;  %v7492_v58 = vld [vmem:[#allocation11_spill] sm:$0xff] }
 0xe41   :  { %3408 = vmatpush1.bf16.msra.mxu0 %v6822_v48  ;;  %v4929_v48 = vld [vmem:[%s7270_s9 + $0x78] sm:$0xff]  }
 0xe42   :  { %3409 = vmatprep.subr.bf16.mxu0 %v7483_v15 }
 0xe45   :  { %3410 = vmatpush1.bf16.msra.mxu0 %v7484_v10 }
 0xe46   :  { %3411 = vmatprep.subr.bf16.mxu0 %v7485_v37 }
 0xe49   :  { %3412 = vmatpush1.bf16.msra.mxu0 %v7486_v14 }
 0xe4a   :  { %3413 = vmatprep.subr.bf16.mxu0 %v7487_v16 }
 0xe4d   :  { %3414 = vmatpush1.bf16.msra.mxu0 %v7488_v17 }
 0xe4e   :  { %3415 = vmatprep.subr.bf16.mxu0 %v7489_v22 }
 0xe51   :  { %3416 = vmatpush1.bf16.msra.mxu0 %v7490_v59 }
 0xe52   :  { %3417 = vmatprep.subr.bf16.mxu0 %v7491_v8  ;;  %v4931_v8 = vld [vmem:[%s7270_s9 + $0x70] sm:$0xff]  }
 0xe55   :  { %3418 = vmatpush1.bf16.msra.mxu0 %v7492_v58  ;;  %v4932_v58 = vld [vmem:[%s7270_s9 + $0x30] sm:$0xff]  }
 0xe56   :  { %4255 = vmatprep.subr.bf16.mxu0 %v4929_v48 }
 0xed8   :  { %v4227_v33 = vpop.f32.mrf.mxu0 }
 0xeda   :  { %v4228_v4 = vpop.f32.mrf.mxu0 }
 0xedb   :  { %v6989_v57 = vadd.f32 %v4228_v4, %v4227_v33  ;;  %v4933_v4 = vld [vmem:[%s7270_s9 + $0x68] sm:$0xff]  }
 0xedc   :  { %v4230_v24 = vpop.f32.mrf.mxu0 }
 0xedd   :  { %v4934_v24 = vld [vmem:[%s7270_s9 + $0x28] sm:$0xff]  }
 0xede   :  { %v4231_v62 = vpop.f32.mrf.mxu0 }
 0xef8   :  { %v3224_v61 = vpop.f32.mrf.mxu0 }
 0xef9   :  { %v3233_v2 = vadd.f32 %v3224_v61, %v7493_v54  ;;  %v4940_v61 = vld [vmem:[%s7270_s9 + $0x10] sm:$0xff]   ;;  %v4941_v54 = vld [vmem:[%s7270_s9 + $0x48] sm:$0xff]  }
 0xefa   :  { %v3226_v3 = vpop.f32.mrf.mxu0 }
 0xefb   :  { %4779 = vtanh.f32 %v3233_v2  ;;  %v3234_v25 = vadd.f32 %v3226_v3, %v7494_v20  ;;  %v4942_v2 = vld [vmem:[%s7270_s9 + $0x8] sm:$0xff]   ;;  %v4943_v3 = vld [vmem:[%s7270_s9 + $0x40] sm:$0xff]  }
 0xefc   :  { %v3228_v27 = vpop.f32.mrf.mxu0  ;;  %v4944_v20 = vld [vmem:[%s7270_s9] sm:$0xff]  }
 0xefd   :  { %v4154_v13 = vmul.f32 -1.442695, %v3234_v25 }
 0xefe   :  { %v3229_v35 = vpop.f32.mrf.mxu0 }
 0xeff   :  { %4781 = vpow2.f32 %v4154_v13 }
 0xf08   :  { %v4780_v1 = vpop.eup %4779 }
 0xf09   :  { %v3255_v9 = vmul.f32 %v4780_v1, %v4778_v6 }
 0xf0b   :  { %v6996_v40 = vadd.f32 %v3255_v9, %v3254_v19 }
 0xf0c   :  { %v4782_v11 = vpop.eup %4781 }
 0xf0d   :  { %v3251_v31 = vadd.f32 1.0, %v4782_v11  ;;  %4783 = vtanh.f32 %v6996_v40 }
 0xf0f   :  { %4785 = vrcp.f32 %v3251_v31 }
 0xf1a   :  { %v4784_v15 = vpop.eup %4783 }
 0xf1c   :  { %v4786_v10 = vpop.eup %4785 }
 0xf1d   :  { %v3258_v37 = vmul.f32 %v4786_v10, %v4784_v15 }
 0xf1f   :  { %v6999_v14 = vpack.c.bf16 %v3258_v37, %v3258_v37  ;;  %v3268_v16 = vmul.f32 %v3258_v37, %v6443_v63  ;;  %v3267_v17 = vmul.f32 %v3258_v37, %v5698_v38  ;;  %v3270_v22 = vmul.f32 %v3258_v37, %v6463_v51 }
 0xf20   :  { %v3269_v59 = vmul.f32 %v3258_v37, %v6453_v42  ;;  %v3272_v48 = vmul.f32 %v3258_v37, %v6473_v41  ;;  %v3271_v33 = vmul.f32 %v3258_v37, %v6457_v50  ;;  %v3274_v62 = vmul.f32 %v3258_v37, %v6478_v18 }
 0xf21   :  { %3387 = vmatprep.mubr.bf16.mxu1 %v6999_v14  ;;  %3436 = vmatmul.mubr.bf16.vlgmr.msra.gmra.mxu0 %v6999_v14  ;;  %v3273_v47 = vmul.f32 %v3258_v37, %v6467_v49 }
 0xf22   :  { %3277 = vadd.xlane.f32.xlu0 %v3268_v16  ;;  %3275 = vadd.xlane.f32.xlu1 %v3267_v17 }
 0xf23   :  { %4256 = vmatpush3.bf16.msra.mxu0 %v4930_v53 }
 0xf24   :  { %4257 = vmatprep.subr.bf16.mxu0 %v4931_v8 }
 0xf26   :  { %3281 = vadd.xlane.f32.xlu0 %v3270_v22  ;;  %3279 = vadd.xlane.f32.xlu1 %v3269_v59 }
 0xf27   :  { %4258 = vmatpush3.bf16.msra.mxu0 %v4932_v58 }
 0xf28   :  { %4259 = vmatprep.subr.bf16.mxu0 %v4933_v4 }
 0xf2a   :  { %3285 = vadd.xlane.f32.xlu0 %v3272_v48  ;;  %3283 = vadd.xlane.f32.xlu1 %v3271_v33 }
 0xf2b   :  { %4260 = vmatpush3.bf16.msra.mxu0 %v4934_v24 }
 0xf2c   :  { %4261 = vmatprep.subr.bf16.mxu0 %v4935_v46 }
 0xf2e   :  { %3289 = vadd.xlane.f32.xlu0 %v3274_v62  ;;  %3287 = vadd.xlane.f32.xlu1 %v3273_v47 }
 0xf2f   :  { %4262 = vmatpush3.bf16.msra.mxu0 %v4936_v21 }
 0xf30   :  { %4263 = vmatprep.subr.bf16.mxu0 %v4937_v56 }
 0xf33   :  { %4264 = vmatpush3.bf16.msra.mxu0 %v4938_v23 }
 0xf34   :  { %4265 = vmatprep.subr.bf16.mxu0 %v4939_v52 }
 0xf37   :  { %4266 = vmatpush3.bf16.msra.mxu0 %v4940_v61 }
 0xf38   :  { %4267 = vmatprep.subr.bf16.mxu0 %v4941_v54 }
 0xf3b   :  { %4268 = vmatpush3.bf16.msra.mxu0 %v4942_v2 }
 0xf3c   :  { %4269 = vmatprep.subr.bf16.mxu0 %v4943_v3 }
 0xf3f   :  { %4270 = vmatpush3.bf16.msra.mxu0 %v4944_v20 }
 0xfab   :  { %v3278_v25 = vpop.xlane.xlu0 %3277  ;;  %v3276_v27 = vpop.xlane.xlu1 %3275 }
 0xfaf   :  { %v3282_v13 = vpop.xlane.xlu0 %3281  ;;  %v3280_v35 = vpop.xlane.xlu1 %3279 }
 0xfb3   :  { %v3286_v28 = vpop.xlane.xlu0 %3285  ;;  %v3284_v6 = vpop.xlane.xlu1 %3283 }
 0xfb4   :  { %v3292_v1 = vmax.f32 %v3278_v25, %v3286_v28  ;;  %v3291_v19 = vmax.f32 %v3276_v27, %v3284_v6 }
 0xfb6   :  { %v3295_v10 = vmax.f32 %v3291_v19, %v3292_v1 }
 0xfb7   :  { %v3290_v9 = vpop.xlane.xlu0 %3289  ;;  %v3288_v11 = vpop.xlane.xlu1 %3287 }
 0xfb8   :  { %v3294_v31 = vmax.f32 %v3282_v13, %v3290_v9  ;;  %v3293_v15 = vmax.f32 %v3280_v35, %v3288_v11 }
 0xfba   :  { %v3296_v37 = vmax.f32 %v3293_v15, %v3294_v31  ;;  %v7495_v31 = vld [vmem:[#allocation47_spill] sm:$0xff] }
 0xfbc   :  { %v3297_v16 = vmax.f32 %v3295_v10, %v3296_v37  ;;  %v7496_v37 = vld [vmem:[#allocation49_spill] sm:$0xff] }
 0xfbe   :  { %v3298_v17 = vsub.f32 %v3276_v27, %v3297_v16  ;;  %v3299_v53 = vsub.f32 %v3278_v25, %v3297_v16  ;;  %v3300_v22 = vsub.f32 %v3280_v35, %v3297_v16  ;;  %v3301_v59 = vsub.f32 %v3282_v13, %v3297_v16 }
 0xfbf   :  { %v3302_v48 = vsub.f32 %v3284_v6, %v3297_v16  ;;  %v3303_v4 = vsub.f32 %v3286_v28, %v3297_v16  ;;  %v3304_v62 = vsub.f32 %v3288_v11, %v3297_v16  ;;  %v3305_v46 = vsub.f32 %v3290_v9, %v3297_v16 }
 0xfc0   :  { %v3306_v8 = vmul.f32 1.442695, %v3298_v17  ;;  %v3308_v58 = vmul.f32 1.442695, %v3299_v53  ;;  %v3310_v33 = vmul.f32 1.442695, %v3300_v22 }
 0xfc1   :  { %v3312_v24 = vmul.f32 1.442695, %v3301_v59  ;;  %v3314_v47 = vmul.f32 1.442695, %v3302_v48  ;;  %v3316_v21 = vmul.f32 1.442695, %v3303_v4 }
 0xfc2   :  { %4787 = vpow2.f32 %v3306_v8  ;;  %v3318_v56 = vmul.f32 1.442695, %v3304_v62  ;;  %v3320_v23 = vmul.f32 1.442695, %v3305_v46 }
 0xfc3   :  { %4789 = vpow2.f32 %v3308_v58 }
 0xfc4   :  { %4791 = vpow2.f32 %v3310_v33 }
 0xfc5   :  { %4793 = vpow2.f32 %v3312_v24 }
 0xfc6   :  { %4795 = vpow2.f32 %v3314_v47 }
 0xfc7   :  { %4797 = vpow2.f32 %v3316_v21 }
 0xfc8   :  { %4799 = vpow2.f32 %v3318_v56 }
 0xfc9   :  { %4801 = vpow2.f32 %v3320_v23 }
 0xfcf   :  { %v4788_v52 = vpop.eup %4787 }
 0xfd0   :  { %v4790_v61 = vpop.eup %4789 }
 0xfd1   :  { %v3322_v54 = vadd.f32 %v4790_v61, %v4788_v52  ;;  %v4792_v2 = vpop.eup %4791 }
 0xfd2   :  { %v4794_v20 = vpop.eup %4793 }
 0xfd3   :  { %v3323_v3 = vadd.f32 %v4792_v2, %v3322_v54  ;;  %v4796_v27 = vpop.eup %4795 }
 0xfd4   :  { %v4798_v35 = vpop.eup %4797 }
 0xfd5   :  { %v3324_v25 = vadd.f32 %v4794_v20, %v3323_v3  ;;  %v4800_v6 = vpop.eup %4799 }
 0xfd6   :  { %v4802_v19 = vpop.eup %4801 }
 0xfd7   :  { %v3325_v13 = vadd.f32 %v4796_v27, %v3324_v25 }
 0xfd9   :  { %v3326_v28 = vadd.f32 %v4798_v35, %v3325_v13 }
 0xfdb   :  { %v3327_v1 = vadd.f32 %v4800_v6, %v3326_v28 }
 0xfdd   :  { %v3328_v9 = vadd.f32 %v4802_v19, %v3327_v1 }
 0xfdf   :  { %4803 = vrcp.f32 %v3328_v9 }
 0xfe1   :  { %v3437_v11 = vpop.f32.mrf.mxu0 }
 0xfe2   :  { %v7057_v15 = vadd.f32 %v3437_v11, %v7495_v31 }
 0xfe3   :  { %v3439_v10 = vpop.f32.mrf.mxu0 }
 0xfe4   :  { %v7060_v16 = vadd.f32 %v3439_v10, %v7496_v37  ;;  %v4155_v11 = vmul.f32 -1.442695, %v7057_v15  ;;  %v7502_v15 = vld [vmem:[#allocation50_spill] sm:$0xff] }
 0xfe5   :  { %v3441_v17 = vpop.f32.mrf.mxu0 }
 0xfe6   :  { %v4156_v9 = vmul.f32 -1.442695, %v7060_v16 }
 0xfe7   :  { %v3442_v53 = vpop.f32.mrf.mxu0 }
 0xfec   :  { %v4804_v22 = vpop.eup %4803 }
 0xfed   :  { %v3330_v59 = vmul.f32 %v4804_v22, %v4788_v52  ;;  %v3331_v8 = vmul.f32 %v4804_v22, %v4790_v61  ;;  %v3332_v58 = vmul.f32 %v4804_v22, %v4792_v2  ;;  %v3333_v48 = vmul.f32 %v4804_v22, %v4794_v20 }
 0xfee   :  { %v3334_v24 = vmul.f32 %v4804_v22, %v4796_v27  ;;  %v3335_v46 = vmul.f32 %v4804_v22, %v4798_v35  ;;  %v3336_v23 = vmul.f32 %v4804_v22, %v4800_v6  ;;  %v3337_v52 = vmul.f32 %v4804_v22, %v4802_v19 }
 0xfef   :  { %v3338_v33 = vmul.f32 %v3330_v59, %v5698_v38  ;;  %v3339_v4 = vmul.f32 %v3331_v8, %v6443_v63  ;;  %v3340_v62 = vmul.f32 %v3332_v58, %v6453_v42  ;;  %v3341_v21 = vmul.f32 %v3333_v48, %v6463_v51  ;;  %v7501_v8 = vld [vmem:[#allocation48_spill] sm:$0xff] }
 0xff0   :  { %v3342_v54 = vmul.f32 %v3334_v24, %v6457_v50  ;;  %v3343_v61 = vmul.f32 %v3335_v46, %v6473_v41  ;;  %v3344_v20 = vmul.f32 %v3336_v23, %v6467_v49  ;;  %v3345_v27 = vmul.f32 %v3337_v52, %v6478_v18 }
 0xff1   :  { %v3346_v47 = vadd.f32 %v3339_v4, %v3338_v33 }
 0xff3   :  { %v3347_v56 = vadd.f32 %v3346_v47, %v3340_v62 }
 0xff5   :  { %v3348_v3 = vadd.f32 %v3347_v56, %v3341_v21 }
 0xff7   :  { %v3349_v2 = vadd.f32 %v3348_v3, %v3342_v54 }
 0xff9   :  { %v3350_v25 = vadd.f32 %v3349_v2, %v3343_v61 }
 0xffb   :  { %v3351_v13 = vadd.f32 %v3350_v25, %v3344_v20 }
 0xffd   :  { %v3352_v28 = vadd.f32 %v3351_v13, %v3345_v27 }
 0xfff   :  { %v3353_v1 = vpack.c.bf16 %v3352_v28, %v3352_v28 }
0x1001   :  { %3388 = vmatmul.mubr.bf16.vlgmr.msra.gmra.mxu1 %v3353_v1 }
0x1002   :  { %3445 = vmatpush1.bf16.msra.mxu1 %v6699_v29  ;;  %3476 = vmatprep.mubr.bf16.mxu1 %v7385_v30  ;;  %v4529_v30 = vld [vmem:[%s7272_s11 + $0x38] sm:$0xff]   ;;  %v4947_v29 = vmov 0.0  }
0x1003   :  { %3446 = vmatprep.subr.bf16.mxu1 %v6706_v32  ;;  %v4530_v32 = vld [vmem:[%s7272_s11 + $0x30] sm:$0xff]  }
0x1006   :  { %3447 = vmatpush1.bf16.msra.mxu1 %v6712_v34  ;;  %v4531_v34 = vld [vmem:[%s7272_s11 + $0x28] sm:$0xff]  }
0x1007   :  { %3448 = vmatprep.subr.bf16.mxu1 %v6718_v36  ;;  %v4532_v36 = vld [vmem:[%s7272_s11 + $0x20] sm:$0xff]  }
0x100a   :  { %3449 = vmatpush1.bf16.msra.mxu1 %v6724_v39  ;;  %v4533_v39 = vld [vmem:[%s7272_s11 + $0x18] sm:$0xff]  }
0x100b   :  { %3450 = vmatprep.subr.bf16.mxu1 %v6730_v43  ;;  %v4534_v43 = vld [vmem:[%s7272_s11 + $0x10] sm:$0xff]  }
0x100e   :  { %3451 = vmatpush1.bf16.msra.mxu1 %v6736_v45  ;;  %v4535_v45 = vld [vmem:[%s7272_s11 + $0x8] sm:$0xff]  }
0x100f   :  { %3452 = vmatprep.subr.bf16.mxu1 %v6742_v7  ;;  %v4536_v7 = vld [vmem:[%s7272_s11] sm:$0xff]  }
0x1012   :  { %3453 = vmatpush1.bf16.msra.mxu1 %v6748_v12  ;;  %v7497_v12 = vld [vmem:[#allocation13_spill] sm:$0xff] }
0x1013   :  { %3454 = vmatprep.subr.bf16.mxu1 %v6754_v44  ;;  %v7498_v44 = vld [vmem:[#allocation7_spill] sm:$0xff] }
0x1016   :  { %3455 = vmatpush1.bf16.msra.mxu1 %v6760_v0  ;;  %v7499_v0 = vpack.c.bf16 %v7497_v12, %v7498_v44 }
0x1017   :  { %3456 = vmatprep.subr.bf16.mxu1 %v6766_v60 }
0x101a   :  { %3457 = vmatpush1.bf16.msra.mxu1 %v6772_v55  ;;  %v7500_v55 = vld [vmem:[#allocation14_spill] sm:$0xff] }
0x101b   :  { %3458 = vmatprep.subr.bf16.mxu1 %v6778_v5  ;;  %v3136_v5 = vadd.f32 %v6989_v57, %v7500_v55 }
0x101d   :  { %4805 = vtanh.f32 %v3136_v5 }
0x101e   :  { %3459 = vmatpush1.bf16.msra.mxu1 %v6784_v26 }
0x101f   :  { %4288 = vmatprep.subr.bf16.mxu1 %v4947_v29 }
0x1021   :  { %3477 = vmatmul.mubr.bf16.vlgmr.msra.gmra.mxu1 %v6999_v14 }
0x1022   :  { %4289 = vmatpush3.bf16.msra.mxu1 %v4529_v30  ;;  %4304 = vmatprep.mubr.msk.bf16.mxu1 %vm4948_vm0, %v4947_v29 }
0x1023   :  { %4290 = vmatprep.subr.bf16.mxu1 %v4947_v29 }
0x1026   :  { %4291 = vmatpush3.bf16.msra.mxu1 %v4530_v32 }
0x1027   :  { %4292 = vmatprep.subr.bf16.mxu1 %v4947_v29 }
0x102a   :  { %4293 = vmatpush3.bf16.msra.mxu1 %v4531_v34  ;;  %v4806_v31 = vpop.eup %4805 }
0x102b   :  { %4294 = vmatprep.subr.bf16.mxu1 %v4947_v29 }
0x102e   :  { %4295 = vmatpush3.bf16.msra.mxu1 %v4532_v36 }
0x102f   :  { %4296 = vmatprep.subr.bf16.mxu1 %v4947_v29 }
0x1032   :  { %4297 = vmatpush3.bf16.msra.mxu1 %v4533_v39 }
0x1033   :  { %4298 = vmatprep.subr.bf16.mxu1 %v4947_v29 }
0x1036   :  { %4299 = vmatpush3.bf16.msra.mxu1 %v4534_v43  ;;  %v7136_v43 = vld [vmem:[%s7273_s12] ss:$0 sm:$0xff] }
0x1037   :  { %4300 = vmatprep.subr.bf16.mxu1 %v4947_v29 }
0x103a   :  { %4301 = vmatpush3.bf16.msra.mxu1 %v4535_v45 }
0x103b   :  { %4302 = vmatprep.subr.bf16.mxu1 %v4947_v29 }
0x103e   :  { %4303 = vmatpush3.bf16.msra.mxu1 %v4536_v7 }
0x1041   :  { %4305 = vmatmul.mubr.bf16.vlgmr.msra.gmra.mxu1 %v7499_v0 }
0x1042   :  { %4308 = vmatprep.mubr.msk.bf16.mxu1 %vm4948_vm0, %v4947_v29 }
0x10c1   :  { %v4249_v60 = vpop.f32.mrf.mxu1 }
0x10c3   :  { %v4250_v26 = vpop.f32.mrf.mxu1 }
0x10c4   :  { %v4251_v14 = vadd.f32 %v4250_v26, %v4249_v60 }
0x10c5   :  { %v4252_v35 = vpop.f32.mrf.mxu1 }
0x10c6   :  { %v3390_v6 = vadd.f32 %v4251_v14, %v7500_v55 }
0x10c7   :  { %v4253_v19 = vpop.f32.mrf.mxu1 }
0x10c8   :  { %4807 = vtanh.f32 %v3390_v6 }
0x10c9   :  { %4809 = vpow2.f32 %v4156_v9 }
0x10ca   :  { %4811 = vpow2.f32 %v4155_v11 }
0x10d5   :  { %v4808_v10 = vpop.eup %4807 }
0x10d6   :  { %v3658_v37 = vpack.c.bf16 %v4808_v10, %v4806_v31  ;;  %v4810_v57 = vpop.eup %4809 }
0x10d7   :  { %v4812_v17 = vpop.eup %4811  ;;  %v3498_v53 = vadd.f32 1.0, %v4810_v57 }
0x10d8   :  { %4309 = vmatmul.mubr.bf16.gmra.mxu1 %v3658_v37  ;;  %v3492_v22 = vadd.f32 1.0, %v4812_v17 }
0x10d9   :  { %4312 = vmatprep.mubr.msk.bf16.mxu1 %vm4948_vm0, %v4947_v29  ;;  %4813 = vrcp.f32 %v3498_v53 }
0x10da   :  { %4815 = vrcp.f32 %v3492_v22 }
0x10e1   :  { %v3478_v59 = vpop.f32.mrf.mxu1 }
0x10e2   :  { %v3487_v58 = vadd.f32 %v3478_v59, %v7501_v8 }
0x10e3   :  { %v3480_v16 = vpop.f32.mrf.mxu1 }
0x10e4   :  { %4817 = vtanh.f32 %v3487_v58  ;;  %v3488_v48 = vadd.f32 %v3480_v16, %v7502_v15  ;;  %v7503_v58 = vlaneseq }
0x10e5   :  { %v3482_v33 = vpop.f32.mrf.mxu1 }
0x10e6   :  { %v4157_v4 = vmul.f32 -1.442695, %v3488_v48  ;;  %v4814_v62 = vpop.eup %4813  ;;  %v7157_v16 = vand.u32 127, %v7503_v58 }
0x10e7   :  { %v3483_v24 = vpop.f32.mrf.mxu1  ;;  %v4816_v47 = vpop.eup %4815  ;;  %v3508_v21 = vmul.f32 %v4814_v62, %v6996_v40 }
0x10e8   :  { %4819 = vpow2.f32 %v4157_v4 }
0x10f1   :  { %v4818_v46 = vpop.eup %4817 }
0x10f2   :  { %v3509_v56 = vmul.f32 %v4818_v46, %v4816_v47 }
0x10f4   :  { %v3510_v23 = vadd.f32 %v3509_v56, %v3508_v21 }
0x10f5   :  { %v4820_v54 = vpop.eup %4819 }
0x10f6   :  { %v3505_v3 = vadd.f32 1.0, %v4820_v54  ;;  %4821 = vtanh.f32 %v3510_v23 }
0x10f8   :  { %4823 = vrcp.f32 %v3505_v3 }
0x1101   :  { %v3765_v52 = vpop.f32.mrf.mxu1 }
0x1102   :  { %v7142_v7 = vadd.f32 %v7136_v43, %v3765_v52 }
0x1103   :  { %v4306_v61 = vpop.f32.mrf.mxu1  ;;  %v4822_v2 = vpop.eup %4821 }
0x1105   :  { %v4824_v20 = vpop.eup %4823  ;;  %v3768_v25 = vpop.f32.mrf.mxu1 }
0x1106   :  { %v3512_v27 = vmul.f32 %v4824_v20, %v4822_v2  ;;  %v7139_v45 = vadd.f32 %v7136_v43, %v3768_v25 }
0x1107   :  { %v4307_v13 = vpop.f32.mrf.mxu1 }
0x1108   :  { %v3608_v28 = vpack.c.bf16 %v3512_v27, %v3512_v27  ;;  %v3522_v1 = vmul.f32 %v3512_v27, %v6443_v63  ;;  %v3521_v30 = vmul.f32 %v3512_v27, %v5698_v38  ;;  %v3524_v40 = vmul.f32 %v3512_v27, %v6463_v51 }
0x1109   :  { %v3523_v29 = vmul.f32 %v3512_v27, %v6453_v42  ;;  %v3526_v32 = vmul.f32 %v3512_v27, %v6473_v41  ;;  %v3525_v34 = vmul.f32 %v3512_v27, %v6457_v50  ;;  %v3528_v36 = vmul.f32 %v3512_v27, %v6478_v18 }
0x110a   :  { %3641 = vmatprep.mubr.bf16.mxu0 %v3608_v28  ;;  %3531 = vadd.xlane.f32.xlu0 %v3522_v1  ;;  %v3527_v39 = vmul.f32 %v3512_v27, %v6467_v49 }
0x110b   :  { %3529 = vadd.xlane.f32.xlu1 %v3521_v30 }
0x110e   :  { %3535 = vadd.xlane.f32.xlu0 %v3524_v40 }
0x110f   :  { %3533 = vadd.xlane.f32.xlu1 %v3523_v29 }
0x1112   :  { %3539 = vadd.xlane.f32.xlu0 %v3526_v32 }
0x1113   :  { %3537 = vadd.xlane.f32.xlu1 %v3525_v34 }
0x1116   :  { %3543 = vadd.xlane.f32.xlu0 %v3528_v36 }
0x1117   :  { %3541 = vadd.xlane.f32.xlu1 %v3527_v39 }
0x111a   :  { %3789 = vmax.xlane.f32.xlu0 %v7139_v45 }
0x111b   :  { %3787 = vmax.xlane.f32.xlu1 %v7142_v7 }
0x1193   :  { %v3532_v12 = vpop.xlane.xlu0 %3531 }
0x1194   :  { %v3530_v44 = vpop.xlane.xlu1 %3529 }
0x1197   :  { %v3536_v0 = vpop.xlane.xlu0 %3535 }
0x1198   :  { %v3534_v60 = vpop.xlane.xlu1 %3533  ;;  %v3773_v55 = vpop.f32.mrf.mxu1 }
0x1199   :  { %v7147_v5 = vadd.f32 %v7136_v43, %v3773_v55 }
0x119a   :  { %v4310_v26 = vpop.f32.mrf.mxu1 }
0x119b   :  { %v3540_v14 = vpop.xlane.xlu0 %3539  ;;  %3791 = vmax.xlane.f32.xlu1 %v7147_v5 }
0x119c   :  { %v3538_v35 = vpop.xlane.xlu1 %3537  ;;  %v3776_v6 = vpop.f32.mrf.mxu1  ;;  %v3546_v11 = vmax.f32 %v3532_v12, %v3540_v14 }
0x119d   :  { %v7151_v19 = vadd.f32 %v7136_v43, %v3776_v6  ;;  %v3545_v31 = vmax.f32 %v3530_v44, %v3538_v35 }
0x119e   :  { %v4311_v9 = vpop.f32.mrf.mxu1 }
0x119f   :  { %v3544_v10 = vpop.xlane.xlu0 %3543  ;;  %3793 = vmax.xlane.f32.xlu0 %v7151_v19  ;;  %v3549_v53 = vmax.f32 %v3545_v31, %v3546_v11 }
0x11a0   :  { %v3548_v37 = vmax.f32 %v3536_v0, %v3544_v10  ;;  %v3542_v57 = vpop.xlane.xlu1 %3541 }
0x11a1   :  { %v3547_v17 = vmax.f32 %v3534_v60, %v3542_v57 }
0x11a3   :  { %v3550_v22 = vmax.f32 %v3547_v17, %v3548_v37 }
0x11a4   :  { %v7154_v59 = vpop.xlane.xlu1 %3787 }
0x11a5   :  { %v3551_v8 = vmax.f32 %v3549_v53, %v3550_v22  ;;  %vm3849_vm1 = vcmp.eq.f32.partialorder %v7142_v7, %v7154_v59 }
0x11a6   :  { %v7162_v47 = vsel %vm3849_vm1, %v7157_v16, 128 }
0x11a7   :  { %v3552_v15 = vsub.f32 %v3530_v44, %v3551_v8  ;;  %v3553_v48 = vsub.f32 %v3532_v12, %v3551_v8  ;;  %v3554_v33 = vsub.f32 %v3534_v60, %v3551_v8  ;;  %v3555_v4 = vsub.f32 %v3536_v0, %v3551_v8 }
0x11a8   :  { %v3556_v46 = vsub.f32 %v3538_v35, %v3551_v8  ;;  %v3557_v56 = vsub.f32 %v3540_v14, %v3551_v8  ;;  %v3860_v54 = vshra.s32 %v7162_v47, 16  ;;  %v3558_v3 = vsub.f32 %v3542_v57, %v3551_v8 }
0x11a9   :  { %v3560_v24 = vmul.f32 1.442695, %v3552_v15  ;;  %v3562_v62 = vmul.f32 1.442695, %v3553_v48  ;;  %v3564_v21 = vmul.f32 1.442695, %v3554_v33  ;;  %v3559_v2 = vsub.f32 %v3544_v10, %v3551_v8 }
0x11aa   :  { %v3566_v23 = vmul.f32 1.442695, %v3555_v4  ;;  %v3568_v52 = vmul.f32 1.442695, %v3556_v46  ;;  %v7165_v61 = vcvt.s32.f32 %v3860_v54  ;;  %v3570_v20 = vmul.f32 1.442695, %v3557_v56 }
0x11ab   :  { %4825 = vpow2.f32 %v3560_v24  ;;  %v3572_v25 = vmul.f32 1.442695, %v3558_v3  ;;  %v3574_v27 = vmul.f32 1.442695, %v3559_v2  ;;  %v4945_v54 = vld [vmem:[%s7271_s10] ss:$0 sm:$0xff] }
0x11ac   :  { %4827 = vpow2.f32 %v3562_v62  ;;  %3863 = vmin.xlane.f32.xlu0 %v7165_v61 }
0x11ad   :  { %4829 = vpow2.f32 %v3564_v21 }
0x11ae   :  { %4831 = vpow2.f32 %v3566_v23 }
0x11af   :  { %4833 = vpow2.f32 %v3568_v52 }
0x11b0   :  { %4835 = vpow2.f32 %v3570_v20 }
0x11b1   :  { %4837 = vpow2.f32 %v3572_v25  ;;  %v7190_v25 = vpop.xlane.xlu0 %3789 }
0x11b2   :  { %4839 = vpow2.f32 %v3574_v27  ;;  %v3797_v27 = vsub.f32 %v7142_v7, %v7154_v59  ;;  %vm3850_vm3 = vcmp.eq.f32.partialorder %v7139_v45, %v7190_v25 }
0x11b8   :  { %v4826_v13 = vpop.eup %4825 }
0x11b9   :  { %v4828_v28 = vpop.eup %4827 }
0x11ba   :  { %v3576_v1 = vadd.f32 %v4828_v28, %v4826_v13  ;;  %v4830_v30 = vpop.eup %4829 }
0x11bb   :  { %v4832_v29 = vpop.eup %4831 }
0x11bc   :  { %v3577_v40 = vadd.f32 %v4830_v30, %v3576_v1  ;;  %v4834_v34 = vpop.eup %4833 }
0x11bd   :  { %v4836_v39 = vpop.eup %4835 }
0x11be   :  { %v3578_v32 = vadd.f32 %v4832_v29, %v3577_v40  ;;  %v4838_v44 = vpop.eup %4837 }
0x11bf   :  { %v4840_v60 = vpop.eup %4839 }
0x11c0   :  { %v3579_v36 = vadd.f32 %v4834_v34, %v3578_v32 }
0x11c2   :  { %v3580_v12 = vadd.f32 %v4836_v39, %v3579_v36 }
0x11c4   :  { %v3581_v0 = vadd.f32 %v4838_v44, %v3580_v12 }
0x11c6   :  { %v3582_v55 = vadd.f32 %v4840_v60, %v3581_v0 }
0x11c8   :  { %4841 = vrcp.f32 %v3582_v55 }
0x11d5   :  { %v4842_v26 = vpop.eup %4841 }
0x11d6   :  { %v3584_v14 = vmul.f32 %v4842_v26, %v4826_v13  ;;  %v3585_v35 = vmul.f32 %v4842_v26, %v4828_v28  ;;  %v3586_v6 = vmul.f32 %v4842_v26, %v4830_v30  ;;  %v3587_v9 = vmul.f32 %v4842_v26, %v4832_v29 }
0x11d7   :  { %v3588_v10 = vmul.f32 %v4842_v26, %v4834_v34  ;;  %v3589_v17 = vmul.f32 %v4842_v26, %v4836_v39  ;;  %v3590_v8 = vmul.f32 %v4842_v26, %v4838_v44  ;;  %v3591_v48 = vmul.f32 %v4842_v26, %v4840_v60 }
0x11d8   :  { %v3592_v11 = vmul.f32 %v3584_v14, %v5698_v38  ;;  %v3593_v31 = vmul.f32 %v3585_v35, %v6443_v63  ;;  %v3594_v37 = vmul.f32 %v3586_v6, %v6453_v42  ;;  %v3595_v53 = vmul.f32 %v3587_v9, %v6463_v51 }
0x11d9   :  { %v3596_v58 = vmul.f32 %v3588_v10, %v6457_v50  ;;  %v3597_v33 = vmul.f32 %v3589_v17, %v6473_v41  ;;  %v3598_v38 = vmul.f32 %v3590_v8, %v6467_v49  ;;  %v3599_v63 = vmul.f32 %v3591_v48, %v6478_v18 }
0x11da   :  { %v3600_v57 = vadd.f32 %v3593_v31, %v3592_v11  ;;  %v3802_v28 = vmul.f32 1.442695, %v3797_v27  ;;  %v3855_v30 = vsel %vm3850_vm3, %v7157_v16, 128  ;;  %v3859_v48 = vand.u32 65535, %v7162_v47 }
0x11db   :  { %v3874_v34 = vshra.s32 %v3855_v30, 16 }
0x11dc   :  { %v3601_v22 = vadd.f32 %v3600_v57, %v3594_v37 }
0x11dd   :  { %v3876_v44 = vcvt.s32.f32 %v3874_v34 }
0x11de   :  { %v3602_v15 = vadd.f32 %v3601_v22, %v3595_v53 }
0x11e0   :  { %v3603_v4 = vadd.f32 %v3602_v15, %v3596_v58 }
0x11e2   :  { %v3604_v24 = vadd.f32 %v3603_v4, %v3597_v33 }
0x11e4   :  { %v3605_v62 = vadd.f32 %v3604_v24, %v3598_v38  ;;  %v3861_v24 = vcvt.s32.f32 %v3859_v48 }
0x11e6   :  { %v3606_v42 = vadd.f32 %v3605_v62, %v3599_v63  ;;  %v3873_v62 = vand.u32 65535, %v3855_v30 }
0x11e8   :  { %v3607_v46 = vpack.c.bf16 %v3606_v42, %v3606_v42 }
0x11ea   :  { %3642 = vmatmul.mubr.bf16.vlgmr.msra.gmra.mxu0 %v3607_v46 }
0x1224   :  { %v7176_v21 = vpop.xlane.xlu1 %3791 }
0x1225   :  { %vm3851_vm2 = vcmp.eq.f32.partialorder %v7147_v5, %v7176_v21  ;;  %v3799_v1 = vsub.f32 %v7147_v5, %v7176_v21 }
0x1226   :  { %v7181_v50 = vsel %vm3851_vm2, %v7157_v16, 128 }
0x1227   :  { %v3888_v51 = vshra.s32 %v7181_v50, 16  ;;  %v3806_v29 = vmul.f32 1.442695, %v3799_v1  ;;  %v3887_v63 = vand.u32 65535, %v7181_v50 }
0x1228   :  { %v7196_v13 = vpop.xlane.xlu0 %3793 }
0x1229   :  { %v7184_v41 = vcvt.s32.f32 %v3888_v51  ;;  %vm3852_vm4 = vcmp.eq.f32.partialorder %v7151_v19, %v7196_v13  ;;  %v3800_v6 = vsub.f32 %v7151_v19, %v7196_v13  ;;  %v3889_v47 = vcvt.s32.f32 %v3887_v63 }
0x122a   :  { %v3857_v39 = vsel %vm3852_vm4, %v7157_v16, 128  ;;  %v3875_v51 = vcvt.s32.f32 %v3873_v62 }
0x122b   :  { %3891 = vmin.xlane.f32.xlu0 %v7184_v41  ;;  %v3902_v0 = vshra.s32 %v3857_v39, 16  ;;  %v3808_v9 = vmul.f32 1.442695, %v3800_v6 }
0x122d   :  { %v3904_v55 = vcvt.s32.f32 %v3902_v0 }
0x1235   :  { %v3864_v58 = vpop.xlane.xlu0 %3863 }
0x1236   :  { %vm3865_vm6 = vcmp.eq.f32.partialorder %v7165_v61, %v3864_v58 }
0x1237   :  { %v3866_v46 = vsel %vm3865_vm6, %v3861_v24, inf }
0x12aa   :  { %v4271_v49 = vpop.f32.mrf.mxu0 }
0x12ac   :  { %v4272_v18 = vpop.f32.mrf.mxu0 }
0x12ad   :  { %v4273_v56 = vadd.f32 %v4272_v18, %v4271_v49  ;;  %v3901_v49 = vand.u32 65535, %v3857_v39 }
0x12ae   :  { %v4274_v23 = vpop.f32.mrf.mxu0 }
0x12af   :  { %v3644_v3 = vadd.f32 %v4945_v54, %v4273_v56  ;;  %v3903_v50 = vcvt.s32.f32 %v3901_v49 }
0x12b0   :  { %v4275_v52 = vpop.f32.mrf.mxu0 }
0x12b1   :  { %4843 = vtanh.f32 %v3644_v3 }
0x12b2   :  { %4845 = vpow2.f32 %v3802_v28 }
0x12b3   :  { %4847 = vpow2.f32 %v3806_v29  ;;  %v3870_v29 = vcvt.f32.s32 %v3864_v58 }
0x12b4   :  { %v3892_v4 = vpop.xlane.xlu0 %3891 }
0x12b5   :  { %vm3893_vm7 = vcmp.eq.f32.partialorder %v7184_v41, %v3892_v4  ;;  %v3898_v34 = vcvt.f32.s32 %v3892_v4 }
0x12b6   :  { %v3894_v18 = vsel %vm3893_vm7, %v3889_v47, inf }
0x12be   :  { %v4844_v2 = vpop.eup %4843 }
0x12bf   :  { %v3659_v20 = vpack.c.bf16 %v4844_v2, %v4844_v2  ;;  %v4846_v26 = vpop.eup %4845 }
0x12c0   :  { %v4848_v14 = vpop.eup %4847 }
0x12c1   :  { %4313 = vmatmul.mubr.bf16.gmra.mxu1 %v3659_v20 }
0x1381   :  { %v3781_v40 = vpop.f32.mrf.mxu1 }
0x1382   :  { %v7204_v32 = vadd.f32 %v7136_v43, %v3781_v40  ;;  %v3798_v43 = vsub.f32 %v7139_v45, %v7190_v25 }
0x1383   :  { %v4314_v36 = vpop.f32.mrf.mxu1 }
0x1384   :  { %3795 = vmax.xlane.f32.xlu1 %v7204_v32  ;;  %v3804_v35 = vmul.f32 1.442695, %v3798_v43 }
0x1385   :  { %v3784_v12 = vpop.f32.mrf.mxu1 }
0x1386   :  { %4849 = vpow2.f32 %v3804_v35  ;;  %v3871_v12 = vshll.u32 %v3870_v29, 16 }
0x1387   :  { %v4315_v60 = vpop.f32.mrf.mxu1  ;;  %4851 = vpow2.f32 %v3808_v9 }
0x1388   :  { %3877 = vmin.xlane.f32.xlu1 %v3876_v44 }
0x138c   :  { %3905 = vmin.xlane.f32.xlu1 %v3904_v55 }
0x1390   :  { %3812 = vadd.xlane.f32.xlu1 %v4846_v26 }
0x1393   :  { %v4850_v8 = vpop.eup %4849 }
0x1394   :  { %3816 = vadd.xlane.f32.xlu1 %v4848_v14  ;;  %v4852_v33 = vpop.eup %4851  ;;  %v7504_v14 = vld [vmem:[#allocation6_spill] sm:$0xff] }
0x1395   :  { %v3931_v43 = vsub.s32 %v7157_v16, %v7504_v14 }
0x140d   :  { %v7212_v11 = vpop.xlane.xlu1 %3795 }
0x140e   :  { %v3801_v31 = vsub.f32 %v7204_v32, %v7212_v11  ;;  %vm3853_vm5 = vcmp.eq.f32.partialorder %v7204_v32, %v7212_v11 }
0x140f   :  { %v3858_v10 = vsel %vm3853_vm5, %v7157_v16, 128 }
0x1410   :  { %v3810_v37 = vmul.f32 1.442695, %v3801_v31  ;;  %v3916_v57 = vshra.s32 %v3858_v10, 16  ;;  %v3915_v28 = vand.u32 65535, %v3858_v10 }
0x1411   :  { %v7219_v17 = vpop.xlane.xlu1 %3877 }
0x1412   :  { %4853 = vpow2.f32 %v3810_v37  ;;  %v3918_v53 = vcvt.s32.f32 %v3916_v57  ;;  %vm3879_vm8 = vcmp.eq.f32.partialorder %v3876_v44, %v7219_v17  ;;  %v3917_v30 = vcvt.s32.f32 %v3915_v28 }
0x1413   :  { %v3880_v61 = vsel %vm3879_vm8, %v3875_v51, inf  ;;  %v3899_v44 = vshll.u32 %v3898_v34, 16 }
0x1414   :  { %3919 = vmin.xlane.f32.xlu0 %v3918_v53 }
0x1415   :  { %v7221_v22 = vpop.xlane.xlu1 %3905 }
0x1416   :  { %vm3907_vm9 = vcmp.eq.f32.partialorder %v3904_v55, %v7221_v22  ;;  %v3912_v60 = vcvt.f32.s32 %v7221_v22 }
0x1417   :  { %v3908_v23 = vsel %vm3907_vm9, %v3903_v50, inf }
0x1418   :  { %3814 = vadd.xlane.f32.xlu0 %v4850_v8 }
0x1419   :  { %v3813_v15 = vpop.xlane.xlu1 %3812 }
0x141a   :  { %4855 = vlog2.f32 %v3813_v15 }
0x141c   :  { %3818 = vadd.xlane.f32.xlu0 %v4852_v33 }
0x141d   :  { %v3817_v38 = vpop.xlane.xlu1 %3816 }
0x141e   :  { %4857 = vlog2.f32 %v3817_v38 }
0x141f   :  { %v4854_v42 = vpop.eup %4853 }
0x1420   :  { %3867 = vmin.xlane.f32.xlu0 %v3866_v46  ;;  %3820 = vadd.xlane.f32.xlu1 %v4854_v42 }
0x1424   :  { %3895 = vmin.xlane.f32.xlu0 %v3894_v18  ;;  %3881 = vmin.xlane.f32.xlu1 %v3880_v61 }
0x1427   :  { %v4856_v56 = vpop.eup %4855 }
0x1428   :  { %v3823_v54 = vmul.f32 0.6931472, %v4856_v56  ;;  %3909 = vmin.xlane.f32.xlu1 %v3908_v23 }
0x142a   :  { %v3832_v3 = vadd.f32 %v3823_v54, %v7154_v59 }
0x142b   :  { %v4858_v52 = vpop.eup %4857 }
0x142c   :  { %v3837_v41 = vsub.f32 %v7142_v7, %v3832_v3  ;;  %v3827_v2 = vmul.f32 0.6931472, %v4858_v52 }
0x142e   :  { %3842 = vst [vmem:[%s7274_s13] sm:$0xff] %v3837_v41  ;;  %v3834_v20 = vadd.f32 %v3827_v2, %v7176_v21  ;;  %v3884_v21 = vcvt.f32.s32 %v7219_v17  ;;  %v3913_v17 = vshll.u32 %v3912_v60, 16 }
0x1430   :  { %v3839_v27 = vsub.f32 %v7147_v5, %v3834_v20  ;;  %v3885_v0 = vshll.u32 %v3884_v21, 16 }
0x1432   :  { %3844 = vst [vmem:[%s7274_s13 + $0x10] sm:$0xff] %v3839_v27 }
0x149d   :  { %v3920_v1 = vpop.xlane.xlu0 %3919 }
0x149e   :  { %vm3921_vm10 = vcmp.eq.f32.partialorder %v3918_v53, %v3920_v1 }
0x149f   :  { %v3922_v59 = vsel %vm3921_vm10, %v3917_v30, inf }
0x14a0   :  { %3923 = vmin.xlane.f32.xlu0 %v3922_v59 }
0x14a1   :  { %v3815_v7 = vpop.xlane.xlu0 %3814 }
0x14a2   :  { %4859 = vlog2.f32 %v3815_v7 }
0x14a5   :  { %v3819_v40 = vpop.xlane.xlu0 %3818 }
0x14a6   :  { %4861 = vlog2.f32 %v3819_v40 }
0x14a9   :  { %v3868_v36 = vpop.xlane.xlu0 %3867  ;;  %v3821_v5 = vpop.xlane.xlu1 %3820 }
0x14aa   :  { %v3869_v39 = vcvt.f32.s32 %v3868_v36  ;;  %4863 = vlog2.f32 %v3821_v5 }
0x14ac   :  { %v3872_v35 = vadd.s32 %v3871_v12, %v3869_v39 }
0x14ad   :  { %v3896_v55 = vpop.xlane.xlu0 %3895  ;;  %v3882_v26 = vpop.xlane.xlu1 %3881 }
0x14ae   :  { %v3897_v6 = vcvt.f32.s32 %v3896_v55  ;;  %v3883_v9 = vcvt.f32.s32 %v3882_v26  ;;  %v3932_v58 = vrot.slane %v3872_v35, %v3931_v43 }
0x14af   :  { %v4860_v31 = vpop.eup %4859 }
0x14b0   :  { %v3825_v10 = vmul.f32 0.6931472, %v4860_v31  ;;  %v3900_v37 = vadd.s32 %v3899_v44, %v3897_v6  ;;  %v3886_v57 = vadd.s32 %v3885_v0, %v3883_v9 }
0x14b1   :  { %v3910_v53 = vpop.xlane.xlu1 %3909 }
0x14b2   :  { %v3833_v8 = vadd.f32 %v3825_v10, %v7190_v25  ;;  %v3936_v15 = vrot.slane %v3886_v57, %v3931_v43  ;;  %v3911_v22 = vcvt.f32.s32 %v3910_v53  ;;  %v3940_v33 = vrot.slane %v3900_v37, %v3931_v43 }
0x14b3   :  { %v4862_v48 = vpop.eup %4861 }
0x14b4   :  { %v3838_v16 = vsub.f32 %v7139_v45, %v3833_v8  ;;  %v3829_v4 = vmul.f32 0.6931472, %v4862_v48  ;;  %v3950_v38 = vsel %vm3949_vm11, %v3936_v15, %v3932_v58  ;;  %v3914_v24 = vadd.s32 %v3913_v17, %v3911_v22 }
0x14b5   :  { %v3952_v42 = vsel %vm3951_vm12, %v3940_v33, %v3950_v38 }
0x14b6   :  { %3843 = vst [vmem:[%s7274_s13 + $0x8] sm:$0xff] %v3838_v16  ;;  %v3835_v63 = vadd.f32 %v3829_v4, %v7196_v13  ;;  %v3944_v62 = vrot.slane %v3914_v24, %v3931_v43  ;;  %v3926_v13 = vcvt.f32.s32 %v3920_v1 }
0x14b7   :  { %v4864_v25 = vpop.eup %4863 }
0x14b8   :  { %v3840_v46 = vsub.f32 %v7151_v19, %v3835_v63  ;;  %v3831_v47 = vmul.f32 0.6931472, %v4864_v25  ;;  %v3954_v51 = vsel %vm3953_vm13, %v3944_v62, %v3952_v42  ;;  %v3927_v61 = vshll.u32 %v3926_v13, 16 }
0x14ba   :  { %3845 = vst [vmem:[%s7274_s13 + $0x18] sm:$0xff] %v3840_v46  ;;  %v3836_v45 = vadd.f32 %v3831_v47, %v7212_v11 }
0x14bc   :  { %v3841_v49 = vsub.f32 %v7204_v32, %v3836_v45 }
0x14be   :  { %3846 = vst [vmem:[%s7274_s13 + $0x20] sm:$0xff] %v3841_v49 }
0x1529   :  { %v3924_v18 = vpop.xlane.xlu0 %3923 }
0x152a   :  { %v3925_v50 = vcvt.f32.s32 %v3924_v18 }
0x152c   :  { %v3928_v56 = vadd.s32 %v3927_v61, %v3925_v50 }
0x152e   :  { %v3948_v19 = vrot.slane %v3928_v56, %v3931_v43 }
0x1530   :  { %v3956_v23 = vsel %vm3955_vm14, %v3948_v19, %v3954_v51 }
0x1531   :  { %3958 = vst.msk [vmem:[%s7275_s14] sm:$0x1f] %vm3957_vm15, %v3956_v23 }

</bundles_post_ra>
